<compile_context>
chip_gen: v5e
topology: v5e:2x2
jax: 0.10.0
libtpu: 0.0.40
codegen_flags: <defaults>
</compile_context>

<pallas_src>
import functools

import jax
import jax.numpy as jnp
from jax import lax
from jax.experimental import pallas as pl
from jax.experimental.pallas import tpu as pltpu

CONVOLUTIONAL_FILTERS = 64
_BN_EPS = 1e-5


def _fused_residual_kernel(x_ref, w1_ref, s1_ref, w2_ref, s2_ref, o_ref,
                           pad_ref, col_ref):
    """One grid step = NB images, both conv+BN+ReLU blocks fused.

    x_ref   : (NB, H, W, C)       bf16 NHWC input block
    w1_ref  : (9*C, C)            bf16 im2col conv-1 weights (BN1 scale folded in)
    s1_ref  : (1, C)              f32  folded BN1 shift
    w2_ref  : (9*C, C)            bf16 im2col conv-2 weights (BN2 scale folded in)
    s2_ref  : (1, C)              f32  folded BN2 shift
    o_ref   : (NB, H, W, C)       f32  output block
    pad_ref : (NB, H+2, W+2, C)   bf16 VMEM scratch: zero-haloed activations
    col_ref : (NB*H*W, 9*C)       bf16 VMEM scratch: im2col matrix
    """
    NB, Hp, Wp, C = pad_ref.shape
    H, W = Hp - 2, Wp - 2
    M = NB * H * W

    # Zero the padded scratch once per step; afterwards only the interior is
    # written, so the 1-pixel halo stays zero for both convs (padding=1).
    pad_ref[...] = jnp.zeros_like(pad_ref)

    def conv_bn_relu(w_ref, s_ref):
        # im2col: 9 shifted (NB,H,W,C) windows -> (M, 9*C), then ONE K=9*C MXU
        # matmul (full systolic depth) instead of 9 small K=C matmuls.
        for dy in range(3):
            for dx in range(3):
                t = dy * 3 + dx
                patch = pad_ref[:, pl.ds(dy, H), pl.ds(dx, W), :]
                col_ref[:, pl.ds(t * C, C)] = patch.reshape(M, C)
        acc = jnp.dot(col_ref[...], w_ref[...],
                      preferred_element_type=jnp.float32)        # (M, C) f32
        # Folded BatchNorm shift (scale already baked into w) + ReLU, in f32.
        return jnp.maximum(acc + s_ref[...], 0.0)

    # ---- block 1: conv -> BN -> ReLU ----
    pad_ref[:, pl.ds(1, H), pl.ds(1, W), :] = x_ref[...]
    y1 = conv_bn_relu(w1_ref, s1_ref)

    # ---- block 2: intermediate never leaves VMEM ----
    pad_ref[:, pl.ds(1, H), pl.ds(1, W), :] = (
        y1.reshape(NB, H, W, C).astype(pad_ref.dtype))
    y2 = conv_bn_relu(w2_ref, s2_ref)

    o_ref[...] = y2.reshape(NB, H, W, C)


def _pick_batch_block(n, h, w):
    """Fold enough images into one grid step that the matmul M dim is >= 128."""
    target = max(1, pl.cdiv(128, h * w))
    nb = min(n, target)
    while n % nb:           # keep the grid evenly divisible
        nb -= 1
    return nb


def residual_layer_forward(x_nchw, kernel_params):
    """Forward pass of ResidualLayer.  Input/output in PyTorch NCHW layout."""
    (w1, s1), (w2, s2) = kernel_params
    # NCHW -> NHWC (channels on the lane axis); bf16 activations for the MXU.
    x = jnp.transpose(x_nchw, (0, 2, 3, 1)).astype(jnp.bfloat16)
    N, H, W, C = x.shape
    NB = _pick_batch_block(N, H, W)

    flops = 2 * (2 * N * H * W * (9 * C) * C)                     # two convs
    bytes_accessed = (N * H * W * C * 2                           # bf16 input
                      + 2 * (9 * C * C * 2 + C * 4)               # weights+shifts
                      + N * H * W * C * 4)                        # f32 output

    out = pl.pallas_call(
        _fused_residual_kernel,
        out_shape=jax.ShapeDtypeStruct((N, H, W, C), jnp.float32),
        grid_spec=pltpu.PrefetchScalarGridSpec(
            num_scalar_prefetch=0,
            grid=(N // NB,),
            in_specs=[
                pl.BlockSpec((NB, H, W, C), lambda b: (b, 0, 0, 0)),
                pl.BlockSpec((9 * C, C), lambda b: (0, 0)),
                pl.BlockSpec((1, C), lambda b: (0, 0)),
                pl.BlockSpec((9 * C, C), lambda b: (0, 0)),
                pl.BlockSpec((1, C), lambda b: (0, 0)),
            ],
            out_specs=pl.BlockSpec((NB, H, W, C), lambda b: (b, 0, 0, 0)),
            scratch_shapes=[
                pltpu.VMEM((NB, H + 2, W + 2, C), jnp.bfloat16),   # haloed acts
                pltpu.VMEM((NB * H * W, 9 * C), jnp.bfloat16),     # im2col
            ],
        ),
        compiler_params=pltpu.CompilerParams(
            dimension_semantics=("parallel",)),
        cost_estimate=pl.CostEstimate(
            flops=flops, transcendentals=0, bytes_accessed=bytes_accessed),
    )(x, w1, s1, w2, s2)

    return jnp.transpose(out, (0, 3, 1, 2))                       # NHWC -> NCHW


def make_raw_params(key, c=CONVOLUTIONAL_FILTERS):
    """Synthetic PyTorch-equivalent params: (conv_w HWIO, conv_b, gamma, beta, mean, var) x2."""
    raw = []
    for _ in range(2):
        key, k_w, k_b, k_g, k_be, k_m, k_v = jax.random.split(key, 7)
        w = jax.random.normal(k_w, (3, 3, c, c), jnp.float32) * 0.05    # HWIO
        b = jax.random.normal(k_b, (c,), jnp.float32) * 0.05
        gamma = 1.0 + 0.1 * jax.random.normal(k_g, (c,), jnp.float32)
        beta = 0.1 * jax.random.normal(k_be, (c,), jnp.float32)
        mean = 0.1 * jax.random.normal(k_m, (c,), jnp.float32)
        var = jax.random.uniform(k_v, (c,), jnp.float32, 0.5, 1.5)
        raw.append((w, b, gamma, beta, mean, var))
    return raw


def prepare_kernel_params(raw_params, eps=_BN_EPS):
    """Fold eval-mode BN into the conv weights / bias and im2col-flatten them."""
    prepared = []
    for (w, b, gamma, beta, mean, var) in raw_params:
        cin, cout = w.shape[2], w.shape[3]
        scale = gamma / jnp.sqrt(var + eps)                       # (Cout,)
        w_folded = (w * scale).astype(jnp.bfloat16)               # scale along Cout
        w_im2col = w_folded.reshape(9 * cin, cout)                # tap-major rows
        shift = (beta + scale * (b - mean)).reshape(1, cout).astype(jnp.float32)
        prepared.append((w_im2col, shift))
    return prepared


def _reference_forward(x_nchw, raw_params, eps=_BN_EPS):
    """Pure-JAX f32 reference: conv(p=1) -> eval-mode BN -> ReLU, twice."""
    x = jnp.transpose(x_nchw, (0, 2, 3, 1))
    for (w, b, gamma, beta, mean, var) in raw_params:
        y = lax.conv_general_dilated(
            x, w, window_strides=(1, 1), padding=((1, 1), (1, 1)),
            dimension_numbers=("NHWC", "HWIO", "NHWC"),
            precision=lax.Precision.HIGHEST) + b
        y = (y - mean) / jnp.sqrt(var + eps) * gamma + beta
        x = jnp.maximum(y, 0.0)
    return jnp.transpose(x, (0, 3, 1, 2))


if __name__ == "__main__":
    key = jax.random.PRNGKey(0)
    k_x, k_p = jax.random.split(key)

    N, C, H, W = 2, CONVOLUTIONAL_FILTERS, 8, 8
    x = jax.random.normal(k_x, (N, C, H, W), jnp.float32)
    raw_params = make_raw_params(k_p)
    kernel_params = prepare_kernel_params(raw_params)

    fwd = jax.jit(functools.partial(residual_layer_forward,
                                    kernel_params=kernel_params))
    out = fwd(x)
    jax.block_until_ready(out)
    assert out.shape == (N, C, H, W), out.shape

    # Loose-tolerance check vs a pure-JAX f32 reference (kernel runs bf16
    # inputs/weights with f32 accumulation, so allow a small drift).
    ref = _reference_forward(x, raw_params)
    rel_err = float(jnp.max(jnp.abs(out - ref)) / (jnp.max(jnp.abs(ref)) + 1e-6))
    assert rel_err < 8e-2, f"max relative error too large: {rel_err}"

    print("KERNEL_OK")
</pallas_src>

<mosaic_0001>
module attributes {stable_mosaic.version = 11 : i64} {
  func.func @_fused_residual_kernel(%arg0: i32, %arg1: memref<2x8x8x64xbf16, #tpu.memory_space<vmem>>, %arg2: memref<576x64xbf16, #tpu.memory_space<vmem>>, %arg3: memref<1x64xf32, #tpu.memory_space<vmem>>, %arg4: memref<576x64xbf16, #tpu.memory_space<vmem>>, %arg5: memref<1x64xf32, #tpu.memory_space<vmem>>, %arg6: memref<2x8x8x64xf32, #tpu.memory_space<vmem>>, %arg7: memref<2x10x10x64xbf16, #tpu.memory_space<vmem>>, %arg8: memref<128x576xbf16, #tpu.memory_space<vmem>>) attributes {dimension_semantics = [#tpu.dimension_semantics<parallel>], iteration_bounds = array<i64: 1>, scalar_prefetch = 0 : i64, scratch_operands = 2 : i64, tpu.core_type = #tpu.core_type<tc>, window_params = [{transform_indices = @transform_0, window_bounds = array<i64: 2, 8, 8, 64>}, {pipeline_mode = #tpu.pipeline_mode<synchronous>, transform_indices = @transform_1, window_bounds = array<i64: 576, 64>}, {pipeline_mode = #tpu.pipeline_mode<synchronous>, transform_indices = @transform_2, window_bounds = array<i64: 1, 64>}, {pipeline_mode = #tpu.pipeline_mode<synchronous>, transform_indices = @transform_3, window_bounds = array<i64: 576, 64>}, {pipeline_mode = #tpu.pipeline_mode<synchronous>, transform_indices = @transform_4, window_bounds = array<i64: 1, 64>}, {transform_indices = @transform_5, window_bounds = array<i64: 2, 8, 8, 64>}]} {
    %cst = arith.constant 0.000000e+00 : bf16
    %0 = vector.broadcast %cst : bf16 to vector<2x10x10x64xbf16>
    %c0 = arith.constant 0 : index
    %c0_0 = arith.constant 0 : index
    %c0_1 = arith.constant 0 : index
    %c0_2 = arith.constant 0 : index
    %1 = vector.load %arg7[%c0, %c0_0, %c0_1, %c0_2] : memref<2x10x10x64xbf16, #tpu.memory_space<vmem>>, vector<2x10x10x64xbf16>
    tpu.vector_store %arg7[%c0, %c0_0, %c0_1, %c0_2], %0 {strides = array<i32>} : memref<2x10x10x64xbf16, #tpu.memory_space<vmem>>, vector<2x10x10x64xbf16>,
    %c0_3 = arith.constant 0 : index
    %c0_4 = arith.constant 0 : index
    %c0_5 = arith.constant 0 : index
    %c0_6 = arith.constant 0 : index
    %2 = vector.load %arg1[%c0_3, %c0_4, %c0_5, %c0_6] : memref<2x8x8x64xbf16, #tpu.memory_space<vmem>>, vector<2x8x8x64xbf16>
    %c0_7 = arith.constant 0 : index
    %c1 = arith.constant 1 : index
    %c1_8 = arith.constant 1 : index
    %c0_9 = arith.constant 0 : index
    %3 = vector.load %arg7[%c0_7, %c1, %c1_8, %c0_9] : memref<2x10x10x64xbf16, #tpu.memory_space<vmem>>, vector<2x8x8x64xbf16>
    tpu.vector_store %arg7[%c0_7, %c1, %c1_8, %c0_9], %2 {strides = array<i32>} : memref<2x10x10x64xbf16, #tpu.memory_space<vmem>>, vector<2x8x8x64xbf16>,
    %c0_10 = arith.constant 0 : index
    %c0_11 = arith.constant 0 : index
    %c0_12 = arith.constant 0 : index
    %c0_13 = arith.constant 0 : index
    %4 = vector.load %arg7[%c0_10, %c0_11, %c0_12, %c0_13] : memref<2x10x10x64xbf16, #tpu.memory_space<vmem>>, vector<2x8x8x64xbf16>
    %5 = vector.shape_cast %4 : vector<2x8x8x64xbf16> to vector<128x64xbf16>
    %c0_14 = arith.constant 0 : index
    %c0_15 = arith.constant 0 : index
    %6 = vector.load %arg8[%c0_14, %c0_15] : memref<128x576xbf16, #tpu.memory_space<vmem>>, vector<128x64xbf16>
    tpu.vector_store %arg8[%c0_14, %c0_15], %5 {strides = array<i32>} : memref<128x576xbf16, #tpu.memory_space<vmem>>, vector<128x64xbf16>,
    %c0_16 = arith.constant 0 : index
    %c0_17 = arith.constant 0 : index
    %c1_18 = arith.constant 1 : index
    %c0_19 = arith.constant 0 : index
    %7 = vector.load %arg7[%c0_16, %c0_17, %c1_18, %c0_19] : memref<2x10x10x64xbf16, #tpu.memory_space<vmem>>, vector<2x8x8x64xbf16>
    %8 = vector.shape_cast %7 : vector<2x8x8x64xbf16> to vector<128x64xbf16>
    %c0_20 = arith.constant 0 : index
    %c64 = arith.constant 64 : index
    %9 = vector.load %arg8[%c0_20, %c64] : memref<128x576xbf16, #tpu.memory_space<vmem>>, vector<128x64xbf16>
    tpu.vector_store %arg8[%c0_20, %c64], %8 {strides = array<i32>} : memref<128x576xbf16, #tpu.memory_space<vmem>>, vector<128x64xbf16>,
    %c0_21 = arith.constant 0 : index
    %c0_22 = arith.constant 0 : index
    %c2 = arith.constant 2 : index
    %c0_23 = arith.constant 0 : index
    %10 = vector.load %arg7[%c0_21, %c0_22, %c2, %c0_23] : memref<2x10x10x64xbf16, #tpu.memory_space<vmem>>, vector<2x8x8x64xbf16>
    %11 = vector.shape_cast %10 : vector<2x8x8x64xbf16> to vector<128x64xbf16>
    %c0_24 = arith.constant 0 : index
    %c128 = arith.constant 128 : index
    %12 = vector.load %arg8[%c0_24, %c128] : memref<128x576xbf16, #tpu.memory_space<vmem>>, vector<128x64xbf16>
    tpu.vector_store %arg8[%c0_24, %c128], %11 {strides = array<i32>} : memref<128x576xbf16, #tpu.memory_space<vmem>>, vector<128x64xbf16>,
    %c0_25 = arith.constant 0 : index
    %c1_26 = arith.constant 1 : index
    %c0_27 = arith.constant 0 : index
    %c0_28 = arith.constant 0 : index
    %13 = vector.load %arg7[%c0_25, %c1_26, %c0_27, %c0_28] : memref<2x10x10x64xbf16, #tpu.memory_space<vmem>>, vector<2x8x8x64xbf16>
    %14 = vector.shape_cast %13 : vector<2x8x8x64xbf16> to vector<128x64xbf16>
    %c0_29 = arith.constant 0 : index
    %c192 = arith.constant 192 : index
    %15 = vector.load %arg8[%c0_29, %c192] : memref<128x576xbf16, #tpu.memory_space<vmem>>, vector<128x64xbf16>
    tpu.vector_store %arg8[%c0_29, %c192], %14 {strides = array<i32>} : memref<128x576xbf16, #tpu.memory_space<vmem>>, vector<128x64xbf16>,
    %c0_30 = arith.constant 0 : index
    %c1_31 = arith.constant 1 : index
    %c1_32 = arith.constant 1 : index
    %c0_33 = arith.constant 0 : index
    %16 = vector.load %arg7[%c0_30, %c1_31, %c1_32, %c0_33] : memref<2x10x10x64xbf16, #tpu.memory_space<vmem>>, vector<2x8x8x64xbf16>
    %17 = vector.shape_cast %16 : vector<2x8x8x64xbf16> to vector<128x64xbf16>
    %c0_34 = arith.constant 0 : index
    %c256 = arith.constant 256 : index
    %18 = vector.load %arg8[%c0_34, %c256] : memref<128x576xbf16, #tpu.memory_space<vmem>>, vector<128x64xbf16>
    tpu.vector_store %arg8[%c0_34, %c256], %17 {strides = array<i32>} : memref<128x576xbf16, #tpu.memory_space<vmem>>, vector<128x64xbf16>,
    %c0_35 = arith.constant 0 : index
    %c1_36 = arith.constant 1 : index
    %c2_37 = arith.constant 2 : index
    %c0_38 = arith.constant 0 : index
    %19 = vector.load %arg7[%c0_35, %c1_36, %c2_37, %c0_38] : memref<2x10x10x64xbf16, #tpu.memory_space<vmem>>, vector<2x8x8x64xbf16>
    %20 = vector.shape_cast %19 : vector<2x8x8x64xbf16> to vector<128x64xbf16>
    %c0_39 = arith.constant 0 : index
    %c320 = arith.constant 320 : index
    %21 = vector.load %arg8[%c0_39, %c320] : memref<128x576xbf16, #tpu.memory_space<vmem>>, vector<128x64xbf16>
    tpu.vector_store %arg8[%c0_39, %c320], %20 {strides = array<i32>} : memref<128x576xbf16, #tpu.memory_space<vmem>>, vector<128x64xbf16>,
    %c0_40 = arith.constant 0 : index
    %c2_41 = arith.constant 2 : index
    %c0_42 = arith.constant 0 : index
    %c0_43 = arith.constant 0 : index
    %22 = vector.load %arg7[%c0_40, %c2_41, %c0_42, %c0_43] : memref<2x10x10x64xbf16, #tpu.memory_space<vmem>>, vector<2x8x8x64xbf16>
    %23 = vector.shape_cast %22 : vector<2x8x8x64xbf16> to vector<128x64xbf16>
    %c0_44 = arith.constant 0 : index
    %c384 = arith.constant 384 : index
    %24 = vector.load %arg8[%c0_44, %c384] : memref<128x576xbf16, #tpu.memory_space<vmem>>, vector<128x64xbf16>
    tpu.vector_store %arg8[%c0_44, %c384], %23 {strides = array<i32>} : memref<128x576xbf16, #tpu.memory_space<vmem>>, vector<128x64xbf16>,
    %c0_45 = arith.constant 0 : index
    %c2_46 = arith.constant 2 : index
    %c1_47 = arith.constant 1 : index
    %c0_48 = arith.constant 0 : index
    %25 = vector.load %arg7[%c0_45, %c2_46, %c1_47, %c0_48] : memref<2x10x10x64xbf16, #tpu.memory_space<vmem>>, vector<2x8x8x64xbf16>
    %26 = vector.shape_cast %25 : vector<2x8x8x64xbf16> to vector<128x64xbf16>
    %c0_49 = arith.constant 0 : index
    %c448 = arith.constant 448 : index
    %27 = vector.load %arg8[%c0_49, %c448] : memref<128x576xbf16, #tpu.memory_space<vmem>>, vector<128x64xbf16>
    tpu.vector_store %arg8[%c0_49, %c448], %26 {strides = array<i32>} : memref<128x576xbf16, #tpu.memory_space<vmem>>, vector<128x64xbf16>,
    %c0_50 = arith.constant 0 : index
    %c2_51 = arith.constant 2 : index
    %c2_52 = arith.constant 2 : index
    %c0_53 = arith.constant 0 : index
    %28 = vector.load %arg7[%c0_50, %c2_51, %c2_52, %c0_53] : memref<2x10x10x64xbf16, #tpu.memory_space<vmem>>, vector<2x8x8x64xbf16>
    %29 = vector.shape_cast %28 : vector<2x8x8x64xbf16> to vector<128x64xbf16>
    %c0_54 = arith.constant 0 : index
    %c512 = arith.constant 512 : index
    %30 = vector.load %arg8[%c0_54, %c512] : memref<128x576xbf16, #tpu.memory_space<vmem>>, vector<128x64xbf16>
    tpu.vector_store %arg8[%c0_54, %c512], %29 {strides = array<i32>} : memref<128x576xbf16, #tpu.memory_space<vmem>>, vector<128x64xbf16>,
    %c0_55 = arith.constant 0 : index
    %c0_56 = arith.constant 0 : index
    %31 = vector.load %arg8[%c0_55, %c0_56] : memref<128x576xbf16, #tpu.memory_space<vmem>>, vector<128x576xbf16>
    %c0_57 = arith.constant 0 : index
    %c0_58 = arith.constant 0 : index
    %32 = vector.load %arg2[%c0_57, %c0_58] : memref<576x64xbf16, #tpu.memory_space<vmem>>, vector<576x64xbf16>
    %cst_59 = arith.constant dense<0.000000e+00> : vector<128x64xf32>
    %33 = tpu.matmul %31, %32, %cst_59 {dimension_numbers = #tpu.dot_dimension_numbers<[1], [0], [0], [1], [0, 0, 1, 1], [], []>} : vector<128x576xbf16>, vector<576x64xbf16>, vector<128x64xf32> -> vector<128x64xf32>
    %c0_60 = arith.constant 0 : index
    %c0_61 = arith.constant 0 : index
    %34 = vector.load %arg3[%c0_60, %c0_61] : memref<1x64xf32, #tpu.memory_space<vmem>>, vector<1x64xf32>
    %35 = vector.broadcast %34 : vector<1x64xf32> to vector<128x64xf32>
    %36 = arith.addf %33, %35 : vector<128x64xf32>
    %cst_62 = arith.constant 0.000000e+00 : f32
    %37 = vector.broadcast %cst_62 : f32 to vector<128x64xf32>
    %38 = arith.maximumf %36, %37 : vector<128x64xf32>
    %39 = vector.shape_cast %38 : vector<128x64xf32> to vector<2x8x8x64xf32>
    %40 = arith.truncf %39 : vector<2x8x8x64xf32> to vector<2x8x8x64xbf16>
    %c0_63 = arith.constant 0 : index
    %c1_64 = arith.constant 1 : index
    %c1_65 = arith.constant 1 : index
    %c0_66 = arith.constant 0 : index
    %41 = vector.load %arg7[%c0_63, %c1_64, %c1_65, %c0_66] : memref<2x10x10x64xbf16, #tpu.memory_space<vmem>>, vector<2x8x8x64xbf16>
    tpu.vector_store %arg7[%c0_63, %c1_64, %c1_65, %c0_66], %40 {strides = array<i32>} : memref<2x10x10x64xbf16, #tpu.memory_space<vmem>>, vector<2x8x8x64xbf16>,
    %c0_67 = arith.constant 0 : index
    %c0_68 = arith.constant 0 : index
    %c0_69 = arith.constant 0 : index
    %c0_70 = arith.constant 0 : index
    %42 = vector.load %arg7[%c0_67, %c0_68, %c0_69, %c0_70] : memref<2x10x10x64xbf16, #tpu.memory_space<vmem>>, vector<2x8x8x64xbf16>
    %43 = vector.shape_cast %42 : vector<2x8x8x64xbf16> to vector<128x64xbf16>
    %c0_71 = arith.constant 0 : index
    %c0_72 = arith.constant 0 : index
    %44 = vector.load %arg8[%c0_71, %c0_72] : memref<128x576xbf16, #tpu.memory_space<vmem>>, vector<128x64xbf16>
    tpu.vector_store %arg8[%c0_71, %c0_72], %43 {strides = array<i32>} : memref<128x576xbf16, #tpu.memory_space<vmem>>, vector<128x64xbf16>,
    %c0_73 = arith.constant 0 : index
    %c0_74 = arith.constant 0 : index
    %c1_75 = arith.constant 1 : index
    %c0_76 = arith.constant 0 : index
    %45 = vector.load %arg7[%c0_73, %c0_74, %c1_75, %c0_76] : memref<2x10x10x64xbf16, #tpu.memory_space<vmem>>, vector<2x8x8x64xbf16>
    %46 = vector.shape_cast %45 : vector<2x8x8x64xbf16> to vector<128x64xbf16>
    %c0_77 = arith.constant 0 : index
    %c64_78 = arith.constant 64 : index
    %47 = vector.load %arg8[%c0_77, %c64_78] : memref<128x576xbf16, #tpu.memory_space<vmem>>, vector<128x64xbf16>
    tpu.vector_store %arg8[%c0_77, %c64_78], %46 {strides = array<i32>} : memref<128x576xbf16, #tpu.memory_space<vmem>>, vector<128x64xbf16>,
    %c0_79 = arith.constant 0 : index
    %c0_80 = arith.constant 0 : index
    %c2_81 = arith.constant 2 : index
    %c0_82 = arith.constant 0 : index
    %48 = vector.load %arg7[%c0_79, %c0_80, %c2_81, %c0_82] : memref<2x10x10x64xbf16, #tpu.memory_space<vmem>>, vector<2x8x8x64xbf16>
    %49 = vector.shape_cast %48 : vector<2x8x8x64xbf16> to vector<128x64xbf16>
    %c0_83 = arith.constant 0 : index
    %c128_84 = arith.constant 128 : index
    %50 = vector.load %arg8[%c0_83, %c128_84] : memref<128x576xbf16, #tpu.memory_space<vmem>>, vector<128x64xbf16>
    tpu.vector_store %arg8[%c0_83, %c128_84], %49 {strides = array<i32>} : memref<128x576xbf16, #tpu.memory_space<vmem>>, vector<128x64xbf16>,
    %c0_85 = arith.constant 0 : index
    %c1_86 = arith.constant 1 : index
    %c0_87 = arith.constant 0 : index
    %c0_88 = arith.constant 0 : index
    %51 = vector.load %arg7[%c0_85, %c1_86, %c0_87, %c0_88] : memref<2x10x10x64xbf16, #tpu.memory_space<vmem>>, vector<2x8x8x64xbf16>
    %52 = vector.shape_cast %51 : vector<2x8x8x64xbf16> to vector<128x64xbf16>
    %c0_89 = arith.constant 0 : index
    %c192_90 = arith.constant 192 : index
    %53 = vector.load %arg8[%c0_89, %c192_90] : memref<128x576xbf16, #tpu.memory_space<vmem>>, vector<128x64xbf16>
    tpu.vector_store %arg8[%c0_89, %c192_90], %52 {strides = array<i32>} : memref<128x576xbf16, #tpu.memory_space<vmem>>, vector<128x64xbf16>,
    %c0_91 = arith.constant 0 : index
    %c1_92 = arith.constant 1 : index
    %c1_93 = arith.constant 1 : index
    %c0_94 = arith.constant 0 : index
    %54 = vector.load %arg7[%c0_91, %c1_92, %c1_93, %c0_94] : memref<2x10x10x64xbf16, #tpu.memory_space<vmem>>, vector<2x8x8x64xbf16>
    %55 = vector.shape_cast %54 : vector<2x8x8x64xbf16> to vector<128x64xbf16>
    %c0_95 = arith.constant 0 : index
    %c256_96 = arith.constant 256 : index
    %56 = vector.load %arg8[%c0_95, %c256_96] : memref<128x576xbf16, #tpu.memory_space<vmem>>, vector<128x64xbf16>
    tpu.vector_store %arg8[%c0_95, %c256_96], %55 {strides = array<i32>} : memref<128x576xbf16, #tpu.memory_space<vmem>>, vector<128x64xbf16>,
    %c0_97 = arith.constant 0 : index
    %c1_98 = arith.constant 1 : index
    %c2_99 = arith.constant 2 : index
    %c0_100 = arith.constant 0 : index
    %57 = vector.load %arg7[%c0_97, %c1_98, %c2_99, %c0_100] : memref<2x10x10x64xbf16, #tpu.memory_space<vmem>>, vector<2x8x8x64xbf16>
    %58 = vector.shape_cast %57 : vector<2x8x8x64xbf16> to vector<128x64xbf16>
    %c0_101 = arith.constant 0 : index
    %c320_102 = arith.constant 320 : index
    %59 = vector.load %arg8[%c0_101, %c320_102] : memref<128x576xbf16, #tpu.memory_space<vmem>>, vector<128x64xbf16>
    tpu.vector_store %arg8[%c0_101, %c320_102], %58 {strides = array<i32>} : memref<128x576xbf16, #tpu.memory_space<vmem>>, vector<128x64xbf16>,
    %c0_103 = arith.constant 0 : index
    %c2_104 = arith.constant 2 : index
    %c0_105 = arith.constant 0 : index
    %c0_106 = arith.constant 0 : index
    %60 = vector.load %arg7[%c0_103, %c2_104, %c0_105, %c0_106] : memref<2x10x10x64xbf16, #tpu.memory_space<vmem>>, vector<2x8x8x64xbf16>
    %61 = vector.shape_cast %60 : vector<2x8x8x64xbf16> to vector<128x64xbf16>
    %c0_107 = arith.constant 0 : index
    %c384_108 = arith.constant 384 : index
    %62 = vector.load %arg8[%c0_107, %c384_108] : memref<128x576xbf16, #tpu.memory_space<vmem>>, vector<128x64xbf16>
    tpu.vector_store %arg8[%c0_107, %c384_108], %61 {strides = array<i32>} : memref<128x576xbf16, #tpu.memory_space<vmem>>, vector<128x64xbf16>,
    %c0_109 = arith.constant 0 : index
    %c2_110 = arith.constant 2 : index
    %c1_111 = arith.constant 1 : index
    %c0_112 = arith.constant 0 : index
    %63 = vector.load %arg7[%c0_109, %c2_110, %c1_111, %c0_112] : memref<2x10x10x64xbf16, #tpu.memory_space<vmem>>, vector<2x8x8x64xbf16>
    %64 = vector.shape_cast %63 : vector<2x8x8x64xbf16> to vector<128x64xbf16>
    %c0_113 = arith.constant 0 : index
    %c448_114 = arith.constant 448 : index
    %65 = vector.load %arg8[%c0_113, %c448_114] : memref<128x576xbf16, #tpu.memory_space<vmem>>, vector<128x64xbf16>
    tpu.vector_store %arg8[%c0_113, %c448_114], %64 {strides = array<i32>} : memref<128x576xbf16, #tpu.memory_space<vmem>>, vector<128x64xbf16>,
    %c0_115 = arith.constant 0 : index
    %c2_116 = arith.constant 2 : index
    %c2_117 = arith.constant 2 : index
    %c0_118 = arith.constant 0 : index
    %66 = vector.load %arg7[%c0_115, %c2_116, %c2_117, %c0_118] : memref<2x10x10x64xbf16, #tpu.memory_space<vmem>>, vector<2x8x8x64xbf16>
    %67 = vector.shape_cast %66 : vector<2x8x8x64xbf16> to vector<128x64xbf16>
    %c0_119 = arith.constant 0 : index
    %c512_120 = arith.constant 512 : index
    %68 = vector.load %arg8[%c0_119, %c512_120] : memref<128x576xbf16, #tpu.memory_space<vmem>>, vector<128x64xbf16>
    tpu.vector_store %arg8[%c0_119, %c512_120], %67 {strides = array<i32>} : memref<128x576xbf16, #tpu.memory_space<vmem>>, vector<128x64xbf16>,
    %c0_121 = arith.constant 0 : index
    %c0_122 = arith.constant 0 : index
    %69 = vector.load %arg8[%c0_121, %c0_122] : memref<128x576xbf16, #tpu.memory_space<vmem>>, vector<128x576xbf16>
    %c0_123 = arith.constant 0 : index
    %c0_124 = arith.constant 0 : index
    %70 = vector.load %arg4[%c0_123, %c0_124] : memref<576x64xbf16, #tpu.memory_space<vmem>>, vector<576x64xbf16>
    %cst_125 = arith.constant dense<0.000000e+00> : vector<128x64xf32>
    %71 = tpu.matmul %69, %70, %cst_125 {dimension_numbers = #tpu.dot_dimension_numbers<[1], [0], [0], [1], [0, 0, 1, 1], [], []>} : vector<128x576xbf16>, vector<576x64xbf16>, vector<128x64xf32> -> vector<128x64xf32>
    %c0_126 = arith.constant 0 : index
    %c0_127 = arith.constant 0 : index
    %72 = vector.load %arg5[%c0_126, %c0_127] : memref<1x64xf32, #tpu.memory_space<vmem>>, vector<1x64xf32>
    %73 = vector.broadcast %72 : vector<1x64xf32> to vector<128x64xf32>
    %74 = arith.addf %71, %73 : vector<128x64xf32>
    %cst_128 = arith.constant 0.000000e+00 : f32
    %75 = vector.broadcast %cst_128 : f32 to vector<128x64xf32>
    %76 = arith.maximumf %74, %75 : vector<128x64xf32>
    %77 = vector.shape_cast %76 : vector<128x64xf32> to vector<2x8x8x64xf32>
    %c0_129 = arith.constant 0 : index
    %c0_130 = arith.constant 0 : index
    %c0_131 = arith.constant 0 : index
    %c0_132 = arith.constant 0 : index
    %78 = vector.load %arg6[%c0_129, %c0_130, %c0_131, %c0_132] : memref<2x8x8x64xf32, #tpu.memory_space<vmem>>, vector<2x8x8x64xf32>
    tpu.vector_store %arg6[%c0_129, %c0_130, %c0_131, %c0_132], %77 {strides = array<i32>} : memref<2x8x8x64xf32, #tpu.memory_space<vmem>>, vector<2x8x8x64xf32>,
    return
  }
  func.func @transform_0(%arg0: i32) -> (i32, i32, i32, i32) {
    %c0_i32 = arith.constant 0 : i32
    %c0_i32_0 = arith.constant 0 : i32
    %c0_i32_1 = arith.constant 0 : i32
    %c0_i32_2 = arith.constant 0 : i32
    return %arg0, %c0_i32, %c0_i32_0, %c0_i32_1 : i32, i32, i32, i32
  }
  func.func @transform_1(%arg0: i32) -> (i32, i32) {
    %c0_i32 = arith.constant 0 : i32
    %c0_i32_0 = arith.constant 0 : i32
    %c0_i32_1 = arith.constant 0 : i32
    return %c0_i32, %c0_i32_0 : i32, i32
  }
  func.func @transform_2(%arg0: i32) -> (i32, i32) {
    %c0_i32 = arith.constant 0 : i32
    %c0_i32_0 = arith.constant 0 : i32
    %c0_i32_1 = arith.constant 0 : i32
    return %c0_i32, %c0_i32_0 : i32, i32
  }
  func.func @transform_3(%arg0: i32) -> (i32, i32) {
    %c0_i32 = arith.constant 0 : i32
    %c0_i32_0 = arith.constant 0 : i32
    %c0_i32_1 = arith.constant 0 : i32
    return %c0_i32, %c0_i32_0 : i32, i32
  }
  func.func @transform_4(%arg0: i32) -> (i32, i32) {
    %c0_i32 = arith.constant 0 : i32
    %c0_i32_0 = arith.constant 0 : i32
    %c0_i32_1 = arith.constant 0 : i32
    return %c0_i32, %c0_i32_0 : i32, i32
  }
  func.func @transform_5(%arg0: i32) -> (i32, i32, i32, i32) {
    %c0_i32 = arith.constant 0 : i32
    %c0_i32_0 = arith.constant 0 : i32
    %c0_i32_1 = arith.constant 0 : i32
    %c0_i32_2 = arith.constant 0 : i32
    return %arg0, %c0_i32, %c0_i32_0, %c0_i32_1 : i32, i32, i32, i32
  }
}

</mosaic_0001>

<bundles_post_ra>
// kernel: residual_layer_forward.1
= control target key start
LH: loop header
LB: loop body
LE: loop exit
PB: predicated region body
PF: predicated region fallthrough
CT: control target
= control target key end

     0   :  { %10 = vsyncpa [#allocation5], 0  ;;  %s8274_s0 = inlined_call_operand.vmem [shape: bf16[2,8,8,64], index: 0, kind: input, shape index: {}]   ;;  %s8275_s1 = inlined_call_operand.hbm [shape: bf16[576,64], index: 1, kind: input, shape index: {}]   ;;  %s8276_s2 = inlined_call_operand.vmem [shape: f32[1,64], index: 2, kind: input, shape index: {}]   ;;  %s8277_s3 = inlined_call_operand.hbm [shape: bf16[576,64], index: 3, kind: input, shape index: {}]   ;;  %s8278_s4 = inlined_call_operand.vmem [shape: f32[1,64], index: 4, kind: input, shape index: {}]   ;;  %s8279_s5 = inlined_call_operand.hbm [shape: f32[2,8,8,64], index: 5, kind: output, shape index: {}]  }
   0x1   :  { %11 = vsyncpa [#allocation8], 0 }
   0x2   :  { %12 = vsyncpa [#allocation6], 0  ;;  %s19_s20 = sshll.u32 %s8275_s1, 4  ;;  %s6519_s21 = smov [#allocation4]   ;;  %s20_s20 = int_to_ptr.hbm [resolvable:$true] %s19_s20 }
   0x3   :  { %s21_s22 = sshll.u32 %s6519_s21, 4  ;;  %s34_s25 = sshll.u32 %s8277_s3, 4  ;;  %s22_s22 = int_to_ptr.vmem [resolvable:$true] %s21_s22  ;;  %s35_s25 = int_to_ptr.hbm [resolvable:$true] %s34_s25 }
   0x4   :  { %s6520_s26 = smov 64   ;;  %s6521_s27 = smov 4  }
   0x5   :  { %27 = dma.hbm_to_vmem [thread:$0]  %s20_s20, 4608, %s22_s22, [#allocation5], %s6520_s26, %s6520_s26, %s6521_s27  }
   0x6   :  { %s6522_s28 = smov [#allocation7]  }
   0x7   :  { %s36_s29 = sshll.u32 %s6522_s28, 4  ;;  %s37_s29 = int_to_ptr.vmem [resolvable:$true] %s36_s29 }
   0x8   :  { %42 = dma.hbm_to_vmem [thread:$0]  %s35_s25, 4608, %s37_s29, [#allocation8], %s6520_s26, %s6520_s26, %s6521_s27  }
   0x9   :  { %6513 = dma.done.wait [#allocation5], 4608  }
   0xa   :  { %6514 = vsyncadd [#allocation5], 4294962688 }
   0xb   :  { %6515 = dma.done.wait [#allocation8], 4608  }
   0xc   :  { %6516 = vsyncadd [#allocation8], 4294962688  ;;  %vm54_vm0 = vcmask 519168   ;;  %v6523_v0 = vmov 0   ;;  %v104_v1 = vld [vmem:[%s8274_s0 + $0x20] sm:$0xf] }
   0xd   :  { %78 = vst.msk [vmem:[#allocation2 + $0x58] sm:$0xf] %vm54_vm0, %v6523_v0  ;;  %v177_v2 = vshrl.u32 %v104_v1, 16  ;;  %v180_v3 = vshll.u32 %v104_v1, 16  ;;  %vm274_vm1 = vsmask.f32 7938 }
   0xe   :  { %55 = vst.msk [vmem:[#allocation2] sm:$0xf] %vm54_vm0, %v6523_v0  ;;  %vm6593_vm2 = vmand %vm54_vm0, %vm274_vm1  ;;  %v6617_v9 = vld [vmem:[%s8274_s0 + $0x24] sm:$0xf]  ;;  %v6622_v10 = vld [vmem:[%s8274_s0 + $0x28] sm:$0xf] }
   0xf   :  { %58 = vst.msk [vmem:[#allocation2 + $0x8] sm:$0xf] %vm54_vm0, %v6523_v0  ;;  %v6588_v4 = vrot.slane %v177_v2, 7  ;;  %vm56_vm3 = vcmask 516096   ;;  %v185_v14 = vshrl.u32 %v6617_v9, 16  ;;  %v193_v16 = vshrl.u32 %v6622_v10, 16 }
  0x10   :  { %60 = vst.msk [vmem:[#allocation2 + $0x10] sm:$0xf] %vm54_vm0, %v6523_v0  ;;  %v6642_v23 = vld [vmem:[%s8274_s0] sm:$0xf]  ;;  %v6647_v24 = vld [vmem:[%s8274_s0 + $0x4] sm:$0xf] }
  0x11   :  { %62 = vst.msk [vmem:[#allocation2 + $0x18] sm:$0xf] %vm54_vm0, %v6523_v0  ;;  %v182_v7 = vor.u32 %v180_v3, %v6588_v4  ;;  %vm439_vm4 = vsmask.f32 3328  ;;  %vm280_vm5 = vsmask.f32 256 }
  0x12   :  { %64 = vst.msk [vmem:[#allocation2 + $0x20] sm:$0xf] %vm54_vm0, %v6523_v0  ;;  %vm440_vm6 = vsmask.f32 7440  ;;  %v188_v30 = vshll.u32 %v6617_v9, 16  ;;  %v6658_v32 = vrot.slane %v185_v14, 7  ;;  %vm6722_vm8 = vmand %vm56_vm3, %vm280_vm5 }
  0x13   :  { %66 = vst.msk [vmem:[#allocation2 + $0x28] sm:$0xf] %vm54_vm0, %v6523_v0  ;;  %v6660_v33 = vrot.slane %v193_v16, 7  ;;  %v113_v34 = vshrl.u32 %v6642_v23, 16  ;;  %v121_v35 = vshrl.u32 %v6647_v24, 16  ;;  %vm6670_vm7 = vmor %vm439_vm4, %vm440_vm6  ;;  %v183_v46 = vrot.slane %v6588_v4, 4 }
  0x14   :  { %68 = vst.msk [vmem:[#allocation2 + $0x30] sm:$0xf] %vm54_vm0, %v6523_v0  ;;  %v327_v6 = vld [vmem:[#allocation2 + $0x58] sm:$0xf]  ;;  %v6679_v45 = vld [vmem:[%s8274_s0 + $0x2c] sm:$0xf]  ;;  %v190_v57 = vor.u32 %v188_v30, %v6658_v32 }
  0x15   :  { %70 = vst.msk [vmem:[#allocation2 + $0x38] sm:$0xf] %vm54_vm0, %v6523_v0  ;;  %v328_v8 = vsel %vm6593_vm2, %v182_v7, %v327_v6  ;;  %v407_v15 = vld [vmem:[#allocation2] sm:$0xf]  ;;  %v191_v48 = vrot.slane %v6658_v32, 4  ;;  %v196_v49 = vshll.u32 %v6622_v10, 16 }
  0x16   :  { %72 = vst.msk [vmem:[#allocation2 + $0x40] sm:$0xf] %vm54_vm0, %v6523_v0  ;;  %v443_v21 = vshrl.u32 %v407_v15, 16  ;;  %v446_v22 = vshll.u32 %v407_v15, 16  ;;  %v199_v51 = vrot.slane %v6660_v33, 4  ;;  %v115_v55 = vrot.slane %v113_v34, 7 }
  0x17   :  { %74 = vst.msk [vmem:[#allocation2 + $0x48] sm:$0xf] %vm54_vm0, %v6523_v0  ;;  %v6692_v52 = vld [vmem:[%s8274_s0 + $0x30] sm:$0xf]  ;;  %v201_v56 = vshrl.u32 %v6679_v45, 16  ;;  %v116_v59 = vshll.u32 %v6642_v23, 16  ;;  %v198_v2 = vor.u32 %v196_v49, %v6660_v33 }
  0x18   :  { %76 = vst.msk [vmem:[#allocation2 + $0x50] sm:$0xf] %vm54_vm0, %v6523_v0  ;;  %v445_v27 = vrot.slane %v443_v21, 4  ;;  %v448_v28 = vrot.slane %v446_v22, 5  ;;  %v6706_v60 = vrot.slane %v121_v35, 7  ;;  %v124_v63 = vshll.u32 %v6647_v24, 16 }
  0x19   :  { %80 = vst.msk [vmem:[#allocation2 + $0x60] sm:$0xf] %vm54_vm0, %v6523_v0  ;;  %v99_v61 = vld [vmem:[%s8274_s0 + $0xc] sm:$0xf]  ;;  %v209_v1 = vshrl.u32 %v6692_v52, 16  ;;  %v119_v4 = vrot.slane %v115_v55, 4 }
  0x1a   :  { %82 = vst.msk [vmem:[#allocation2 + $0x68] sm:$0xf] %vm54_vm0, %v6523_v0  ;;  %v449_v31 = vor.u32 %v448_v28, %v445_v27  ;;  %v127_v6 = vrot.slane %v6706_v60, 4  ;;  %v6730_v9 = vrot.slane %v201_v56, 7  ;;  %v204_v10 = vshll.u32 %v6679_v45, 16  ;;  %s5528_s15 = sshll.u32 %s8279_s5, 4  ;;  %s5529_s15 = int_to_ptr.hbm [resolvable:$true] %s5528_s15 }
  0x1b   :  { %329 = vst [vmem:[#allocation2 + $0x58] sm:$0xf] %v328_v8  ;;  %v109_v14 = vld [vmem:[%s8274_s0 + $0x34] sm:$0xf]  ;;  %v6743_v15 = vld [vmem:[%s8274_s0 + $0x38] sm:$0xf]  ;;  %v126_v28 = vor.u32 %v124_v63, %v6706_v60 }
  0x1c   :  { %84 = vst.msk [vmem:[#allocation2 + $0x70] sm:$0xf] %vm54_vm0, %v6523_v0  ;;  %v450_v43 = vrot.slane %v449_v31, 4  ;;  %v285_v24 = vld [vmem:[#allocation2 + $0x10] sm:$0xf]  ;;  %v225_v30 = vshrl.u32 %v6743_v15, 16  ;;  %v206_v33 = vor.u32 %v204_v10, %v6730_v9 }
  0x1d   :  { %86 = vst.msk [vmem:[#allocation2 + $0x78] sm:$0xf] %vm54_vm0, %v6523_v0  ;;  %v207_v34 = vrot.slane %v6730_v9, 4  ;;  %v286_v45 = vsel %vm6593_vm2, %v126_v28, %v285_v24  ;;  %vm795_vm9 = vcmask 1042432   ;;  %vm796_vm10 = vcmask 1046532   ;;  %s6525_s16 = smov 128  }
  0x1e   :  { %88 = vst.msk [vmem:[#allocation2 + $0x80] sm:$0xf] %vm54_vm0, %v6523_v0  ;;  %v6777_v49 = vrot.slane %v225_v30, 7  ;;  %vm6913_vm11 = vmor %vm795_vm9, %vm796_vm10  ;;  %vm714_vm12 = vcmask 1043968   ;;  %vm2523_vm13 = vcmask 523264   ;;  %s6526_s17 = smov 8  }
  0x1f   :  { %90 = vst.msk [vmem:[#allocation2 + $0x88] sm:$0xf] %vm54_vm0, %v6523_v0  ;;  %v423_v11 = vld [vmem:[#allocation2 + $0x50] sm:$0xf] }
  0x20   :  { %92 = vst.msk [vmem:[#allocation2 + $0x90] sm:$0xf] %vm54_vm0, %v6523_v0  ;;  %v555_v12 = vshrl.u32 %v423_v11, 16  ;;  %v558_v13 = vshll.u32 %v423_v11, 16  ;;  %v333_v62 = vld [vmem:[#allocation2 + $0x60] sm:$0xf] }
  0x21   :  { %94 = vst.msk [vmem:[#allocation2 + $0x98] sm:$0xf] %vm54_vm0, %v6523_v0  ;;  %v339_v3 = vld [vmem:[#allocation2 + $0x68] sm:$0xf]  ;;  %v137_v11 = vshrl.u32 %v99_v61, 16 }
  0x22   :  { %v902_v17 = vld [vmem:[#allocation2 + $0x58] sm:$0xf]  ;;  %77 = vst.msk [vmem:[#allocation2 + $0x54] sm:$0x1] %vm56_vm3, %v6523_v0  ;;  %v557_v18 = vrot.slane %v555_v12, 4  ;;  %v560_v19 = vrot.slane %v558_v13, 5  ;;  %v334_v12 = vsel %vm6593_vm2, %v190_v57, %v333_v62  ;;  %v340_v22 = vsel %vm6593_vm2, %v198_v2, %v339_v3 }
  0x23   :  { %942 = vrot.lane.b32.xlu1 %v902_v17, %s6520_s26  ;;  %57 = vst.msk [vmem:[#allocation2 + $0x4] sm:$0x1] %vm56_vm3, %v6523_v0  ;;  %v425_v20 = vld [vmem:[#allocation2 + $0x58] sm:$0xf]  ;;  %v276_v13 = vld [vmem:[#allocation2 + $0x8] sm:$0xf]  ;;  %v118_v17 = vor.u32 %v116_v59, %v115_v55 }
  0x24   :  { %59 = vst.msk [vmem:[#allocation2 + $0xc] sm:$0x1] %vm56_vm3, %v6523_v0  ;;  %v561_v25 = vor.u32 %v560_v19, %v557_v18  ;;  %v569_v26 = vshrl.u32 %v425_v20, 16  ;;  %v572_v29 = vshll.u32 %v425_v20, 16  ;;  %v6747_v19 = vrot.slane %v209_v1, 7 }
  0x25   :  { %61 = vst.msk [vmem:[#allocation2 + $0x14] sm:$0x1] %vm56_vm3, %v6523_v0  ;;  %v212_v20 = vshll.u32 %v6692_v52, 16  ;;  %v277_v35 = vsel %vm6593_vm2, %v118_v17, %v276_v13  ;;  %v6791_v57 = vld [vmem:[#allocation2 + $0x80] sm:$0xf]  ;;  %v231_v59 = vrot.slane %v6777_v49, 4 }
  0x26   :  { %63 = vst.msk [vmem:[#allocation2 + $0x1c] sm:$0x1] %vm56_vm3, %v6523_v0  ;;  %v562_v37 = vrot.slane %v561_v25, 4  ;;  %v571_v38 = vrot.slane %v569_v26, 4  ;;  %v574_v40 = vrot.slane %v572_v29, 5  ;;  %v140_v25 = vshll.u32 %v99_v61, 16 }
  0x27   :  { %65 = vst.msk [vmem:[#allocation2 + $0x24] sm:$0x1] %vm56_vm3, %v6523_v0  ;;  %v217_v26 = vshrl.u32 %v109_v14, 16  ;;  %v139_v29 = vrot.slane %v137_v11, 7  ;;  %v363_v30 = vld [vmem:[#allocation2 + $0x88] sm:$0xf] }
  0x28   :  { %67 = vst.msk [vmem:[#allocation2 + $0x2c] sm:$0x1] %vm56_vm3, %v6523_v0  ;;  %v575_v54 = vor.u32 %v574_v40, %v571_v38  ;;  %v6769_v40 = vld [vmem:[#allocation2 + $0x20] sm:$0xf] }
  0x29   :  { %v424_v36 = vld [vmem:[#allocation2 + $0x54] sm:$0x1]  ;;  %69 = vst.msk [vmem:[#allocation2 + $0x34] sm:$0x1] %vm56_vm3, %v6523_v0 }
  0x2a   :  { %v564_v39 = vshll.u32 %v424_v36, 16  ;;  %71 = vst.msk [vmem:[#allocation2 + $0x3c] sm:$0x1] %vm56_vm3, %v6523_v0  ;;  %v408_v41 = vld [vmem:[#allocation2 + $0x4] sm:$0x1]  ;;  %v6728_v8 = vrot.slane %v575_v54, 4 }
  0x2b   :  { %73 = vst.msk [vmem:[#allocation2 + $0x44] sm:$0x1] %vm56_vm3, %v6523_v0  ;;  %v452_v44 = vshll.u32 %v408_v41, 16  ;;  %v282_v18 = vld [vmem:[#allocation2 + $0xc] sm:$0x1] }
  0x2c   :  { %v566_v47 = vrot.slane %v564_v39, 5  ;;  %75 = vst.msk [vmem:[#allocation2 + $0x4c] sm:$0x1] %vm56_vm3, %v6523_v0  ;;  %v288_v32 = vld [vmem:[#allocation2 + $0x14] sm:$0x1]  ;;  %v283_v38 = vsel %vm6722_vm8, %v119_v4, %v282_v18  ;;  %v214_v39 = vor.u32 %v212_v20, %v6747_v19 }
  0x2d   :  { %79 = vst.msk [vmem:[#allocation2 + $0x5c] sm:$0x1] %vm56_vm3, %v6523_v0  ;;  %v454_v50 = vrot.slane %v452_v44, 5  ;;  %v345_v36 = vld [vmem:[#allocation2 + $0x70] sm:$0xf]  ;;  %v220_v44 = vshll.u32 %v109_v14, 16 }
  0x2e   :  { %v567_v53 = vsel %vm6670_vm7, %v562_v37, %v566_v47  ;;  %81 = vst.msk [vmem:[#allocation2 + $0x64] sm:$0x1] %vm56_vm3, %v6523_v0  ;;  %v351_v37 = vld [vmem:[#allocation2 + $0x78] sm:$0xf]  ;;  %v300_v41 = vld [vmem:[#allocation2 + $0x24] sm:$0x1]  ;;  %v6775_v47 = vor.u32 %v140_v25, %v139_v29  ;;  %v346_v52 = vsel %vm6593_vm2, %v206_v33, %v345_v36 }
  0x2f   :  { %682 = vrot.lane.b32.xlu0 %v567_v53, %s6520_s26  ;;  %83 = vst.msk [vmem:[#allocation2 + $0x6c] sm:$0x1] %vm56_vm3, %v6523_v0  ;;  %v455_v58 = vsel %vm6670_vm7, %v450_v43, %v454_v50  ;;  %v6771_v43 = vrot.slane %v217_v26, 7  ;;  %v6782_v50 = vld [vmem:[%s8274_s0 + $0x8] sm:$0xf]  ;;  %v215_v53 = vrot.slane %v6747_v19, 4  ;;  %v352_v63 = vsel %vm6593_vm2, %v214_v39, %v351_v37 }
  0x30   :  { %85 = vst.msk [vmem:[#allocation2 + $0x74] sm:$0x1] %vm56_vm3, %v6523_v0  ;;  %666 = vrot.lane.b32.xlu2 %v455_v58, %s6520_s26  ;;  %v129_v55 = vshrl.u32 %v6782_v50, 16  ;;  %v228_v58 = vshll.u32 %v6743_v15, 16  ;;  %v132_v60 = vshll.u32 %v6782_v50, 16 }
  0x31   :  { %87 = vst.msk [vmem:[#allocation2 + $0x7c] sm:$0x1] %vm56_vm3, %v6523_v0  ;;  %v223_v56 = vrot.slane %v6771_v43, 4  ;;  %v6799_v1 = vor.u32 %v220_v44, %v6771_v43 }
  0x32   :  { %89 = vst.msk [vmem:[#allocation2 + $0x84] sm:$0x1] %vm56_vm3, %v6523_v0  ;;  %v6814_v14 = vrot.slane %v129_v55, 7  ;;  %v230_v24 = vor.u32 %v228_v58, %v6777_v49 }
  0x33   :  { %91 = vst.msk [vmem:[#allocation2 + $0x8c] sm:$0x1] %vm56_vm3, %v6523_v0 }
  0x34   :  { %93 = vst.msk [vmem:[#allocation2 + $0x94] sm:$0x1] %vm56_vm3, %v6523_v0  ;;  %v330_v16 = vld [vmem:[#allocation2 + $0x5c] sm:$0x1] }
  0x35   :  { %95 = vst.msk [vmem:[#allocation2 + $0x9c] sm:$0x1] %vm56_vm3, %v6523_v0  ;;  %v331_v21 = vsel %vm6722_vm8, %v183_v46, %v330_v16  ;;  %v336_v23 = vld [vmem:[#allocation2 + $0x64] sm:$0x1] }
  0x36   :  { %335 = vst [vmem:[#allocation2 + $0x60] sm:$0xf] %v334_v12  ;;  %v342_v27 = vld [vmem:[#allocation2 + $0x6c] sm:$0x1]  ;;  %v337_v31 = vsel %vm6722_vm8, %v191_v48, %v336_v23  ;;  %v143_v48 = vrot.slane %v139_v29, 4  ;;  %v358_v23 = vsel %vm6593_vm2, %v6799_v1, %v6791_v57 }
  0x37   :  { %332 = vst [vmem:[#allocation2 + $0x5c] sm:$0x1] %v331_v21  ;;  %v343_v0 = vsel %vm6722_vm8, %v199_v51, %v342_v27  ;;  %v348_v46 = vld [vmem:[#allocation2 + $0x74] sm:$0x1]  ;;  %v289_v51 = vsel %vm6722_vm8, %v127_v6, %v288_v32  ;;  %v298_v6 = vsel %vm6593_vm2, %v6775_v47, %v6769_v40  ;;  %v135_v47 = vrot.slane %v6814_v14, 4 }
  0x38   :  { %341 = vst [vmem:[#allocation2 + $0x68] sm:$0xf] %v340_v22  ;;  %v354_v54 = vld [vmem:[#allocation2 + $0x7c] sm:$0x1]  ;;  %v6808_v9 = vsel %vm6722_vm8, %v143_v48, %v300_v41  ;;  %v349_v13 = vsel %vm6722_vm8, %v207_v34, %v348_v46 }
  0x39   :  { %344 = vst [vmem:[#allocation2 + $0x6c] sm:$0x1] %v343_v0  ;;  %v355_v12 = vsel %vm6722_vm8, %v215_v53, %v354_v54  ;;  %v134_v53 = vor.u32 %v132_v60, %v6814_v14  ;;  %v291_v54 = vld [vmem:[#allocation2 + $0x18] sm:$0xf]  ;;  %v101_v14 = vld [vmem:[%s8274_s0 + $0x14] sm:$0xf] }
  0x3a   :  { %338 = vst [vmem:[#allocation2 + $0x64] sm:$0x1] %v337_v31 }
  0x3b   :  { %278 = vst [vmem:[#allocation2 + $0x8] sm:$0xf] %v277_v35  ;;  %v366_v35 = vld [vmem:[#allocation2 + $0x8c] sm:$0x1]  ;;  %v292_v49 = vsel %vm6593_vm2, %v134_v53, %v291_v54 }
  0x3c   :  { %284 = vst [vmem:[#allocation2 + $0xc] sm:$0x1] %v283_v38  ;;  %v367_v60 = vsel %vm6722_vm8, %v231_v59, %v366_v35 }
  0x3d   :  { %v903_v61 = vld [vmem:[#allocation2 + $0x60] sm:$0xf]  ;;  %287 = vst [vmem:[#allocation2 + $0x10] sm:$0xf] %v286_v45 }
  0x3e   :  { %v427_v62 = vld [vmem:[#allocation2 + $0x60] sm:$0xf]  ;;  %944 = vrot.lane.b32.xlu1 %v903_v61, %s6520_s26  ;;  %v426_v2 = vld [vmem:[#allocation2 + $0x5c] sm:$0x1]  ;;  %290 = vst [vmem:[#allocation2 + $0x14] sm:$0x1] %v289_v51 }
  0x3f   :  { %v583_v3 = vshrl.u32 %v427_v62, 16  ;;  %v586_v4 = vshll.u32 %v427_v62, 16  ;;  %v578_v10 = vshll.u32 %v426_v2, 16  ;;  %v429_v11 = vld [vmem:[#allocation2 + $0x68] sm:$0xf]  ;;  %v364_v62 = vsel %vm6593_vm2, %v230_v24, %v363_v30 }
  0x40   :  { %347 = vst [vmem:[#allocation2 + $0x70] sm:$0xf] %v346_v52  ;;  %v430_v15 = vld [vmem:[#allocation2 + $0x6c] sm:$0x1]  ;;  %v597_v16 = vshrl.u32 %v429_v11, 16  ;;  %v600_v17 = vshll.u32 %v429_v11, 16 }
  0x41   :  { %v585_v18 = vrot.slane %v583_v3, 4  ;;  %v588_v19 = vrot.slane %v586_v4, 5  ;;  %v580_v20 = vrot.slane %v578_v10, 5  ;;  %v606_v21 = vshll.u32 %v430_v15, 16  ;;  %v428_v22 = vld [vmem:[#allocation2 + $0x64] sm:$0x1] }
  0x42   :  { %353 = vst [vmem:[#allocation2 + $0x78] sm:$0xf] %v352_v63  ;;  %v599_v25 = vrot.slane %v597_v16, 4  ;;  %v602_v26 = vrot.slane %v600_v17, 5  ;;  %v592_v28 = vshll.u32 %v428_v22, 16 }
  0x43   :  { %v589_v27 = vor.u32 %v588_v19, %v585_v18  ;;  %v409_v29 = vld [vmem:[#allocation2 + $0x8] sm:$0xf]  ;;  %v581_v0 = vsel %vm6670_vm7, %v6728_v8, %v580_v20  ;;  %v608_v31 = vrot.slane %v606_v21, 5  ;;  %v410_v32 = vld [vmem:[#allocation2 + $0xc] sm:$0x1] }
  0x44   :  { %v457_v33 = vshrl.u32 %v409_v29, 16  ;;  %v460_v34 = vshll.u32 %v409_v29, 16  ;;  %684 = vrot.lane.b32.xlu0 %v581_v0, %s6520_s26  ;;  %v603_v36 = vor.u32 %v602_v26, %v599_v25  ;;  %v594_v38 = vrot.slane %v592_v28, 5  ;;  %v411_v41 = vld [vmem:[#allocation2 + $0x10] sm:$0xf] }
  0x45   :  { %v590_v37 = vrot.slane %v589_v27, 4  ;;  %v466_v39 = vshll.u32 %v410_v32, 16  ;;  %v412_v46 = vld [vmem:[#allocation2 + $0x14] sm:$0x1]  ;;  %v471_v48 = vshrl.u32 %v411_v41, 16  ;;  %v474_v50 = vshll.u32 %v411_v41, 16 }
  0x46   :  { %v459_v44 = vrot.slane %v457_v33, 4  ;;  %v462_v45 = vrot.slane %v460_v34, 5  ;;  %v604_v51 = vrot.slane %v603_v36, 4  ;;  %v480_v8 = vshll.u32 %v412_v46, 16  ;;  %356 = vst [vmem:[#allocation2 + $0x7c] sm:$0x1] %v355_v12 }
  0x47   :  { %v468_v52 = vrot.slane %v466_v39, 5  ;;  %v473_v57 = vrot.slane %v471_v48, 4  ;;  %v476_v58 = vrot.slane %v474_v50, 5  ;;  %v431_v61 = vld [vmem:[#allocation2 + $0x70] sm:$0xf]  ;;  %v595_v1 = vsel %vm6670_vm7, %v590_v37, %v594_v38 }
  0x48   :  { %v463_v55 = vor.u32 %v462_v45, %v459_v44  ;;  %v609_v63 = vsel %vm6670_vm7, %v604_v51, %v608_v31  ;;  %350 = vst [vmem:[#allocation2 + $0x74] sm:$0x1] %v349_v13  ;;  %v611_v3 = vshrl.u32 %v431_v61, 16  ;;  %v482_v15 = vrot.slane %v480_v8, 5  ;;  %v905_v25 = vld [vmem:[#allocation2 + $0x70] sm:$0xf] }
  0x49   :  { %v433_v2 = vld [vmem:[#allocation2 + $0x78] sm:$0xf]  ;;  %688 = vrot.lane.b32.xlu1 %v609_v63, %s6520_s26  ;;  %v477_v10 = vor.u32 %v476_v58, %v473_v57  ;;  %299 = vst [vmem:[#allocation2 + $0x20] sm:$0xf] %v298_v6  ;;  %v614_v16 = vshll.u32 %v431_v61, 16  ;;  %v153_v34 = vshrl.u32 %v101_v14, 16 }
  0x4a   :  { %v464_v4 = vrot.slane %v463_v55, 4  ;;  %v625_v11 = vshrl.u32 %v433_v2, 16  ;;  %v628_v12 = vshll.u32 %v433_v2, 16  ;;  %v613_v13 = vrot.slane %v611_v3, 4  ;;  %302 = vst [vmem:[#allocation2 + $0x24] sm:$0x1] %v6808_v9 }
  0x4b   :  { %v478_v17 = vrot.slane %v477_v10, 4  ;;  %359 = vst [vmem:[#allocation2 + $0x80] sm:$0xf] %v358_v23  ;;  %v616_v40 = vrot.slane %v614_v16, 5  ;;  %v294_v6 = vld [vmem:[#allocation2 + $0x1c] sm:$0x1] }
  0x4c   :  { %v469_v59 = vsel %vm6670_vm7, %v464_v4, %v468_v52  ;;  %v627_v18 = vrot.slane %v625_v11, 4  ;;  %v630_v19 = vrot.slane %v628_v12, 5  ;;  %686 = vrot.lane.b32.xlu0 %v595_v1, %s6520_s26  ;;  %365 = vst [vmem:[#allocation2 + $0x88] sm:$0xf] %v364_v62  ;;  %v360_v9 = vld [vmem:[#allocation2 + $0x84] sm:$0x1]  ;;  %v295_v23 = vsel %vm6722_vm8, %v135_v47, %v294_v6 }
  0x4d   :  { %668 = vrot.lane.b32.xlu2 %v469_v59, %s6520_s26  ;;  %368 = vst [vmem:[#allocation2 + $0x8c] sm:$0x1] %v367_v60  ;;  %v483_v20 = vsel %vm6670_vm7, %v478_v17, %v482_v15  ;;  %v434_v21 = vld [vmem:[#allocation2 + $0x7c] sm:$0x1]  ;;  %v361_v24 = vsel %vm6722_vm8, %v223_v56, %v360_v9  ;;  %v617_v28 = vor.u32 %v616_v40, %v613_v13  ;;  %v904_v32 = vld [vmem:[#allocation2 + $0x68] sm:$0xf] }
  0x4e   :  { %v631_v22 = vor.u32 %v630_v19, %v627_v18  ;;  %293 = vst [vmem:[#allocation2 + $0x18] sm:$0xf] %v292_v49  ;;  %v634_v26 = vshll.u32 %v434_v21, 16  ;;  %v155_v58 = vrot.slane %v153_v34, 7  ;;  %v156_v10 = vshll.u32 %v101_v14, 16 }
  0x4f   :  { %v432_v27 = vld [vmem:[#allocation2 + $0x74] sm:$0x1]  ;;  %296 = vst [vmem:[#allocation2 + $0x1c] sm:$0x1] %v295_v23  ;;  %v618_v35 = vrot.slane %v617_v28, 4 }
  0x50   :  { %v620_v29 = vshll.u32 %v432_v27, 16  ;;  %v415_v30 = vld [vmem:[#allocation2 + $0x20] sm:$0xf]  ;;  %362 = vst [vmem:[#allocation2 + $0x84] sm:$0x1] %v361_v24  ;;  %v632_v33 = vrot.slane %v631_v22, 4  ;;  %v158_v59 = vor.u32 %v156_v10, %v155_v58 }
  0x51   :  { %670 = vrot.lane.b32.xlu1 %v483_v20, %s6520_s26  ;;  %v416_v0 = vld [vmem:[#allocation2 + $0x24] sm:$0x1]  ;;  %v499_v31 = vshrl.u32 %v415_v30, 16  ;;  %v502_v43 = vshll.u32 %v415_v30, 16  ;;  %v636_v56 = vrot.slane %v634_v26, 5  ;;  %v159_v13 = vrot.slane %v155_v58, 4 }
  0x52   :  { %v622_v36 = vrot.slane %v620_v29, 5  ;;  %v508_v41 = vshll.u32 %v416_v0, 16  ;;  %v435_v44 = vld [vmem:[#allocation2 + $0x80] sm:$0xf]  ;;  %v312_v11 = vld [vmem:[#allocation2 + $0x34] sm:$0x1] }
  0x53   :  { %v501_v37 = vrot.slane %v499_v31, 4  ;;  %v504_v38 = vrot.slane %v502_v43, 5  ;;  %v437_v39 = vld [vmem:[#allocation2 + $0x88] sm:$0xf]  ;;  %v637_v51 = vsel %vm6670_vm7, %v632_v33, %v636_v56  ;;  %v639_v57 = vshrl.u32 %v435_v44, 16 }
  0x54   :  { %948 = vrot.lane.b32.xlu0 %v905_v25, %s6520_s26  ;;  %v653_v46 = vshrl.u32 %v437_v39, 16  ;;  %v656_v48 = vshll.u32 %v437_v39, 16  ;;  %v623_v54 = vsel %vm6670_vm7, %v618_v35, %v622_v36  ;;  %v510_v61 = vrot.slane %v508_v41, 5  ;;  %v438_v62 = vld [vmem:[#allocation2 + $0x8c] sm:$0x1] }
  0x55   :  { %946 = vrot.lane.b32.xlu2 %v904_v32, %s6520_s26  ;;  %v505_v45 = vor.u32 %v504_v38, %v501_v37  ;;  %v413_v50 = vld [vmem:[#allocation2 + $0x18] sm:$0xf]  ;;  %v642_v2 = vshll.u32 %v435_v44, 16  ;;  %v309_v16 = vld [vmem:[#allocation2 + $0x30] sm:$0xf]  ;;  %v662_v19 = vshll.u32 %v438_v62, 16  ;;  %v313_v9 = vsel %vm6722_vm8, %v159_v13, %v312_v11 }
  0x56   :  { %v414_v52 = vld [vmem:[#allocation2 + $0x1c] sm:$0x1]  ;;  %v485_v8 = vshrl.u32 %v413_v50, 16  ;;  %v488_v53 = vshll.u32 %v413_v50, 16  ;;  %v655_v60 = vrot.slane %v653_v46, 4  ;;  %v658_v4 = vrot.slane %v656_v48, 5 }
  0x57   :  { %v494_v55 = vshll.u32 %v414_v52, 16  ;;  %v506_v3 = vrot.slane %v505_v45, 4  ;;  %v111_v49 = vld [vmem:[%s8274_s0 + $0x3c] sm:$0xf]  ;;  %v436_v47 = vld [vmem:[#allocation2 + $0x84] sm:$0x1]  ;;  %v310_v21 = vsel %vm6593_vm2, %v158_v59, %v309_v16 }
  0x58   :  { %v487_v63 = vrot.slane %v485_v8, 4  ;;  %v490_v1 = vrot.slane %v488_v53, 5  ;;  %v233_v17 = vshrl.u32 %v111_v49, 16  ;;  %v236_v18 = vshll.u32 %v111_v49, 16  ;;  %314 = vst [vmem:[#allocation2 + $0x34] sm:$0x1] %v313_v9 }
  0x59   :  { %692 = vrot.lane.b32.xlu1 %v637_v51, %s6520_s26  ;;  %v496_v15 = vrot.slane %v494_v55, 5  ;;  %v641_v6 = vrot.slane %v639_v57, 4  ;;  %v644_v20 = vrot.slane %v642_v2, 5  ;;  %v100_v23 = vld [vmem:[%s8274_s0 + $0x10] sm:$0xf]  ;;  %v511_v24 = vsel %vm6670_vm7, %v506_v3, %v510_v61 }
  0x5a   :  { %v491_v12 = vor.u32 %v490_v1, %v487_v63  ;;  %v6877_v22 = vrot.slane %v233_v17, 7  ;;  %v659_v14 = vor.u32 %v658_v4, %v655_v60  ;;  %311 = vst [vmem:[#allocation2 + $0x30] sm:$0xf] %v310_v21  ;;  %v369_v26 = vld [vmem:[#allocation2 + $0x90] sm:$0xf]  ;;  %v145_v27 = vshrl.u32 %v100_v23, 16 }
  0x5b   :  { %v148_v29 = vshll.u32 %v100_v23, 16  ;;  %v907_v30 = vld [vmem:[#allocation2 + $0x80] sm:$0xf]  ;;  %v645_v31 = vor.u32 %v644_v20, %v641_v6  ;;  %v648_v43 = vshll.u32 %v436_v47, 16  ;;  %v303_v33 = vld [vmem:[#allocation2 + $0x28] sm:$0xf] }
  0x5c   :  { %690 = vrot.lane.b32.xlu0 %v623_v54, %s6520_s26  ;;  %v492_v40 = vrot.slane %v491_v12, 4  ;;  %v238_v28 = vor.u32 %v236_v18, %v6877_v22  ;;  %v147_v0 = vrot.slane %v145_v27, 7  ;;  %v306_v56 = vld [vmem:[#allocation2 + $0x2c] sm:$0x1]  ;;  %v660_v34 = vrot.slane %v659_v14, 4 }
  0x5d   :  { %v664_v35 = vrot.slane %v662_v19, 5  ;;  %v102_v38 = vld [vmem:[%s8274_s0 + $0x18] sm:$0xf]  ;;  %v646_v48 = vrot.slane %v645_v31, 4  ;;  %v650_v50 = vrot.slane %v648_v43, 5 }
  0x5e   :  { %v497_v25 = vsel %vm6670_vm7, %v492_v40, %v496_v15  ;;  %v370_v32 = vsel %vm6593_vm2, %v238_v28, %v369_v26  ;;  %v150_v36 = vor.u32 %v148_v29, %v147_v0  ;;  %v151_v37 = vrot.slane %v147_v0, 4  ;;  %v906_v41 = vld [vmem:[#allocation2 + $0x78] sm:$0xf]  ;;  %v318_v3 = vld [vmem:[#allocation2 + $0x3c] sm:$0x1] }
  0x5f   :  { %672 = vrot.lane.b32.xlu2 %v497_v25, %s6520_s26  ;;  %371 = vst [vmem:[#allocation2 + $0x90] sm:$0xf] %v370_v32  ;;  %v420_v39 = vld [vmem:[#allocation2 + $0x34] sm:$0x1]  ;;  %v161_v46 = vshrl.u32 %v102_v38, 16  ;;  %v665_v52 = vsel %vm6670_vm7, %v660_v34, %v664_v35  ;;  %v164_v57 = vshll.u32 %v102_v38, 16  ;;  %v651_v63 = vsel %vm6670_vm7, %v646_v48, %v650_v50 }
  0x60   :  { %v304_v44 = vsel %vm6593_vm2, %v150_v36, %v303_v33  ;;  %v307_v45 = vsel %vm6722_vm8, %v151_v37, %v306_v56  ;;  %v536_v54 = vshll.u32 %v420_v39, 16  ;;  %v315_v62 = vld [vmem:[#allocation2 + $0x38] sm:$0xf]  ;;  %v1280_v19 = vld [vmem:[#allocation2 + $0x10] sm:$0xe] }
  0x61   :  { %674 = vrot.lane.b32.xlu1 %v511_v24, %s6520_s26  ;;  %v419_v51 = vld [vmem:[#allocation2 + $0x30] sm:$0xf]  ;;  %305 = vst [vmem:[#allocation2 + $0x28] sm:$0xf] %v304_v44  ;;  %v163_v55 = vrot.slane %v161_v46, 7  ;;  %v5559_v26 = vrot.slane %v1280_v19, 9 }
  0x62   :  { %v527_v8 = vshrl.u32 %v419_v51, 16  ;;  %v530_v53 = vshll.u32 %v419_v51, 16  ;;  %308 = vst [vmem:[#allocation2 + $0x2c] sm:$0x1] %v307_v45  ;;  %v538_v4 = vrot.slane %v536_v54, 5  ;;  %v6309_v33 = vld [vmem:[#allocation4 + $0x38] sm:$0xff] }
  0x63   :  { %v166_v1 = vor.u32 %v164_v57, %v163_v55  ;;  %v167_v2 = vrot.slane %v163_v55, 4  ;;  %v1505_v18 = vld [vmem:[#allocation2 + $0x18] sm:$0xf]  ;;  %v1281_v40 = vld [vmem:[#allocation2 + $0x14] sm:$0x1]  ;;  %2548 = vmatpush.bf16.msra.mxu0 %v6309_v33  ;;  %6414 = vmatpush.bf16.msra.mxu2 %v6309_v33 }
  0x64   :  { %952 = vrot.lane.b32.xlu0 %v907_v30, %s6520_s26  ;;  %v529_v58 = vrot.slane %v527_v8, 4  ;;  %v532_v61 = vrot.slane %v530_v53, 5  ;;  %v1278_v9 = vld [vmem:[#allocation2 + $0x8] sm:$0xe]  ;;  %v1279_v20 = vld [vmem:[#allocation2 + $0xc] sm:$0x1] }
  0x65   :  { %v316_v10 = vsel %vm6593_vm2, %v166_v1, %v315_v62  ;;  %v319_v11 = vsel %vm6722_vm8, %v167_v2, %v318_v3  ;;  %v1550_v14 = vshrl.u32 %v1505_v18, 16  ;;  %v1553_v25 = vshll.u32 %v1505_v18, 16  ;;  %v1506_v37 = vld [vmem:[#allocation2 + $0x1c] sm:$0x1]  ;;  %v1503_v38 = vld [vmem:[#allocation2 + $0x10] sm:$0xf] }
  0x66   :  { %v533_v60 = vor.u32 %v532_v61, %v529_v58  ;;  %317 = vst [vmem:[#allocation2 + $0x38] sm:$0xf] %v316_v10  ;;  %v909_v21 = vld [vmem:[#allocation2 + $0x90] sm:$0xf]  ;;  %v1348_v27 = vrot.slane %v1281_v40, 5  ;;  %v5558_v0 = vrot.slane %v1278_v9, 9 }
  0x67   :  { %950 = vrot.lane.b32.xlu2 %v906_v41, %s6520_s26  ;;  %320 = vst [vmem:[#allocation2 + $0x3c] sm:$0x1] %v319_v11  ;;  %v1344_v31 = vrot.slane %v1279_v20, 5  ;;  %v1552_v34 = vrot.slane %v1550_v14, 4  ;;  %v1555_v35 = vrot.slane %v1553_v25, 5  ;;  %v1559_v50 = vshll.u32 %v1506_v37, 16 }
  0x68   :  { %v534_v12 = vrot.slane %v533_v60, 4  ;;  %v417_v15 = vld [vmem:[#allocation2 + $0x28] sm:$0xf]  ;;  %v1349_v36 = vsel %vm6913_vm11, %v5559_v26, %v1348_v27  ;;  %v103_v46 = vld [vmem:[%s8274_s0 + $0x1c] sm:$0xf]  ;;  %v1536_v51 = vshrl.u32 %v1503_v38, 16 }
  0x69   :  { %696 = vrot.lane.b32.xlu1 %v665_v52, %s6520_s26  ;;  %v418_v13 = vld [vmem:[#allocation2 + $0x2c] sm:$0x1]  ;;  %v513_v16 = vshrl.u32 %v417_v15, 16  ;;  %v516_v49 = vshll.u32 %v417_v15, 16  ;;  %v1345_v44 = vsel %vm6913_vm11, %v5558_v0, %v1344_v31  ;;  %v1556_v48 = vor.u32 %v1555_v35, %v1552_v34  ;;  %v6308_v52 = vld [vmem:[#allocation4 + $0x30] sm:$0xff] }
  0x6a   :  { %v539_v59 = vsel %vm6670_vm7, %v534_v12, %v538_v4  ;;  %v522_v17 = vshll.u32 %v418_v13, 16  ;;  %v169_v8 = vshrl.u32 %v103_v46, 16  ;;  %v1539_v53 = vshll.u32 %v1503_v38, 16  ;;  %v908_v54 = vld [vmem:[#allocation2 + $0x88] sm:$0xf]  ;;  %2549 = vmatpush.bf16.msra.mxu0 %v6308_v52  ;;  %6415 = vmatpush.bf16.msra.mxu2 %v6308_v52  ;;  %v6316_v31 = vld [vmem:[#allocation4 + $0x70] sm:$0xff] }
  0x6b   :  { %v515_v47 = vrot.slane %v513_v16, 4  ;;  %v518_v6 = vrot.slane %v516_v49, 5  ;;  %v1509_v58 = vld [vmem:[#allocation2 + $0x28] sm:$0xf]  ;;  %v1557_v2 = vrot.slane %v1556_v48, 4  ;;  %v1561_v3 = vrot.slane %v1559_v50, 5 }
  0x6c   :  { %694 = vrot.lane.b32.xlu0 %v651_v63, %s6520_s26  ;;  %v524_v24 = vrot.slane %v522_v17, 5  ;;  %v894_v61 = vld [vmem:[#allocation2 + $0x8] sm:$0xf]  ;;  %v6317_v63 = vld [vmem:[#allocation4 + $0x78] sm:$0xff]  ;;  %v171_v1 = vrot.slane %v169_v8, 7  ;;  %v1538_v4 = vrot.slane %v1536_v51, 4 }
  0x6d   :  { %v519_v23 = vor.u32 %v518_v6, %v515_v47  ;;  %v421_v30 = vld [vmem:[#allocation2 + $0x38] sm:$0xf]  ;;  %v6307_v62 = vld [vmem:[#allocation4 + $0x28] sm:$0xff]  ;;  %v1284_v60 = vld [vmem:[#allocation2 + $0x20] sm:$0xe]  ;;  %v172_v10 = vshll.u32 %v103_v46, 16  ;;  %6422 = vmatpush.bf16.msra.mxu3 %v6317_v63  ;;  %2597 = vmatpush.bf16.msra.mxu1 %v6317_v63  ;;  %v1562_v20 = vsel %vm6670_vm7, %v1557_v2, %v1561_v3 }
  0x6e   :  { %v541_v43 = vshrl.u32 %v421_v30, 16  ;;  %v544_v32 = vshll.u32 %v421_v30, 16  ;;  %v422_v45 = vld [vmem:[#allocation2 + $0x3c] sm:$0x1]  ;;  %v1285_v11 = vld [vmem:[#allocation2 + $0x24] sm:$0x1]  ;;  %2550 = vmatpush.bf16.msra.mxu0 %v6307_v62  ;;  %6416 = vmatpush.bf16.msra.mxu2 %v6307_v62 }
  0x6f   :  { %v520_v29 = vrot.slane %v519_v23, 4  ;;  %v550_v57 = vshll.u32 %v422_v45, 16  ;;  %v1541_v12 = vrot.slane %v1539_v53, 5  ;;  %v1578_v15 = vshrl.u32 %v1509_v58, 16  ;;  %v321_v18 = vld [vmem:[#allocation2 + $0x40] sm:$0xf] }
  0x70   :  { %v543_v39 = vrot.slane %v541_v43, 4  ;;  %v546_v41 = vrot.slane %v544_v32, 5  ;;  %v1581_v13 = vshll.u32 %v1509_v58, 16  ;;  %v175_v16 = vrot.slane %v171_v1, 4  ;;  %v324_v19 = vld [vmem:[#allocation2 + $0x44] sm:$0x1] }
  0x71   :  { %678 = vrot.lane.b32.xlu1 %v539_v59, %s6520_s26  ;;  %v525_v56 = vsel %vm6670_vm7, %v520_v29, %v524_v24  ;;  %v552_v59 = vrot.slane %v550_v57, 5  ;;  %v174_v17 = vor.u32 %v172_v10, %v171_v1  ;;  %v5561_v40 = vrot.slane %v1284_v60, 9  ;;  %v1282_v47 = vld [vmem:[#allocation2 + $0x18] sm:$0xe]  ;;  %v1504_v6 = vld [vmem:[#allocation2 + $0x14] sm:$0x1]  ;;  %6423 = vmatpush.bf16.msra.mxu3 %v6316_v31 }
  0x72   :  { %676 = vrot.lane.b32.xlu2 %v525_v56, %s6520_s26  ;;  %v547_v55 = vor.u32 %v546_v41, %v543_v39  ;;  %v325_v9 = vsel %vm6722_vm8, %v175_v16, %v324_v19  ;;  %v1283_v23 = vld [vmem:[#allocation2 + $0x1c] sm:$0x1]  ;;  %v6306_v24 = vld [vmem:[#allocation4 + $0x20] sm:$0xff]  ;;  %v1510_v25 = vld [vmem:[#allocation2 + $0x2c] sm:$0x1]  ;;  %v1580_v26 = vrot.slane %v1578_v15, 4  ;;  %v1542_v30 = vor.u32 %v1541_v12, %v1538_v4  ;;  %2598 = vmatpush.bf16.msra.mxu1 %v6316_v31 }
  0x73   :  { %v322_v14 = vsel %vm6593_vm2, %v174_v17, %v321_v18  ;;  %326 = vst [vmem:[#allocation2 + $0x44] sm:$0x1] %v325_v9  ;;  %v1583_v27 = vrot.slane %v1581_v13, 5  ;;  %v1545_v0 = vshll.u32 %v1504_v6, 16  ;;  %2551 = vmatpush.bf16.msra.mxu0 %v6306_v24  ;;  %6417 = vmatpush.bf16.msra.mxu2 %v6306_v24  ;;  %v375_v43 = vld [vmem:[#allocation2] sm:$0xf] }
  0x74   :  { %956 = vrot.lane.b32.xlu0 %v909_v21, %s6520_s26  ;;  %v548_v49 = vrot.slane %v547_v55, 4  ;;  %v1356_v21 = vrot.slane %v1285_v11, 5  ;;  %323 = vst [vmem:[#allocation2 + $0x40] sm:$0xf] %v322_v14  ;;  %v6305_v32 = vld [vmem:[#allocation4 + $0x18] sm:$0xff]  ;;  %v5560_v33 = vrot.slane %v1282_v47, 9 }
  0x75   :  { %v1352_v56 = vrot.slane %v1283_v23, 5  ;;  %v1587_v34 = vshll.u32 %v1510_v25, 16  ;;  %391 = vst.msk [vmem:[#allocation3] sm:$0xf] %vm54_vm0, %v375_v43  ;;  %v6315_v35 = vld [vmem:[#allocation4 + $0x68] sm:$0xff]  ;;  %v1584_v37 = vor.u32 %v1583_v27, %v1580_v26  ;;  %v1543_v38 = vrot.slane %v1542_v30, 4 }
  0x76   :  { %v553_v29 = vsel %vm6670_vm7, %v548_v49, %v552_v59  ;;  %v1547_v39 = vrot.slane %v1545_v0, 5  ;;  %v1507_v41 = vld [vmem:[#allocation2 + $0x20] sm:$0xf]  ;;  %6424 = vmatpush.bf16.msra.mxu3 %v6315_v35  ;;  %v6304_v48 = vld [vmem:[#allocation4 + $0x10] sm:$0xff]  ;;  %2599 = vmatpush.bf16.msra.mxu1 %v6315_v35  ;;  %v376_v58 = vld [vmem:[#allocation2 + $0x8] sm:$0xf] }
  0x77   :  { %2552 = vmatpush.bf16.msra.mxu0 %v6305_v32  ;;  %6418 = vmatpush.bf16.msra.mxu2 %v6305_v32  ;;  %v1353_v45 = vsel %vm6913_vm11, %v5560_v33, %v1352_v56  ;;  %v1589_v46 = vrot.slane %v1587_v34, 5  ;;  %v1585_v50 = vrot.slane %v1584_v37, 4  ;;  %v6948_v51 = vld [vmem:[#allocation2 + $0x30] sm:$0xe]  ;;  %v1564_v52 = vshrl.u32 %v1507_v41, 16  ;;  %v6303_v10 = vld [vmem:[#allocation4 + $0x8] sm:$0xff] }
  0x78   :  { %v1567_v8 = vshll.u32 %v1507_v41, 16  ;;  %v1548_v55 = vsel %vm6670_vm7, %v1543_v38, %v1547_v39  ;;  %v896_v62 = vld [vmem:[#allocation2 + $0x18] sm:$0xf]  ;;  %v1289_v63 = vld [vmem:[#allocation2 + $0x34] sm:$0x1]  ;;  %v5563_v16 = vrot.slane %v6948_v51, 9 }
  0x79   :  { %1408 = vrot.lane.b32.xlu1 %v1349_v36, %s6520_s26  ;;  %v1357_v36 = vsel %vm6913_vm11, %v5561_v40, %v1356_v21  ;;  %392 = vst.msk [vmem:[#allocation3 + $0x14] sm:$0xf] %vm54_vm0, %v376_v58  ;;  %v747_v1 = vld [vmem:[#allocation2 + $0x50] sm:$0xe]  ;;  %v748_v2 = vld [vmem:[#allocation2 + $0x54] sm:$0x1]  ;;  %v1590_v18 = vsel %vm6670_vm7, %v1585_v50, %v1589_v46 }
  0x7a   :  { %954 = vrot.lane.b32.xlu2 %v908_v54, %s6520_s26  ;;  %v5550_v3 = vrot.slane %v747_v1, 9  ;;  %v832_v60 = vrot.slane %v748_v2, 5  ;;  %v383_v4 = vld [vmem:[#allocation2 + $0x50] sm:$0xf]  ;;  %v6313_v11 = vld [vmem:[#allocation4 + $0x58] sm:$0xff]  ;;  %v1566_v15 = vrot.slane %v1564_v52, 4 }
  0x7b   :  { %2553 = vmatpush.bf16.msra.mxu0 %v6304_v48  ;;  %6419 = vmatpush.bf16.msra.mxu2 %v6304_v48  ;;  %v1508_v12 = vld [vmem:[#allocation2 + $0x24] sm:$0x1]  ;;  %v1569_v13 = vrot.slane %v1567_v8, 5  ;;  %399 = vst.msk [vmem:[#allocation3 + $0xa0] sm:$0xf] %vm54_vm0, %v383_v4  ;;  %v1364_v19 = vrot.slane %v1289_v63, 5 }
  0x7c   :  { %1406 = vrot.lane.b32.xlu0 %v1345_v44, %s6520_s26  ;;  %v1513_v44 = vld [vmem:[#allocation2 + $0x38] sm:$0xf]  ;;  %v833_v49 = vsel %vm6913_vm11, %v5550_v3, %v832_v60  ;;  %v1286_v59 = vld [vmem:[#allocation2 + $0x28] sm:$0xe]  ;;  %v1287_v17 = vld [vmem:[#allocation2 + $0x2c] sm:$0x1] }
  0x7d   :  { %v1606_v53 = vshrl.u32 %v1513_v44, 16  ;;  %v1609_v57 = vshll.u32 %v1513_v44, 16  ;;  %886 = vst.msk [vmem:[#allocation3 + $0xa4] sm:$0xf] %vm54_vm0, %v833_v49  ;;  %v1573_v40 = vshll.u32 %v1508_v12, 16  ;;  %v6302_v6 = vld [vmem:[#allocation4] sm:$0xff]  ;;  %v1365_v34 = vsel %vm6913_vm11, %v5563_v16, %v1364_v19 }
  0x7e   :  { %v750_v9 = vld [vmem:[#allocation2 + $0x5c] sm:$0x1]  ;;  %v749_v14 = vld [vmem:[#allocation2 + $0x58] sm:$0xe]  ;;  %v895_v25 = vld [vmem:[#allocation2 + $0x10] sm:$0xf] }
  0x7f   :  { %2554 = vmatpush.bf16.msra.mxu0 %v6303_v10  ;;  %6420 = vmatpush.bf16.msra.mxu2 %v6303_v10  ;;  %v1608_v47 = vrot.slane %v1606_v53, 4  ;;  %v1514_v21 = vld [vmem:[#allocation2 + $0x3c] sm:$0x1]  ;;  %v1611_v23 = vrot.slane %v1609_v57, 5  ;;  %v836_v24 = vrot.slane %v750_v9, 5  ;;  %v6312_v27 = vld [vmem:[#allocation4 + $0x50] sm:$0xff] }
  0x80   :  { %v1511_v26 = vld [vmem:[#allocation2 + $0x30] sm:$0xf]  ;;  %v5562_v30 = vrot.slane %v1286_v59, 9  ;;  %v384_v0 = vld [vmem:[#allocation2 + $0x58] sm:$0xf]  ;;  %v1360_v31 = vrot.slane %v1287_v17, 5 }
  0x81   :  { %926 = vrot.lane.b32.xlu1 %v894_v61, %s6520_s26  ;;  %v6314_v61 = vld [vmem:[#allocation4 + $0x60] sm:$0xff]  ;;  %v1575_v43 = vrot.slane %v1573_v40, 5  ;;  %v1615_v32 = vshll.u32 %v1514_v21, 16  ;;  %400 = vst.msk [vmem:[#allocation3 + $0xb4] sm:$0xf] %vm54_vm0, %v384_v0  ;;  %v1592_v37 = vshrl.u32 %v1511_v26, 16 }
  0x82   :  { %680 = vrot.lane.b32.xlu2 %v553_v29, %s6520_s26  ;;  %6425 = vmatpush.bf16.msra.mxu3 %v6314_v61  ;;  %v5551_v29 = vrot.slane %v749_v14, 9  ;;  %v1595_v39 = vshll.u32 %v1511_v26, 16  ;;  %v3081_v41 = vld [vmem:[#allocation2] sm:$0xf]  ;;  %v6311_v44 = vld [vmem:[#allocation4 + $0x48] sm:$0xff]  ;;  %v1361_v46 = vsel %vm6913_vm11, %v5562_v30, %v1360_v31 }
  0x83   :  { %2600 = vmatpush.bf16.msra.mxu1 %v6314_v61  ;;  %2555 = vmatpush.bf16.msra.mxu0 %v6302_v6  ;;  %v1617_v51 = vrot.slane %v1615_v32, 5  ;;  %v6981_v52 = vld [vmem:[#allocation2 + $0x44] sm:$0x1]  ;;  %v1512_v8 = vld [vmem:[#allocation2 + $0x34] sm:$0x1]  ;;  %v1594_v53 = vrot.slane %v1592_v37, 4 }
  0x84   :  { %1761 = vrot.lane.b32.xlu0 %v1562_v20, %s6520_s26  ;;  %v1570_v20 = vor.u32 %v1569_v13, %v1566_v15  ;;  %6421 = vmatpush.bf16.msra.mxu2 %v6302_v6  ;;  %v837_v56 = vsel %vm6913_vm11, %v5551_v29, %v836_v24  ;;  %v6310_v58 = vld [vmem:[#allocation4 + $0x40] sm:$0xff]  ;;  %v898_v61 = vld [vmem:[#allocation2 + $0x28] sm:$0xf]  ;;  %v6984_v2 = vld [vmem:[#allocation2 + $0x38] sm:$0xe]  ;;  %v1372_v12 = vrot.slane %v6981_v52, 5 }
  0x85   :  { %887 = vst.msk [vmem:[#allocation3 + $0xb8] sm:$0xf] %vm54_vm0, %v837_v56  ;;  %v751_v63 = vld [vmem:[#allocation2 + $0x60] sm:$0xe]  ;;  %v752_v1 = vld [vmem:[#allocation2 + $0x64] sm:$0x1] }
  0x86   :  { %6426 = vmatpush.bf16.msra.mxu3 %v6313_v11  ;;  %v1571_v35 = vrot.slane %v1570_v20, 4  ;;  %v5552_v3 = vrot.slane %v751_v63, 9  ;;  %v840_v60 = vrot.slane %v752_v1, 5  ;;  %v385_v4 = vld [vmem:[#allocation2 + $0x60] sm:$0xf]  ;;  %v1601_v15 = vshll.u32 %v1512_v8, 16 }
  0x87   :  { %2601 = vmatpush.bf16.msra.mxu1 %v6313_v11  ;;  %v1292_v10 = vld [vmem:[#allocation2 + $0x40] sm:$0xe]  ;;  %v1291_v11 = vld [vmem:[#allocation2 + $0x3c] sm:$0x1]  ;;  %401 = vst.msk [vmem:[#allocation3 + $0xc8] sm:$0xf] %vm54_vm0, %v385_v4 }
  0x88   :  { %v1576_v48 = vsel %vm6670_vm7, %v1571_v35, %v1575_v43  ;;  %v841_v13 = vsel %vm6913_vm11, %v5552_v3, %v840_v60  ;;  %v3449_v16 = vld [vmem:[#allocation2 + $0x50] sm:$0xe]  ;;  %v3450_v49 = vld [vmem:[#allocation2 + $0x54] sm:$0x1]  ;;  %v1518_v17 = vld [vmem:[#allocation2 + $0x4c] sm:$0x1] }
  0x89   :  { %1412 = vrot.lane.b32.xlu1 %v1357_v36, %s6520_s26  ;;  %v1612_v36 = vor.u32 %v1611_v23, %v1608_v47  ;;  %888 = vst.msk [vmem:[#allocation3 + $0xcc] sm:$0xf] %vm54_vm0, %v841_v13  ;;  %v3531_v19 = vrot.slane %v3450_v49, 5  ;;  %v5565_v40 = vrot.slane %v1292_v10, 9  ;;  %v897_v47 = vld [vmem:[#allocation2 + $0x20] sm:$0xf] }
  0x8a   :  { %v667_v54 = vpop.permute.xlu2 %666  ;;  %1759 = vrot.lane.b32.xlu2 %v1548_v55, %s6520_s26  ;;  %6427 = vmatpush.bf16.msra.mxu3 %v6312_v27  ;;  %v6325_v23 = vld [vmem:[#allocation4 + $0xb8] sm:$0xff]  ;;  %v5564_v14 = vrot.slane %v6984_v2, 9  ;;  %v1603_v29 = vrot.slane %v1601_v15, 5  ;;  %v1643_v30 = vshll.u32 %v1518_v17, 16  ;;  %v1515_v0 = vld [vmem:[#allocation2 + $0x40] sm:$0xf] }
  0x8b   :  { %715 = vst.msk [vmem:[#allocation3] sm:$0xf] %vm714_vm12, %v667_v54  ;;  %2602 = vmatpush.bf16.msra.mxu1 %v6312_v27  ;;  %v1613_v50 = vrot.slane %v1612_v36, 4  ;;  %v1597_v54 = vrot.slane %v1595_v39, 5  ;;  %v6333_v24 = vld [vmem:[#allocation4 + $0xf8] sm:$0xff]  ;;  %2646 = vmatpush.bf16.msrb.mxu2 %v6325_v23  ;;  %v1373_v36 = vsel %vm6913_vm11, %v5565_v40, %v1372_v12 }
  0x8c   :  { %1410 = vrot.lane.b32.xlu0 %v1353_v45, %s6520_s26  ;;  %v1517_v45 = vld [vmem:[#allocation2 + $0x48] sm:$0xf]  ;;  %v377_v31 = vld [vmem:[#allocation2 + $0x10] sm:$0xf]  ;;  %v378_v43 = vld [vmem:[#allocation2 + $0x18] sm:$0xf] }
  0x8d   :  { %v1634_v55 = vshrl.u32 %v1517_v45, 16  ;;  %v1637_v57 = vshll.u32 %v1517_v45, 16  ;;  %v1618_v59 = vsel %vm6670_vm7, %v1613_v50, %v1617_v51  ;;  %v1598_v9 = vor.u32 %v1597_v54, %v1594_v53  ;;  %v753_v32 = vld [vmem:[#allocation2 + $0x68] sm:$0xe]  ;;  %393 = vst.msk [vmem:[#allocation3 + $0x28] sm:$0xf] %vm54_vm0, %v377_v31 }
  0x8e   :  { %6428 = vmatpush.bf16.msra.mxu3 %v6311_v44  ;;  %v5553_v35 = vrot.slane %v753_v32, 9  ;;  %v3089_v39 = vld [vmem:[#allocation2 + $0x50] sm:$0xf]  ;;  %394 = vst.msk [vmem:[#allocation3 + $0x3c] sm:$0xf] %vm54_vm0, %v378_v43  ;;  %v1623_v45 = vshll.u32 %v1515_v0, 16 }
  0x8f   :  { %2603 = vmatpush.bf16.msra.mxu1 %v6311_v44  ;;  %v1636_v20 = vrot.slane %v1634_v55, 4  ;;  %v1639_v21 = vrot.slane %v1637_v57, 5  ;;  %v6337_v50 = vld [vmem:[#allocation4 + $0x118] sm:$0xff]  ;;  %v1516_v52 = vld [vmem:[#allocation2 + $0x44] sm:$0x1]  ;;  %v1645_v55 = vrot.slane %v1643_v30, 5 }
  0x90   :  { %v7010_v51 = vld [vmem:[#allocation2 + $0x58] sm:$0xe]  ;;  %v1521_v63 = vld [vmem:[#allocation2 + $0x68] sm:$0xf]  ;;  %2748 = vmatpush.bf16.msrb.mxu0 %v6337_v50  ;;  %v1625_v60 = vrot.slane %v1623_v45, 5  ;;  %v1629_v4 = vshll.u32 %v1516_v52, 16 }
  0x91   :  { %930 = vrot.lane.b32.xlu1 %v896_v62, %s6520_s26  ;;  %v386_v62 = vld [vmem:[#allocation2 + $0x68] sm:$0xf]  ;;  %v1640_v56 = vor.u32 %v1639_v21, %v1636_v20  ;;  %v388_v1 = vld [vmem:[#allocation2 + $0x78] sm:$0xf]  ;;  %v5566_v2 = vrot.slane %v7010_v51, 9 }
  0x92   :  { %928 = vrot.lane.b32.xlu2 %v895_v25, %s6520_s26  ;;  %v6972_v38 = vld [vmem:[#allocation3] sm:$0xf]  ;;  %6429 = vmatpush.bf16.msra.mxu3 %v6310_v58  ;;  %402 = vst.msk [vmem:[#allocation3 + $0xdc] sm:$0xf] %vm54_vm0, %v386_v62  ;;  %v1368_v25 = vrot.slane %v1291_v11, 5  ;;  %v6331_v30 = vld [vmem:[#allocation4 + $0xe8] sm:$0xff] }
  0x93   :  { %3097 = vst.msk [vmem:[#allocation3] sm:$0xf] %vm54_vm0, %v3081_v41  ;;  %2604 = vmatpush.bf16.msra.mxu1 %v6310_v58  ;;  %v1620_v41 = vshrl.u32 %v1515_v0, 16  ;;  %v1641_v54 = vrot.slane %v1640_v56, 4  ;;  %v7024_v62 = vld [vmem:[#allocation2 + $0x60] sm:$0xe] }
  0x94   :  { %1765 = vrot.lane.b32.xlu0 %v1590_v18, %s6520_s26  ;;  %v5910_v18 = vrot.slane %v3449_v16, 9  ;;  %v1369_v53 = vsel %vm6913_vm11, %v5564_v14, %v1368_v25  ;;  %404 = vst.msk [vmem:[#allocation3 + $0x104] sm:$0xf] %vm54_vm0, %v388_v1  ;;  %v900_v10 = vld [vmem:[#allocation2 + $0x38] sm:$0xf]  ;;  %v7038_v14 = vrot.slane %v1629_v4, 5 }
  0x95   :  { %v943_v33 = vpop.permute.xlu1 %942  ;;  %v1622_v3 = vrot.slane %v1620_v41, 4  ;;  %v755_v11 = vld [vmem:[#allocation2 + $0x70] sm:$0xe]  ;;  %v756_v12 = vld [vmem:[#allocation2 + $0x74] sm:$0x1]  ;;  %v6322_v1 = vld [vmem:[#allocation4 + $0xa0] sm:$0xff] }
  0x96   :  { %982 = vst.msk [vmem:[#allocation3 + $0xa4] sm:$0xf] %vm714_vm12, %v943_v33  ;;  %v3532_v27 = vsel %vm6913_vm11, %v5910_v18, %v3531_v19  ;;  %2695 = vmatpush.bf16.msrb.mxu3 %v6333_v24  ;;  %v1599_v33 = vrot.slane %v1598_v9, 4  ;;  %v387_v15 = vld [vmem:[#allocation2 + $0x70] sm:$0xf]  ;;  %v5554_v16 = vrot.slane %v755_v11, 9 }
  0x97   :  { %v1297_v13 = vld [vmem:[#allocation2 + $0x64] sm:$0x1]  ;;  %v848_v49 = vrot.slane %v756_v12, 5  ;;  %403 = vst.msk [vmem:[#allocation3 + $0xf0] sm:$0xf] %vm54_vm0, %v387_v15  ;;  %v1662_v18 = vshrl.u32 %v1521_v63, 16  ;;  %v1626_v24 = vor.u32 %v1625_v60, %v1622_v3 }
  0x98   :  { %v1604_v58 = vsel %vm6670_vm7, %v1599_v33, %v1603_v29  ;;  %v1665_v19 = vshll.u32 %v1521_v63, 16  ;;  %v1523_v40 = vld [vmem:[#allocation2 + $0x70] sm:$0xf]  ;;  %v5567_v9 = vrot.slane %v7024_v62, 9  ;;  %v1380_v23 = vrot.slane %v1297_v13, 5  ;;  %v6323_v29 = vld [vmem:[#allocation4 + $0xa8] sm:$0xff] }
  0x99   :  { %1416 = vrot.lane.b32.xlu1 %v1365_v34, %s6520_s26  ;;  %v754_v34 = vld [vmem:[#allocation2 + $0x6c] sm:$0x1]  ;;  %v849_v20 = vsel %vm6913_vm11, %v5554_v16, %v848_v49  ;;  %v1676_v0 = vshrl.u32 %v1523_v40, 16  ;;  %v1679_v31 = vshll.u32 %v1523_v40, 16  ;;  %v1664_v43 = vrot.slane %v1662_v18, 4  ;;  %v6330_v3 = vld [vmem:[#allocation4 + $0xe0] sm:$0xff] }
  0x9a   :  { %1763 = vrot.lane.b32.xlu2 %v1576_v48, %s6520_s26  ;;  %v844_v44 = vrot.slane %v754_v34, 5  ;;  %v6332_v48 = vld [vmem:[#allocation4 + $0xf0] sm:$0xff]  ;;  %v1522_v25 = vld [vmem:[#allocation2 + $0x6c] sm:$0x1]  ;;  %890 = vst.msk [vmem:[#allocation3 + $0xf4] sm:$0xf] %vm54_vm0, %v849_v20 }
  0x9b   :  { %2696 = vmatpush.bf16.msrb.mxu3 %v6332_v48  ;;  %v1667_v32 = vrot.slane %v1665_v19, 5  ;;  %v1525_v33 = vld [vmem:[#allocation2 + $0x78] sm:$0xf]  ;;  %v379_v56 = vld [vmem:[#allocation2 + $0x20] sm:$0xf]  ;;  %v1681_v48 = vrot.slane %v1679_v31, 5 }
  0x9c   :  { %1414 = vrot.lane.b32.xlu0 %v1361_v46, %s6520_s26  ;;  %v6324_v46 = vld [vmem:[#allocation4 + $0xb0] sm:$0xff]  ;;  %v845_v8 = vsel %vm6913_vm11, %v5553_v35, %v844_v44  ;;  %395 = vst.msk [vmem:[#allocation3 + $0x50] sm:$0xf] %vm54_vm0, %v379_v56  ;;  %v757_v34 = vld [vmem:[#allocation2 + $0x78] sm:$0xe]  ;;  %v1690_v50 = vshrl.u32 %v1525_v33, 16 }
  0x9d   :  { %v6998_v26 = vld [vmem:[#allocation3 + $0xa4] sm:$0xf]  ;;  %889 = vst.msk [vmem:[#allocation3 + $0xe0] sm:$0xf] %vm54_vm0, %v845_v8  ;;  %2647 = vmatpush.bf16.msrb.mxu2 %v6324_v46  ;;  %v758_v35 = vld [vmem:[#allocation2 + $0x7c] sm:$0x1]  ;;  %v1668_v63 = vor.u32 %v1667_v32, %v1664_v43 }
  0x9e   :  { %3585 = vst.msk [vmem:[#allocation3 + $0xa4] sm:$0xf] %vm54_vm0, %v3532_v27  ;;  %v899_v27 = vld [vmem:[#allocation2 + $0x30] sm:$0xf]  ;;  %v5555_v41 = vrot.slane %v757_v34, 9  ;;  %v852_v44 = vrot.slane %v758_v35, 5 }
  0x9f   :  { %2697 = vmatpush.bf16.msrb.mxu3 %v6331_v30  ;;  %v1298_v45 = vld [vmem:[#allocation2 + $0x68] sm:$0xe]  ;;  %v1678_v46 = vrot.slane %v1676_v0, 4  ;;  %v1693_v52 = vshll.u32 %v1525_v33, 16  ;;  %v239_v62 = vrot.slane %v6877_v22, 4  ;;  %v6336_v60 = vld [vmem:[#allocation4 + $0x110] sm:$0xff] }
  0xa0   :  { %v1519_v12 = vld [vmem:[#allocation2 + $0x60] sm:$0xf]  ;;  %v1692_v49 = vrot.slane %v1690_v50, 4  ;;  %v390_v51 = vld [vmem:[#allocation2 + $0x88] sm:$0xf]  ;;  %2749 = vmatpush.bf16.msrb.mxu0 %v6336_v60 }
  0xa1   :  { %934 = vrot.lane.b32.xlu1 %v898_v61, %s6520_s26  ;;  %v683_v6 = vpop.permute.xlu0 %682  ;;  %v7022_v61 = vld [vmem:[#allocation2 + $0x5c] sm:$0x1]  ;;  %2648 = vmatpush.bf16.msrb.mxu2 %v6323_v29  ;;  %v1682_v16 = vor.u32 %v1681_v48, %v1678_v46  ;;  %406 = vst.msk [vmem:[#allocation3 + $0x12c] sm:$0xf] %vm54_vm0, %v390_v51  ;;  %v1520_v20 = vld [vmem:[#allocation2 + $0x64] sm:$0x1] }
  0xa2   :  { %723 = vst.msk [vmem:[#allocation3 + $0xa0] sm:$0xf] %vm714_vm12, %v683_v6  ;;  %932 = vrot.lane.b32.xlu2 %v897_v47, %s6520_s26  ;;  %v1376_v6 = vrot.slane %v7022_v61, 5  ;;  %v853_v61 = vsel %vm6913_vm11, %v5555_v41, %v852_v44  ;;  %v1527_v56 = vld [vmem:[#allocation2 + $0x80] sm:$0xf]  ;;  %v1657_v46 = vshll.u32 %v1520_v20, 16 }
  0xa3   :  { %891 = vst.msk [vmem:[#allocation3 + $0x108] sm:$0xf] %vm54_vm0, %v853_v61  ;;  %2698 = vmatpush.bf16.msrb.mxu3 %v6330_v3  ;;  %v901_v41 = vld [vmem:[#allocation2 + $0x40] sm:$0xf]  ;;  %v6329_v48 = vld [vmem:[#allocation4 + $0xd8] sm:$0xff]  ;;  %v6320_v51 = vld [vmem:[#allocation4 + $0x90] sm:$0xff] }
  0xa4   :  { %1769 = vrot.lane.b32.xlu0 %v1618_v59, %s6520_s26  ;;  %v1377_v4 = vsel %vm6913_vm11, %v5566_v2, %v1376_v6  ;;  %v5568_v2 = vrot.slane %v1298_v45, 9  ;;  %v7086_v50 = vld [vmem:[#allocation2 + $0x80] sm:$0xe]  ;;  %v761_v61 = vld [vmem:[#allocation2 + $0x88] sm:$0xe] }
  0xa5   :  { %2649 = vmatpush.bf16.msrb.mxu2 %v6322_v1  ;;  %v762_v1 = vld [vmem:[#allocation2 + $0x8c] sm:$0x1]  ;;  %v7090_v3 = vld [vmem:[#allocation2 + $0x84] sm:$0x1]  ;;  %v5557_v60 = vrot.slane %v761_v61, 9 }
  0xa7   :  { %v669_v37 = vpop.permute.xlu2 %668  ;;  %2699 = vmatpush.bf16.msrb.mxu3 %v6329_v48 }
  0xa8   :  { %716 = vst.msk [vmem:[#allocation3 + $0x14] sm:$0xf] %vm714_vm12, %v669_v37  ;;  %v1671_v37 = vshll.u32 %v1522_v25, 16 }
  0xa9   :  { %1420 = vrot.lane.b32.xlu1 %v1373_v36, %s6520_s26  ;;  %v7017_v57 = vld [vmem:[#allocation3 + $0xa0] sm:$0xf]  ;;  %v1627_v36 = vrot.slane %v1626_v24, 4 }
  0xaa   :  { %3105 = vst.msk [vmem:[#allocation3 + $0xa0] sm:$0xf] %vm54_vm0, %v3089_v39  ;;  %1767 = vrot.lane.b32.xlu2 %v1604_v58, %s6520_s26  ;;  %v380_v39 = vld [vmem:[#allocation2 + $0x28] sm:$0xf]  ;;  %v1526_v58 = vld [vmem:[#allocation2 + $0x7c] sm:$0x1] }
  0xab   :  { %396 = vst.msk [vmem:[#allocation3 + $0x64] sm:$0xf] %vm54_vm0, %v380_v39  ;;  %v1632_v11 = vsel %vm6670_vm7, %v1627_v36, %v7038_v14  ;;  %v1699_v6 = vshll.u32 %v1526_v58, 16  ;;  %v760_v14 = vld [vmem:[#allocation2 + $0x84] sm:$0x1]  ;;  %v1704_v36 = vshrl.u32 %v1527_v56, 16 }
  0xac   :  { %1418 = vrot.lane.b32.xlu0 %v1369_v53, %s6520_s26  ;;  %v1381_v53 = vsel %vm6913_vm11, %v5567_v9, %v1380_v23  ;;  %v1648_v9 = vshrl.u32 %v1519_v12, 16  ;;  %v7069_v23 = vrot.slane %v1682_v16, 4  ;;  %v856_v31 = vrot.slane %v760_v14, 5  ;;  %v381_v58 = vld [vmem:[#allocation2 + $0x30] sm:$0xf] }
  0xad   :  { %v1701_v34 = vrot.slane %v1699_v6, 5  ;;  %397 = vst.msk [vmem:[#allocation3 + $0x78] sm:$0xf] %vm54_vm0, %v381_v58  ;;  %v993_v14 = vld [vmem:[#allocation2 + $0x14] sm:$0x1] }
  0xae   :  { %v1650_v32 = vrot.slane %v1648_v9, 4  ;;  %v7108_v9 = vld [vmem:[#allocation2 + $0x70] sm:$0xe] }
  0xaf   :  { %v6264_v59 = vld [vmem:[#allocation3 + $0x10] sm:$0xf0]  ;;  %v947_v17 = vpop.permute.xlu2 %946 }
  0xb0   :  { %v5593_v47 = vor.u32 %v6264_v59, %v6972_v38  ;;  %984 = vst.msk [vmem:[#allocation3 + $0xcc] sm:$0xf] %vm714_vm12, %v947_v17  ;;  %v945_v21 = vpop.permute.xlu1 %944  ;;  %v1646_v38 = vsel %vm6670_vm7, %v1641_v54, %v1645_v55  ;;  %v1299_v54 = vld [vmem:[#allocation2 + $0x6c] sm:$0x1]  ;;  %v1524_v55 = vld [vmem:[#allocation2 + $0x74] sm:$0x1] }
  0xb1   :  { %938 = vrot.lane.b32.xlu1 %v900_v10, %s6520_s26  ;;  %983 = vst.msk [vmem:[#allocation3 + $0xb8] sm:$0xf] %vm714_vm12, %v945_v21  ;;  %v1695_v59 = vrot.slane %v1693_v52, 5  ;;  %v1673_v17 = vrot.slane %v1671_v37, 5  ;;  %v1384_v18 = vrot.slane %v1299_v54, 5  ;;  %v1685_v19 = vshll.u32 %v1524_v55, 16 }
  0xb2   :  { %2556 = vmatmul.bf16.vlgmr.msra.gmra.mxu0 %v5593_v47  ;;  %936 = vrot.lane.b32.xlu2 %v899_v27, %s6520_s26  ;;  %v1669_v47 = vrot.slane %v1668_v63, 4  ;;  %v759_v21 = vld [vmem:[#allocation2 + $0x80] sm:$0xe]  ;;  %v1707_v37 = vshll.u32 %v1527_v56, 16  ;;  %v1706_v52 = vrot.slane %v1704_v36, 4 }
  0xb3   :  { %v1696_v24 = vor.u32 %v1695_v59, %v1692_v49  ;;  %v5556_v25 = vrot.slane %v759_v21, 9  ;;  %v1385_v30 = vsel %vm6913_vm11, %v5568_v2, %v1384_v18  ;;  %v7074_v0 = vrot.slane %v1685_v19, 5  ;;  %v1528_v55 = vld [vmem:[#allocation2 + $0x84] sm:$0x1]  ;;  %v382_v63 = vld [vmem:[#allocation2 + $0x38] sm:$0xf] }
  0xb4   :  { %1773 = vrot.lane.b32.xlu0 %v1646_v38, %s6520_s26  ;;  %v389_v38 = vld [vmem:[#allocation2 + $0x80] sm:$0xf]  ;;  %v1674_v39 = vsel %vm6670_vm7, %v1669_v47, %v1673_v17  ;;  %398 = vst.msk [vmem:[#allocation3 + $0x8c] sm:$0xf] %vm54_vm0, %v382_v63  ;;  %v5571_v49 = vrot.slane %v7086_v50, 9  ;;  %v6328_v17 = vld [vmem:[#allocation4 + $0xd0] sm:$0xff] }
  0xb5   :  { %405 = vst.msk [vmem:[#allocation3 + $0x118] sm:$0xf] %vm54_vm0, %v389_v38  ;;  %v857_v35 = vsel %vm6913_vm11, %v5556_v25, %v856_v31  ;;  %v1697_v45 = vrot.slane %v1696_v24, 4  ;;  %v1396_v18 = vrot.slane %v7090_v3, 5  ;;  %v6335_v19 = vld [vmem:[#allocation4 + $0x108] sm:$0xff]  ;;  %v1688_v6 = vsel %vm6670_vm7, %v7069_v23, %v7074_v0  ;;  %2700 = vmatpush.bf16.msrb.mxu3 %v6328_v17 }
  0xb6   :  { %v685_v8 = vpop.permute.xlu0 %684  ;;  %892 = vst.msk [vmem:[#allocation3 + $0x11c] sm:$0xf] %vm54_vm0, %v857_v35  ;;  %2750 = vmatpush.bf16.msrb.mxu0 %v6335_v19  ;;  %v992_v24 = vld [vmem:[#allocation2 + $0x10] sm:$0xf]  ;;  %v991_v35 = vld [vmem:[#allocation2 + $0xc] sm:$0x1] }
  0xb7   :  { %724 = vst.msk [vmem:[#allocation3 + $0xb4] sm:$0xf] %vm714_vm12, %v685_v8  ;;  %v1709_v8 = vrot.slane %v1707_v37, 5  ;;  %v1040_v23 = vshll.u32 %v992_v24, 16  ;;  %v6287_v31 = vld [vmem:[#allocation3 + $0xcc] sm:$0xf] }
  0xb8   :  { %v5674_v10 = vld [vmem:[#allocation3 + $0xb4] sm:$0xf0]  ;;  %v1032_v58 = vshll.u32 %v991_v35, 16  ;;  %v1534_v3 = vld [vmem:[#allocation2 + $0x9c] sm:$0x1] }
  0xb9   :  { %1424 = vrot.lane.b32.xlu1 %v1381_v53, %s6520_s26  ;;  %v5677_v15 = vor.u32 %v6998_v26, %v5674_v10  ;;  %v673_v13 = vpop.permute.xlu2 %672  ;;  %v1651_v26 = vshll.u32 %v1519_v12, 16  ;;  %v1659_v12 = vrot.slane %v1657_v46, 5  ;;  %v990_v46 = vld [vmem:[#allocation2 + $0x8] sm:$0xf]  ;;  %v1303_v17 = vld [vmem:[#allocation2 + $0x7c] sm:$0x1] }
  0xba   :  { %718 = vst.msk [vmem:[#allocation3 + $0x3c] sm:$0xf] %vm714_vm12, %v673_v13  ;;  %1771 = vrot.lane.b32.xlu2 %v1632_v11, %s6520_s26  ;;  %v1702_v11 = vsel %vm6670_vm7, %v1697_v45, %v1701_v34  ;;  %v1713_v13 = vshll.u32 %v1528_v55, 16  ;;  %v1042_v34 = vrot.slane %v1040_v23, 5  ;;  %v7124_v45 = vld [vmem:[#allocation2 + $0x8c] sm:$0x1] }
  0xbb   :  { %v689_v40 = vpop.permute.xlu1 %688  ;;  %2625 = vmatmul.bf16.vlgmr.msra.gmra.mxu3 %v5677_v15  ;;  %v1653_v33 = vrot.slane %v1651_v26, 5  ;;  %v1710_v15 = vor.u32 %v1709_v8, %v1706_v52  ;;  %v7110_v26 = vld [vmem:[#allocation2 + $0x74] sm:$0x1]  ;;  %v1026_v61 = vshll.u32 %v990_v46, 16  ;;  %v1400_v50 = vrot.slane %v7124_v45, 5 }
  0xbc   :  { %1422 = vrot.lane.b32.xlu0 %v1377_v4, %s6520_s26  ;;  %726 = vst.msk [vmem:[#allocation3 + $0xdc] sm:$0xf] %vm714_vm12, %v689_v40  ;;  %v860_v4 = vrot.slane %v762_v1, 5  ;;  %v1715_v21 = vrot.slane %v1713_v13, 5  ;;  %v1533_v1 = vld [vmem:[#allocation2 + $0x98] sm:$0xf] }
  0xbd   :  { %v1654_v54 = vor.u32 %v1653_v33, %v1650_v32  ;;  %v1711_v20 = vrot.slane %v1710_v15, 4  ;;  %v1388_v32 = vrot.slane %v7110_v26, 5  ;;  %v1471_v33 = vld [vmem:[#allocation2 + $0x10] sm:$0xf]  ;;  %v1028_v22 = vrot.slane %v1026_v61, 5 }
  0xbe   :  { %v687_v27 = vpop.permute.xlu0 %686  ;;  %v6284_v29 = vld [vmem:[#allocation3 + $0xb0] sm:$0xf0]  ;;  %v861_v59 = vsel %vm6913_vm11, %v5557_v60, %v860_v4  ;;  %1487 = vst.msk [vmem:[#allocation3 + $0xc] sm:$0xf] %vm54_vm0, %v1471_v33  ;;  %v1397_v60 = vsel %vm6913_vm11, %v5571_v49, %v1396_v18  ;;  %v1749_v15 = vshll.u32 %v1533_v1, 16 }
  0xbf   :  { %725 = vst.msk [vmem:[#allocation3 + $0xc8] sm:$0xf] %vm714_vm12, %v687_v27  ;;  %v5673_v43 = vor.u32 %v6284_v29, %v7017_v57  ;;  %v6321_v57 = vld [vmem:[#allocation4 + $0x98] sm:$0xff]  ;;  %v1655_v16 = vrot.slane %v1654_v54, 4  ;;  %v1037_v29 = vshrl.u32 %v992_v24, 16  ;;  %v1392_v24 = vrot.slane %v1303_v17, 5 }
  0xc0   :  { %2650 = vmatpush.bf16.msrb.mxu2 %v6321_v57  ;;  %893 = vst.msk [vmem:[#allocation3 + $0x130] sm:$0xf] %vm54_vm0, %v861_v59  ;;  %v372_v57 = vld [vmem:[#allocation2 + $0x94] sm:$0x1]  ;;  %v7127_v54 = vld [vmem:[#allocation2 + $0x90] sm:$0xe] }
  0xc1   :  { %2576 = vmatmul.bf16.vlgmr.msra.gmra.mxu2 %v5673_v43  ;;  %1426 = vrot.lane.b32.xlu1 %v1385_v30, %s6520_s26  ;;  %v951_v44 = vpop.permute.xlu2 %950  ;;  %v6269_v2 = vld [vmem:[#allocation3 + $0x38] sm:$0xf0]  ;;  %v1660_v27 = vsel %vm6670_vm7, %v1655_v16, %v1659_v12  ;;  %v1046_v30 = vshll.u32 %v993_v14, 16  ;;  %v5569_v43 = vrot.slane %v7108_v9, 9  ;;  %v1039_v56 = vrot.slane %v1037_v29, 4  ;;  %v6327_v12 = vld [vmem:[#allocation4 + $0xc8] sm:$0xff] }
  0xc2   :  { %986 = vst.msk [vmem:[#allocation3 + $0xf4] sm:$0xf] %vm714_vm12, %v951_v44  ;;  %940 = vrot.lane.b32.xlu2 %v901_v41, %s6520_s26  ;;  %v1716_v41 = vsel %vm6670_vm7, %v1711_v20, %v1715_v21  ;;  %v7122_v44 = vld [vmem:[#allocation2 + $0x88] sm:$0xe]  ;;  %v373_v63 = vsel %vm6722_vm8, %v239_v62, %v372_v57  ;;  %v1746_v62 = vshrl.u32 %v1533_v1, 16  ;;  %2701 = vmatpush.bf16.msrb.mxu3 %v6327_v12  ;;  %v5573_v19 = vrot.slane %v7127_v54, 9 }
  0xc3   :  { %v671_v53 = vpop.permute.xlu1 %670  ;;  %v6289_v47 = vld [vmem:[#allocation3 + $0xd8] sm:$0xf0]  ;;  %v1043_v52 = vor.u32 %v1042_v34, %v1039_v56  ;;  %v1048_v8 = vrot.slane %v1046_v30, 5  ;;  %374 = vst [vmem:[#allocation2 + $0x94] sm:$0x1] %v373_v63  ;;  %v1389_v16 = vsel %vm6913_vm11, %v5569_v43, %v1388_v32  ;;  %v5572_v59 = vrot.slane %v7122_v44, 9 }
  0xc4   :  { %1777 = vrot.lane.b32.xlu0 %v1674_v39, %s6520_s26  ;;  %717 = vst.msk [vmem:[#allocation3 + $0x28] sm:$0xf] %vm714_vm12, %v671_v53  ;;  %2651 = vmatpush.bf16.msrb.mxu2 %v6320_v51  ;;  %v1023_v53 = vshrl.u32 %v990_v46, 16  ;;  %v1302_v51 = vld [vmem:[#allocation2 + $0x78] sm:$0xe]  ;;  %v6318_v29 = vld [vmem:[#allocation4 + $0x80] sm:$0xff] }
  0xc5   :  { %v1044_v4 = vrot.slane %v1043_v52, 4  ;;  %v731_v9 = vld [vmem:[#allocation2] sm:$0xe]  ;;  %v5570_v21 = vrot.slane %v1302_v51, 9  ;;  %v732_v14 = vld [vmem:[#allocation2 + $0x4] sm:$0x1]  ;;  %v1401_v33 = vsel %vm6913_vm11, %v5572_v59, %v1400_v50 }
  0xc6   :  { %v949_v10 = vpop.permute.xlu0 %948  ;;  %v5692_v40 = vld [vmem:[#allocation3 + $0xc8] sm:$0xf]  ;;  %v734_v43 = vld [vmem:[#allocation2 + $0xc] sm:$0x1]  ;;  %v1472_v45 = vld [vmem:[#allocation2 + $0x18] sm:$0xf] }
  0xc7   :  { %985 = vst.msk [vmem:[#allocation3 + $0xe0] sm:$0xf] %vm714_vm12, %v949_v10  ;;  %v5693_v37 = vor.u32 %v6289_v47, %v5692_v40  ;;  %v1025_v10 = vrot.slane %v1023_v53, 4  ;;  %v1049_v49 = vsel %vm6670_vm7, %v1044_v4, %v1048_v8  ;;  %v1755_v40 = vshll.u32 %v1534_v3, 16  ;;  %v6334_v46 = vld [vmem:[#allocation4 + $0x100] sm:$0xff] }
  0xc8   :  { %1263 = vst.msk [vmem:[#allocation3 + $0x1c] sm:$0xf] %vm54_vm0, %v1049_v49  ;;  %v1748_v47 = vrot.slane %v1746_v62, 4  ;;  %v1393_v52 = vsel %vm6913_vm11, %v5570_v21, %v1392_v24  ;;  %v1529_v53 = vld [vmem:[#allocation2 + $0x88] sm:$0xf]  ;;  %2751 = vmatpush.bf16.msrb.mxu0 %v6334_v46 }
  0xc9   :  { %1781 = vrot.lane.b32.xlu1 %v1702_v11, %s6520_s26  ;;  %v6319_v11 = vld [vmem:[#allocation4 + $0x88] sm:$0xff]  ;;  %v1029_v18 = vor.u32 %v1028_v22, %v1025_v10  ;;  %v1718_v63 = vshrl.u32 %v1529_v53, 16  ;;  %v1721_v1 = vshll.u32 %v1529_v53, 16  ;;  %v996_v4 = vld [vmem:[#allocation2 + $0x20] sm:$0xf] }
  0xca   :  { %1775 = vrot.lane.b32.xlu2 %v1660_v27, %s6520_s26  ;;  %2652 = vmatpush.bf16.msrb.mxu2 %v6319_v11  ;;  %v733_v27 = vld [vmem:[#allocation2 + $0x8] sm:$0xe]  ;;  %v1309_v56 = vld [vmem:[#allocation2 + $0x94] sm:$0x1]  ;;  %v1530_v61 = vld [vmem:[#allocation2 + $0x8c] sm:$0x1] }
  0xcb   :  { %v693_v25 = vpop.permute.xlu1 %692  ;;  %v5612_v38 = vld [vmem:[#allocation3 + $0x28] sm:$0xf]  ;;  %v1030_v20 = vrot.slane %v1029_v18, 4  ;;  %v5543_v32 = vrot.slane %v733_v27, 9  ;;  %v1404_v44 = vrot.slane %v1309_v56, 5  ;;  %v1720_v12 = vrot.slane %v1718_v63, 4 }
  0xcc   :  { %728 = vst.msk [vmem:[#allocation3 + $0x104] sm:$0xf] %vm714_vm12, %v693_v25  ;;  %v5613_v0 = vor.u32 %v6269_v2, %v5612_v38  ;;  %1779 = vrot.lane.b32.xlu0 %v1688_v6, %s6520_s26  ;;  %v677_v55 = vpop.permute.xlu2 %676  ;;  %v1034_v2 = vrot.slane %v1032_v58, 5  ;;  %v1751_v6 = vrot.slane %v1749_v15, 5  ;;  %v5542_v25 = vrot.slane %v731_v9, 9 }
  0xcd   :  { %720 = vst.msk [vmem:[#allocation3 + $0x64] sm:$0xf] %vm714_vm12, %v677_v55  ;;  %v800_v38 = vrot.slane %v732_v14, 5  ;;  %v6292_v55 = vld [vmem:[#allocation3 + $0xf4] sm:$0xf]  ;;  %v1405_v58 = vsel %vm6913_vm11, %v5573_v19, %v1404_v44  ;;  %v1723_v22 = vrot.slane %v1721_v1, 5 }
  0xce   :  { %v691_v36 = vpop.permute.xlu0 %690  ;;  %2561 = vmatmul.bf16.gmra.mxu0 %v5613_v0  ;;  %v5694_v39 = vld [vmem:[#allocation3 + $0xdc] sm:$0xf0]  ;;  %v1035_v0 = vsel %vm6670_vm7, %v1030_v20, %v1034_v2  ;;  %v1752_v34 = vor.u32 %v1751_v6, %v1748_v47  ;;  %2653 = vmatpush.bf16.msrb.mxu2 %v6318_v29  ;;  %1488 = vst.msk [vmem:[#allocation3 + $0x20] sm:$0xf] %vm54_vm0, %v1472_v45  ;;  %v1068_v51 = vshll.u32 %v996_v4, 16 }
  0xcf   :  { %727 = vst.msk [vmem:[#allocation3 + $0xf0] sm:$0xf] %vm714_vm12, %v691_v36  ;;  %v5697_v48 = vor.u32 %v6287_v31, %v5694_v39  ;;  %v7153_v31 = vrot.slane %v1755_v40, 5  ;;  %v801_v35 = vsel %vm6913_vm11, %v5542_v25, %v800_v38  ;;  %v804_v36 = vrot.slane %v734_v43, 5  ;;  %v1473_v2 = vld [vmem:[#allocation2 + $0x20] sm:$0xf] }
  0xd0   :  { %1262 = vst.msk [vmem:[#allocation3 + $0x8] sm:$0xf] %vm54_vm0, %v1035_v0  ;;  %v1753_v3 = vrot.slane %v1752_v34, 4  ;;  %v1724_v50 = vor.u32 %v1723_v22, %v1720_v12  ;;  %v994_v40 = vld [vmem:[#allocation2 + $0x18] sm:$0xf]  ;;  %v1070_v6 = vrot.slane %v1068_v51, 5 }
  0xd1   :  { %2581 = vmatmul.bf16.gmra.mxu2 %v5693_v37  ;;  %2630 = vmatmul.bf16.gmra.mxu3 %v5697_v48  ;;  %v6326_v37 = vld [vmem:[#allocation4 + $0xc0] sm:$0xff]  ;;  %878 = vst.msk [vmem:[#allocation3 + $0x4] sm:$0xf] %vm54_vm0, %v801_v35  ;;  %v805_v8 = vsel %vm6913_vm11, %v5543_v32, %v804_v36  ;;  %v1051_v9 = vshrl.u32 %v994_v40, 16  ;;  %v995_v21 = vld [vmem:[#allocation2 + $0x1c] sm:$0x1] }
  0xd2   :  { %1783 = vrot.lane.b32.xlu1 %v1716_v41, %s6520_s26  ;;  %1428 = vrot.lane.b32.xlu2 %v1389_v16, %s6520_s26  ;;  %879 = vst.msk [vmem:[#allocation3 + $0x18] sm:$0xf] %vm54_vm0, %v805_v8  ;;  %v1065_v16 = vshrl.u32 %v996_v4, 16  ;;  %v1758_v18 = vsel %vm6670_vm7, %v1753_v3, %v7153_v31  ;;  %v1725_v47 = vrot.slane %v1724_v50, 4  ;;  %v1054_v24 = vshll.u32 %v994_v40, 16 }
  0xd3   :  { %v675_v13 = vpop.permute.xlu1 %674  ;;  %v6294_v41 = vld [vmem:[#allocation3 + $0x100] sm:$0xf0]  ;;  %2702 = vmatpush.bf16.msrb.mxu3 %v6326_v37  ;;  %1489 = vst.msk [vmem:[#allocation3 + $0x34] sm:$0xf] %vm54_vm0, %v1473_v2  ;;  %v1053_v38 = vrot.slane %v1051_v9, 4  ;;  %v1060_v27 = vshll.u32 %v995_v21, 16 }
  0xd4   :  { %719 = vst.msk [vmem:[#allocation3 + $0x50] sm:$0xf] %vm714_vm12, %v675_v13  ;;  %1432 = vrot.lane.b32.xlu0 %v1397_v60, %s6520_s26  ;;  %v955_v23 = vpop.permute.xlu2 %954  ;;  %v6274_v30 = vld [vmem:[#allocation3 + $0x60] sm:$0xf0]  ;;  %v1727_v60 = vshll.u32 %v1530_v61, 16  ;;  %v1067_v19 = vrot.slane %v1065_v16, 4 }
  0xd5   :  { %988 = vst.msk [vmem:[#allocation3 + $0x11c] sm:$0xf] %vm714_vm12, %v955_v23  ;;  %v997_v13 = vld [vmem:[#allocation2 + $0x24] sm:$0x1]  ;;  %v1056_v29 = vrot.slane %v1054_v24, 5  ;;  %v1062_v31 = vrot.slane %v1060_v27, 5 }
  0xd6   :  { %v953_v26 = vpop.permute.xlu0 %952  ;;  %v5712_v39 = vld [vmem:[#allocation3 + $0xf0] sm:$0xf]  ;;  %v1729_v49 = vrot.slane %v1727_v60, 5  ;;  %v1074_v17 = vshll.u32 %v997_v13, 16  ;;  %v1071_v25 = vor.u32 %v1070_v6, %v1067_v19  ;;  %v1825_v56 = vld [vmem:[#allocation2 + $0x18] sm:$0xe] }
  0xd7   :  { %987 = vst.msk [vmem:[#allocation3 + $0x108] sm:$0xf] %vm714_vm12, %v953_v26  ;;  %v5713_v62 = vor.u32 %v6294_v41, %v5712_v39  ;;  %v1823_v23 = vld [vmem:[#allocation2 + $0x10] sm:$0xe]  ;;  %v1057_v32 = vor.u32 %v1056_v29, %v1053_v38  ;;  %v1826_v37 = vld [vmem:[#allocation2 + $0x1c] sm:$0x1] }
  0xd8   :  { %v1076_v20 = vrot.slane %v1074_v17, 5  ;;  %v1730_v14 = vsel %vm6670_vm7, %v1725_v47, %v1729_v49  ;;  %v1072_v0 = vrot.slane %v1071_v25, 4  ;;  %v5574_v43 = vrot.slane %v1823_v23, 9  ;;  %v736_v8 = vld [vmem:[#allocation2 + $0x14] sm:$0x1] }
  0xd9   :  { %v5575_v41 = vrot.slane %v1825_v56, 9  ;;  %v1058_v46 = vrot.slane %v1057_v32, 4  ;;  %v808_v63 = vrot.slane %v736_v8, 5  ;;  %v737_v3 = vld [vmem:[#allocation2 + $0x18] sm:$0xe] }
  0xda   :  { %1436 = vrot.lane.b32.xlu1 %v1405_v58, %s6520_s26  ;;  %1430 = vrot.lane.b32.xlu2 %v1393_v52, %s6520_s26  ;;  %v1077_v36 = vsel %vm6670_vm7, %v1072_v0, %v1076_v20  ;;  %v738_v60 = vld [vmem:[#allocation2 + $0x1c] sm:$0x1]  ;;  %v1531_v13 = vld [vmem:[#allocation2 + $0x90] sm:$0xf]  ;;  %v1532_v49 = vld [vmem:[#allocation2 + $0x94] sm:$0x1] }
  0xdb   :  { %v697_v57 = vpop.permute.xlu1 %696  ;;  %v5632_v48 = vld [vmem:[#allocation3 + $0x50] sm:$0xf]  ;;  %1265 = vst.msk [vmem:[#allocation3 + $0x44] sm:$0xf] %vm54_vm0, %v1077_v36  ;;  %v1063_v58 = vsel %vm6670_vm7, %v1058_v46, %v1062_v31  ;;  %v812_v12 = vrot.slane %v738_v60, 5  ;;  %v1732_v51 = vshrl.u32 %v1531_v13, 16 }
  0xdc   :  { %730 = vst.msk [vmem:[#allocation3 + $0x12c] sm:$0xf] %vm714_vm12, %v697_v57  ;;  %v5633_v54 = vor.u32 %v6274_v30, %v5632_v48  ;;  %1434 = vrot.lane.b32.xlu0 %v1401_v33, %s6520_s26  ;;  %v681_v59 = vpop.permute.xlu2 %680  ;;  %v1824_v33 = vld [vmem:[#allocation2 + $0x14] sm:$0x1]  ;;  %v1893_v57 = vrot.slane %v1826_v37, 5  ;;  %v1735_v17 = vshll.u32 %v1531_v13, 16 }
  0xdd   :  { %722 = vst.msk [vmem:[#allocation3 + $0x8c] sm:$0xf] %vm714_vm12, %v681_v59  ;;  %v1889_v39 = vrot.slane %v1824_v33, 5  ;;  %v735_v48 = vld [vmem:[#allocation2 + $0x10] sm:$0xe]  ;;  %v1741_v19 = vshll.u32 %v1532_v49, 16 }
  0xde   :  { %v695_v10 = vpop.permute.xlu0 %694  ;;  %2566 = vmatmul.bf16.gmra.mxu0 %v5633_v54  ;;  %v5714_v11 = vld [vmem:[#allocation3 + $0x104] sm:$0xf0]  ;;  %v5544_v53 = vrot.slane %v735_v48, 9  ;;  %v1894_v61 = vsel %vm6913_vm11, %v5575_v41, %v1893_v57  ;;  %v6297_v4 = vld [vmem:[#allocation3 + $0x11c] sm:$0xf]  ;;  %v1734_v40 = vrot.slane %v1732_v51, 4 }
  0xdf   :  { %729 = vst.msk [vmem:[#allocation3 + $0x118] sm:$0xf] %vm714_vm12, %v695_v10  ;;  %v5717_v15 = vor.u32 %v6292_v55, %v5714_v11  ;;  %v1890_v52 = vsel %vm6913_vm11, %v5574_v43, %v1889_v39  ;;  %v5545_v11 = vrot.slane %v737_v3, 9  ;;  %v3433_v59 = vld [vmem:[#allocation2] sm:$0xe]  ;;  %v1737_v47 = vrot.slane %v1735_v17, 5 }
  0xe0   :  { %1967 = vst.msk [vmem:[#allocation3 + $0x10] sm:$0xf] %vm54_vm0, %v1890_v52  ;;  %v809_v10 = vsel %vm6913_vm11, %v5544_v53, %v808_v63  ;;  %v1000_v6 = vld [vmem:[#allocation2 + $0x30] sm:$0xf]  ;;  %v3434_v9 = vld [vmem:[#allocation2 + $0x4] sm:$0x1] }
  0xe1   :  { %2586 = vmatmul.bf16.gmra.mxu2 %v5713_v62  ;;  %2635 = vmatmul.bf16.gmra.mxu3 %v5717_v15  ;;  %1264 = vst.msk [vmem:[#allocation3 + $0x30] sm:$0xf] %vm54_vm0, %v1063_v58  ;;  %v813_v50 = vsel %vm6913_vm11, %v5545_v11, %v812_v12  ;;  %v1738_v21 = vor.u32 %v1737_v47, %v1734_v40  ;;  %v1743_v24 = vrot.slane %v1741_v19, 5  ;;  %v5902_v25 = vrot.slane %v3433_v59, 9  ;;  %v1475_v31 = vld [vmem:[#allocation2 + $0x30] sm:$0xf] }
  0xe2   :  { %1785 = vrot.lane.b32.xlu2 %v1730_v14, %s6520_s26  ;;  %1968 = vst.msk [vmem:[#allocation3 + $0x24] sm:$0xf] %vm54_vm0, %v1894_v61  ;;  %v1001_v14 = vld [vmem:[#allocation2 + $0x34] sm:$0x1]  ;;  %v1096_v27 = vshll.u32 %v1000_v6, 16  ;;  %v3499_v23 = vrot.slane %v3434_v9, 5 }
  0xe3   :  { %v679_v26 = vpop.permute.xlu1 %678  ;;  %v6299_v45 = vld [vmem:[#allocation3 + $0x128] sm:$0xf0]  ;;  %880 = vst.msk [vmem:[#allocation3 + $0x2c] sm:$0xf] %vm54_vm0, %v809_v10  ;;  %v1102_v29 = vshll.u32 %v1001_v14, 16  ;;  %v1739_v0 = vrot.slane %v1738_v21, 4 }
  0xe4   :  { %721 = vst.msk [vmem:[#allocation3 + $0x78] sm:$0xf] %vm714_vm12, %v679_v26  ;;  %1789 = vrot.lane.b32.xlu0 %v1758_v18, %s6520_s26  ;;  %v1760_v34 = vpop.permute.xlu2 %1759  ;;  %v6279_v35 = vld [vmem:[#allocation3 + $0x88] sm:$0xf0]  ;;  %v1474_v18 = vld [vmem:[#allocation2 + $0x28] sm:$0xf]  ;;  %v3500_v57 = vsel %vm6913_vm11, %v5902_v25, %v3499_v23 }
  0xe5   :  { %1807 = vst.msk [vmem:[#allocation3 + $0xc] sm:$0xf] %vm714_vm12, %v1760_v34  ;;  %v1093_v26 = vshrl.u32 %v1000_v6, 16  ;;  %v1098_v33 = vrot.slane %v1096_v27, 5  ;;  %v1104_v56 = vrot.slane %v1102_v29, 5  ;;  %v1744_v34 = vsel %vm6670_vm7, %v1739_v0, %v1743_v24 }
  0xe6   :  { %v957_v30 = vpop.permute.xlu0 %956  ;;  %v5732_v44 = vld [vmem:[#allocation3 + $0x118] sm:$0xf]  ;;  %881 = vst.msk [vmem:[#allocation3 + $0x40] sm:$0xf] %vm54_vm0, %v813_v50  ;;  %v999_v36 = vld [vmem:[#allocation2 + $0x2c] sm:$0x1] }
  0xe7   :  { %989 = vst.msk [vmem:[#allocation3 + $0x130] sm:$0xf] %vm714_vm12, %v957_v30  ;;  %v5733_v62 = vor.u32 %v6299_v45, %v5732_v44  ;;  %v1095_v38 = vrot.slane %v1093_v26, 4  ;;  %v5608_v30 = vld [vmem:[#allocation3 + $0x10] sm:$0xf]  ;;  %v1088_v46 = vshll.u32 %v999_v36, 16 }
  0xe8   :  { %1490 = vst.msk [vmem:[#allocation3 + $0x48] sm:$0xf] %vm54_vm0, %v1474_v18  ;;  %v1827_v52 = vld [vmem:[#allocation2 + $0x20] sm:$0xe]  ;;  %v1828_v8 = vld [vmem:[#allocation2 + $0x24] sm:$0x1] }
  0xe9   :  { %v6266_v32 = vld [vmem:[#allocation3 + $0x20] sm:$0xf0]  ;;  %1491 = vst.msk [vmem:[#allocation3 + $0x5c] sm:$0xf] %vm54_vm0, %v1475_v31  ;;  %v1099_v41 = vor.u32 %v1098_v33, %v1095_v38  ;;  %v1090_v63 = vrot.slane %v1088_v46, 5  ;;  %v5576_v10 = vrot.slane %v1827_v52, 9 }
  0xea   :  { %1787 = vrot.lane.b32.xlu2 %v1744_v34, %s6520_s26  ;;  %v5609_v48 = vor.u32 %v6266_v32, %v5608_v30  ;;  %v1897_v11 = vrot.slane %v1828_v8, 5  ;;  %v740_v49 = vld [vmem:[#allocation2 + $0x24] sm:$0x1]  ;;  %v741_v6 = vld [vmem:[#allocation2 + $0x28] sm:$0xe] }
  0xeb   :  { %v1409_v54 = vpop.permute.xlu1 %1408  ;;  %v5652_v55 = vld [vmem:[#allocation3 + $0x78] sm:$0xf]  ;;  %v816_v19 = vrot.slane %v740_v49, 5  ;;  %v742_v9 = vld [vmem:[#allocation2 + $0x2c] sm:$0x1]  ;;  %v5547_v24 = vrot.slane %v741_v6, 9 }
  0xec   :  { %1455 = vst.msk [vmem:[#allocation3 + $0x1c] sm:$0xf] %vm714_vm12, %v1409_v54  ;;  %v5653_v1 = vor.u32 %v6279_v35, %v5652_v55  ;;  %v929_v2 = vpop.permute.xlu2 %928  ;;  %v998_v35 = vld [vmem:[#allocation2 + $0x28] sm:$0xf]  ;;  %v1100_v55 = vrot.slane %v1099_v41, 4  ;;  %v1898_v59 = vsel %vm6913_vm11, %v5576_v10, %v1897_v11  ;;  %v820_v14 = vrot.slane %v742_v9, 5 }
  0xed   :  { %975 = vst.msk [vmem:[#allocation3 + $0x18] sm:$0xf] %vm714_vm12, %v929_v2  ;;  %v1079_v44 = vshrl.u32 %v998_v35, 16  ;;  %v1082_v45 = vshll.u32 %v998_v35, 16  ;;  %v1004_v25 = vld [vmem:[#allocation2 + $0x40] sm:$0xf] }
  0xee   :  { %v1407_v22 = vpop.permute.xlu0 %1406  ;;  %2571 = vmatmul.bf16.gmra.mxu0 %v5653_v1  ;;  %v5734_v15 = vld [vmem:[#allocation3 + $0x12c] sm:$0xf0]  ;;  %v1829_v1 = vld [vmem:[#allocation2 + $0x28] sm:$0xe]  ;;  %1969 = vst.msk [vmem:[#allocation3 + $0x38] sm:$0xf] %vm54_vm0, %v1898_v59  ;;  %v821_v0 = vsel %vm6913_vm11, %v5547_v24, %v820_v14 }
  0xef   :  { %1454 = vst.msk [vmem:[#allocation3 + $0x8] sm:$0xf] %vm714_vm12, %v1407_v22  ;;  %v5737_v16 = vor.u32 %v6297_v4, %v5734_v15  ;;  %v1081_v58 = vrot.slane %v1079_v44, 4  ;;  %v1084_v61 = vrot.slane %v1082_v45, 5  ;;  %v1830_v4 = vld [vmem:[#allocation2 + $0x2c] sm:$0x1] }
  0xf0   :  { %v6263_v22 = vld [vmem:[#allocation3 + $0xc] sm:$0xf]  ;;  %v5577_v13 = vrot.slane %v1829_v1, 9  ;;  %v1901_v50 = vrot.slane %v1830_v4, 5  ;;  %v1005_v27 = vld [vmem:[#allocation2 + $0x44] sm:$0x1] }
  0xf1   :  { %2591 = vmatmul.bf16.gmra.mxu2 %v5733_v62  ;;  %2640 = vmatmul.bf16.gmra.mxu3 %v5737_v16  ;;  %v1105_v62 = vsel %vm6670_vm7, %v1100_v55, %v1104_v56  ;;  %v1085_v15 = vor.u32 %v1084_v61, %v1081_v58  ;;  %v739_v16 = vld [vmem:[#allocation2 + $0x20] sm:$0xe]  ;;  %v1121_v29 = vshrl.u32 %v1004_v25, 16  ;;  %v1124_v23 = vshll.u32 %v1004_v25, 16  ;;  %v1002_v34 = vld [vmem:[#allocation2 + $0x38] sm:$0xf] }
  0xf2   :  { %v5546_v51 = vrot.slane %v739_v16, 9  ;;  %1267 = vst.msk [vmem:[#allocation3 + $0x6c] sm:$0xf] %vm54_vm0, %v1105_v62  ;;  %v1902_v21 = vsel %vm6913_vm11, %v5577_v13, %v1901_v50  ;;  %v1130_v31 = vshll.u32 %v1005_v27, 16  ;;  %v1477_v56 = vld [vmem:[#allocation2 + $0x40] sm:$0xf] }
  0xf3   :  { %v927_v20 = vpop.permute.xlu1 %926  ;;  %v6265_v54 = vld [vmem:[#allocation3 + $0x18] sm:$0xf0]  ;;  %v1086_v18 = vrot.slane %v1085_v15, 4  ;;  %1970 = vst.msk [vmem:[#allocation3 + $0x4c] sm:$0xf] %vm54_vm0, %v1902_v21  ;;  %v1123_v32 = vrot.slane %v1121_v29, 4 }
  0xf4   :  { %974 = vst.msk [vmem:[#allocation3 + $0x4] sm:$0xf] %vm714_vm12, %v927_v20  ;;  %v1764_v37 = vpop.permute.xlu2 %1763  ;;  %v5594_v39 = vld [vmem:[#allocation3 + $0x14] sm:$0xf0]  ;;  %v817_v38 = vsel %vm6913_vm11, %v5546_v51, %v816_v19  ;;  %v1126_v33 = vrot.slane %v1124_v23, 5  ;;  %v1107_v44 = vshrl.u32 %v1002_v34, 16 }
  0xf5   :  { %1809 = vst.msk [vmem:[#allocation3 + $0x34] sm:$0xf] %vm714_vm12, %v1764_v37  ;;  %v1091_v20 = vsel %vm6670_vm7, %v1086_v18, %v1090_v63  ;;  %v1132_v37 = vrot.slane %v1130_v31, 5  ;;  %v5628_v41 = vld [vmem:[#allocation3 + $0x38] sm:$0xf]  ;;  %v1110_v45 = vshll.u32 %v1002_v34, 16 }
  0xf6   :  { %v1762_v43 = vpop.permute.xlu0 %1761  ;;  %v5600_v53 = vld [vmem:[#allocation3 + $0x8] sm:$0xf]  ;;  %1266 = vst.msk [vmem:[#allocation3 + $0x58] sm:$0xf] %vm54_vm0, %v1091_v20  ;;  %v1127_v36 = vor.u32 %v1126_v33, %v1123_v32  ;;  %v1109_v8 = vrot.slane %v1107_v44, 4 }
  0xf7   :  { %1808 = vst.msk [vmem:[#allocation3 + $0x20] sm:$0xf] %vm714_vm12, %v1762_v43  ;;  %v5601_v40 = vor.u32 %v6265_v54, %v5600_v53  ;;  %v1476_v43 = vld [vmem:[#allocation2 + $0x38] sm:$0xf]  ;;  %v1112_v53 = vrot.slane %v1110_v45, 5 }
  0xf8   :  { %882 = vst.msk [vmem:[#allocation3 + $0x54] sm:$0xf] %vm54_vm0, %v817_v38  ;;  %v1831_v54 = vld [vmem:[#allocation2 + $0x30] sm:$0xe]  ;;  %v1833_v15 = vld [vmem:[#allocation2 + $0x38] sm:$0xe] }
  0xf9   :  { %883 = vst.msk [vmem:[#allocation3 + $0x68] sm:$0xf] %vm54_vm0, %v821_v0  ;;  %v1113_v11 = vor.u32 %v1112_v53, %v1109_v8  ;;  %v1834_v13 = vld [vmem:[#allocation2 + $0x3c] sm:$0x1]  ;;  %v5579_v50 = vrot.slane %v1833_v15, 9 }
  0xfa   :  { %1492 = vst.msk [vmem:[#allocation3 + $0x70] sm:$0xf] %vm54_vm0, %v1476_v43  ;;  %v6271_v61 = vld [vmem:[#allocation3 + $0x48] sm:$0xf0]  ;;  %v1909_v49 = vrot.slane %v1834_v13, 5 }
  0xfb   :  { %v1413_v3 = vpop.permute.xlu1 %1412  ;;  %v6262_v60 = vld [vmem:[#allocation3 + $0x4] sm:$0xf]  ;;  %1493 = vst.msk [vmem:[#allocation3 + $0x84] sm:$0xf] %vm54_vm0, %v1477_v56  ;;  %v5629_v10 = vor.u32 %v6271_v61, %v5628_v41  ;;  %v1114_v16 = vrot.slane %v1113_v11, 4 }
  0xfc   :  { %1457 = vst.msk [vmem:[#allocation3 + $0x44] sm:$0xf] %vm714_vm12, %v1413_v3  ;;  %v5597_v12 = vor.u32 %v6262_v60, %v5594_v39  ;;  %v933_v26 = vpop.permute.xlu2 %932  ;;  %v1003_v39 = vld [vmem:[#allocation2 + $0x3c] sm:$0x1]  ;;  %v5578_v3 = vrot.slane %v1831_v54, 9  ;;  %v1910_v24 = vsel %vm6913_vm11, %v5579_v50, %v1909_v49 }
  0xfd   :  { %3577 = vst.msk [vmem:[#allocation3 + $0x4] sm:$0xf] %vm54_vm0, %v3500_v57  ;;  %v1116_v52 = vshll.u32 %v1003_v39, 16  ;;  %v6268_v62 = vld [vmem:[#allocation3 + $0x34] sm:$0xf] }
  0xfe   :  { %v1411_v17 = vpop.permute.xlu0 %1410  ;;  %2605 = vmatmul.bf16.vlgmr.msra.gmra.mxu1 %v5597_v12  ;;  %v5602_v2 = vld [vmem:[#allocation3 + $0x1c] sm:$0xf0]  ;;  %5894 = vmatmul.msk.bf16.vlgmr.msrb.gmra.mxu0 %vm2523_vm13, %v5609_v48  ;;  %977 = vst.msk [vmem:[#allocation3 + $0x40] sm:$0xf] %vm714_vm12, %v933_v26  ;;  %v1128_v48 = vrot.slane %v1127_v36, 4 }
  0xff   :  { %1456 = vst.msk [vmem:[#allocation3 + $0x30] sm:$0xf] %vm714_vm12, %v1411_v17  ;;  %v5605_v47 = vor.u32 %v6263_v22, %v5602_v2  ;;  %v1118_v1 = vrot.slane %v1116_v52, 5  ;;  %v1832_v12 = vld [vmem:[#allocation2 + $0x34] sm:$0x1] }
 0x100   :  { %v1133_v63 = vsel %vm6670_vm7, %v1128_v48, %v1132_v37  ;;  %v1905_v59 = vrot.slane %v1832_v12, 5  ;;  %v743_v51 = vld [vmem:[#allocation2 + $0x30] sm:$0xe]  ;;  %v744_v18 = vld [vmem:[#allocation2 + $0x34] sm:$0x1] }
 0x101   :  { %2654 = vmatmul.bf16.vlgmr.msrb.gmra.mxu2 %v5601_v40  ;;  %2703 = vmatmul.bf16.vlgmr.msrb.gmra.mxu3 %v5605_v47  ;;  %1269 = vst.msk [vmem:[#allocation3 + $0x94] sm:$0xf] %vm54_vm0, %v1133_v63  ;;  %v5548_v19 = vrot.slane %v743_v51, 9  ;;  %v1119_v6 = vsel %vm6670_vm7, %v1114_v16, %v1118_v1  ;;  %v745_v26 = vld [vmem:[#allocation2 + $0x38] sm:$0xe]  ;;  %v824_v14 = vrot.slane %v744_v18, 5 }
 0x102   :  { %v1906_v9 = vsel %vm6913_vm11, %v5578_v3, %v1905_v59  ;;  %v746_v20 = vld [vmem:[#allocation2 + $0x3c] sm:$0x1]  ;;  %1268 = vst.msk [vmem:[#allocation3 + $0x80] sm:$0xf] %vm54_vm0, %v1119_v6  ;;  %v5549_v25 = vrot.slane %v745_v26, 9 }
 0x103   :  { %v931_v30 = vpop.permute.xlu1 %930  ;;  %v6270_v58 = vld [vmem:[#allocation3 + $0x40] sm:$0xf0]  ;;  %v828_v38 = vrot.slane %v746_v20, 5  ;;  %1971 = vst.msk [vmem:[#allocation3 + $0x60] sm:$0xf] %vm54_vm0, %v1906_v9  ;;  %v825_v27 = vsel %vm6913_vm11, %v5548_v19, %v824_v14 }
 0x104   :  { %976 = vst.msk [vmem:[#allocation3 + $0x2c] sm:$0xf] %vm714_vm12, %v931_v30  ;;  %v1768_v46 = vpop.permute.xlu2 %1767  ;;  %v1006_v29 = vld [vmem:[#allocation2 + $0x58] sm:$0xf]  ;;  %v1007_v23 = vld [vmem:[#allocation2 + $0x5c] sm:$0x1] }
 0x105   :  { %v5614_v57 = vld [vmem:[#allocation3 + $0x3c] sm:$0xf0]  ;;  %1811 = vst.msk [vmem:[#allocation3 + $0x5c] sm:$0xf] %vm714_vm12, %v1768_v46  ;;  %v829_v0 = vsel %vm6913_vm11, %v5549_v25, %v828_v38  ;;  %v1478_v31 = vld [vmem:[#allocation2 + $0x48] sm:$0xf] }
 0x106   :  { %v1766_v35 = vpop.permute.xlu0 %1765  ;;  %v5620_v55 = vld [vmem:[#allocation3 + $0x30] sm:$0xf]  ;;  %1972 = vst.msk [vmem:[#allocation3 + $0x74] sm:$0xf] %vm54_vm0, %v1910_v24  ;;  %v1135_v43 = vshrl.u32 %v1006_v29, 16  ;;  %v1138_v32 = vshll.u32 %v1006_v29, 16 }
 0x107   :  { %1810 = vst.msk [vmem:[#allocation3 + $0x48] sm:$0xf] %vm714_vm12, %v1766_v35  ;;  %v5621_v40 = vor.u32 %v6270_v58, %v5620_v55  ;;  %v1144_v33 = vshll.u32 %v1007_v23, 16  ;;  %v1008_v56 = vld [vmem:[#allocation2 + $0x60] sm:$0xf] }
 0x108   :  { %884 = vst.msk [vmem:[#allocation3 + $0x7c] sm:$0xf] %vm54_vm0, %v825_v27  ;;  %v1137_v34 = vrot.slane %v1135_v43, 4  ;;  %v1140_v35 = vrot.slane %v1138_v32, 5  ;;  %v1009_v36 = vld [vmem:[#allocation2 + $0x64] sm:$0x1] }
 0x109   :  { %885 = vst.msk [vmem:[#allocation3 + $0x90] sm:$0xf] %vm54_vm0, %v829_v0  ;;  %v1149_v39 = vshrl.u32 %v1008_v56, 16  ;;  %v1146_v44 = vrot.slane %v1144_v33, 5  ;;  %v1152_v45 = vshll.u32 %v1008_v56, 16  ;;  %v1158_v46 = vshll.u32 %v1009_v36, 16 }
 0x10a   :  { %v1141_v41 = vor.u32 %v1140_v35, %v1137_v34  ;;  %1494 = vst.msk [vmem:[#allocation3 + $0x98] sm:$0xf] %vm54_vm0, %v1478_v31  ;;  %v5648_v8 = vld [vmem:[#allocation3 + $0x60] sm:$0xf]  ;;  %v1836_v12 = vld [vmem:[#allocation2 + $0x44] sm:$0x1] }
 0x10b   :  { %v1417_v60 = vpop.permute.xlu1 %1416  ;;  %v6267_v4 = vld [vmem:[#allocation3 + $0x2c] sm:$0xf]  ;;  %v1151_v52 = vrot.slane %v1149_v39, 4  ;;  %v1154_v54 = vrot.slane %v1152_v45, 5  ;;  %v1160_v63 = vrot.slane %v1158_v46, 5  ;;  %v1913_v16 = vrot.slane %v1836_v12, 5 }
 0x10c   :  { %1459 = vst.msk [vmem:[#allocation3 + $0x6c] sm:$0xf] %vm714_vm12, %v1417_v60  ;;  %v5617_v22 = vor.u32 %v6267_v4, %v5614_v57  ;;  %v937_v21 = vpop.permute.xlu2 %936  ;;  %v1142_v53 = vrot.slane %v1141_v41, 4  ;;  %v1835_v1 = vld [vmem:[#allocation2 + $0x40] sm:$0xe] }
 0x10d   :  { %979 = vst.msk [vmem:[#allocation3 + $0x68] sm:$0xf] %vm714_vm12, %v937_v21  ;;  %v6276_v61 = vld [vmem:[#allocation3 + $0x70] sm:$0xf0]  ;;  %v1155_v11 = vor.u32 %v1154_v54, %v1151_v52  ;;  %v1838_v15 = vld [vmem:[#allocation2 + $0x4c] sm:$0x1] }
 0x10e   :  { %v1415_v17 = vpop.permute.xlu0 %1414  ;;  %2610 = vmatmul.bf16.gmra.mxu1 %v5617_v22  ;;  %v5622_v2 = vld [vmem:[#allocation3 + $0x44] sm:$0xf0]  ;;  %5895 = vmatmul.msk.bf16.gmra.mxu0 %vm2523_vm13, %v5629_v10  ;;  %v5649_v4 = vor.u32 %v6276_v61, %v5648_v8  ;;  %v1147_v10 = vsel %vm6670_vm7, %v1142_v53, %v1146_v44  ;;  %v5580_v13 = vrot.slane %v1835_v1, 9  ;;  %v1917_v49 = vrot.slane %v1838_v15, 5  ;;  %v4536_v20 = vld [vmem:[#allocation2 + $0x4c] sm:$0x1] }
 0x10f   :  { %1458 = vst.msk [vmem:[#allocation3 + $0x58] sm:$0xf] %vm714_vm12, %v1415_v17  ;;  %v5625_v47 = vor.u32 %v6268_v62, %v5622_v2  ;;  %v1837_v22 = vld [vmem:[#allocation2 + $0x48] sm:$0xe]  ;;  %v1156_v59 = vrot.slane %v1155_v11, 4 }
 0x110   :  { %1270 = vst.msk [vmem:[#allocation3 + $0xa8] sm:$0xf] %vm54_vm0, %v1147_v10  ;;  %v5581_v50 = vrot.slane %v1837_v22, 9  ;;  %v6273_v17 = vld [vmem:[#allocation3 + $0x5c] sm:$0xf]  ;;  %v1914_v6 = vsel %vm6913_vm11, %v5580_v13, %v1913_v16 }
 0x111   :  { %2659 = vmatmul.bf16.gmra.mxu2 %v5621_v40  ;;  %2708 = vmatmul.bf16.gmra.mxu3 %v5625_v47  ;;  %v4535_v18 = vld [vmem:[#allocation2 + $0x48] sm:$0xe]  ;;  %v1161_v47 = vsel %vm6670_vm7, %v1156_v59, %v1160_v63  ;;  %1973 = vst.msk [vmem:[#allocation3 + $0x88] sm:$0xf] %vm54_vm0, %v1914_v6  ;;  %v1011_v25 = vld [vmem:[#allocation2 + $0x6c] sm:$0x1] }
 0x112   :  { %1271 = vst.msk [vmem:[#allocation3 + $0xbc] sm:$0xf] %vm54_vm0, %v1161_v47  ;;  %v1918_v26 = vsel %vm6913_vm11, %v5581_v50, %v1917_v49  ;;  %v5941_v21 = vrot.slane %v4535_v18, 9  ;;  %v1480_v24 = vld [vmem:[#allocation2 + $0x68] sm:$0xf]  ;;  %v1172_v0 = vshll.u32 %v1011_v25, 16 }
 0x113   :  { %v935_v30 = vpop.permute.xlu1 %934  ;;  %v6275_v58 = vld [vmem:[#allocation3 + $0x68] sm:$0xf0]  ;;  %v1010_v14 = vld [vmem:[#allocation2 + $0x68] sm:$0xf]  ;;  %1974 = vst.msk [vmem:[#allocation3 + $0x9c] sm:$0xf] %vm54_vm0, %v1918_v26 }
 0x114   :  { %978 = vst.msk [vmem:[#allocation3 + $0x54] sm:$0xf] %vm714_vm12, %v935_v30  ;;  %v1772_v57 = vpop.permute.xlu2 %1771  ;;  %v5634_v48 = vld [vmem:[#allocation3 + $0x64] sm:$0xf0]  ;;  %v1479_v27 = vld [vmem:[#allocation2 + $0x60] sm:$0xf] }
 0x115   :  { %1813 = vst.msk [vmem:[#allocation3 + $0x84] sm:$0xf] %vm714_vm12, %v1772_v57  ;;  %v1163_v29 = vshrl.u32 %v1010_v14, 16  ;;  %v1166_v23 = vshll.u32 %v1010_v14, 16  ;;  %v4615_v30 = vrot.slane %v4536_v20, 5  ;;  %v1174_v34 = vrot.slane %v1172_v0, 5 }
 0x116   :  { %v1770_v37 = vpop.permute.xlu0 %1769  ;;  %v5640_v55 = vld [vmem:[#allocation3 + $0x58] sm:$0xf]  ;;  %v1012_v31 = vld [vmem:[#allocation2 + $0x70] sm:$0xf]  ;;  %1496 = vst.msk [vmem:[#allocation3 + $0xc0] sm:$0xf] %vm54_vm0, %v1480_v24 }
 0x117   :  { %1812 = vst.msk [vmem:[#allocation3 + $0x70] sm:$0xf] %vm714_vm12, %v1770_v37  ;;  %v5641_v19 = vor.u32 %v6275_v58, %v5640_v55  ;;  %v1165_v43 = vrot.slane %v1163_v29, 4  ;;  %v1168_v32 = vrot.slane %v1166_v23, 5  ;;  %v1013_v33 = vld [vmem:[#allocation2 + $0x74] sm:$0x1]  ;;  %v4616_v45 = vsel %vm6913_vm11, %v5941_v21, %v4615_v30 }
 0x118   :  { %1495 = vst.msk [vmem:[#allocation3 + $0xac] sm:$0xf] %vm54_vm0, %v1479_v27  ;;  %v1177_v35 = vshrl.u32 %v1012_v31, 16  ;;  %v1180_v37 = vshll.u32 %v1012_v31, 16  ;;  %v1186_v39 = vshll.u32 %v1013_v33, 16 }
 0x119   :  { %v1169_v36 = vor.u32 %v1168_v32, %v1165_v43  ;;  %v1839_v41 = vld [vmem:[#allocation2 + $0x60] sm:$0xe]  ;;  %v5668_v8 = vld [vmem:[#allocation3 + $0x88] sm:$0xf]  ;;  %v1842_v22 = vld [vmem:[#allocation2 + $0x6c] sm:$0x1] }
 0x11a   :  { %v1179_v57 = vrot.slane %v1177_v35, 4  ;;  %v5582_v52 = vrot.slane %v1839_v41, 9  ;;  %v1182_v54 = vrot.slane %v1180_v37, 5  ;;  %v6281_v61 = vld [vmem:[#allocation3 + $0x98] sm:$0xf0]  ;;  %v1188_v63 = vrot.slane %v1186_v39, 5 }
 0x11b   :  { %v1421_v3 = vpop.permute.xlu1 %1420  ;;  %v6272_v60 = vld [vmem:[#allocation3 + $0x54] sm:$0xf]  ;;  %v1170_v53 = vrot.slane %v1169_v36, 4  ;;  %v1841_v1 = vld [vmem:[#allocation2 + $0x68] sm:$0xe]  ;;  %v5669_v10 = vor.u32 %v6281_v61, %v5668_v8  ;;  %v1925_v59 = vrot.slane %v1842_v22, 5 }
 0x11c   :  { %1461 = vst.msk [vmem:[#allocation3 + $0x94] sm:$0xf] %vm714_vm12, %v1421_v3  ;;  %v5637_v62 = vor.u32 %v6272_v60, %v5634_v48  ;;  %v941_v9 = vpop.permute.xlu2 %940  ;;  %v1840_v48 = vld [vmem:[#allocation2 + $0x64] sm:$0x1]  ;;  %v1183_v12 = vor.u32 %v1182_v54, %v1179_v57  ;;  %v5583_v16 = vrot.slane %v1841_v1, 9 }
 0x11d   :  { %981 = vst.msk [vmem:[#allocation3 + $0x90] sm:$0xf] %vm714_vm12, %v941_v9  ;;  %v6278_v58 = vld [vmem:[#allocation3 + $0x84] sm:$0xf]  ;;  %v1921_v3 = vrot.slane %v1840_v48, 5  ;;  %v1175_v11 = vsel %vm6670_vm7, %v1170_v53, %v1174_v34 }
 0x11e   :  { %v1419_v51 = vpop.permute.xlu0 %1418  ;;  %2615 = vmatmul.bf16.gmra.mxu1 %v5637_v62  ;;  %v5642_v2 = vld [vmem:[#allocation3 + $0x6c] sm:$0xf0]  ;;  %5896 = vmatmul.msk.bf16.gmra.mxu0 %vm2523_vm13, %v5649_v4  ;;  %4672 = vst.msk [vmem:[#allocation3 + $0x9c] sm:$0xf] %vm54_vm0, %v4616_v45  ;;  %v4176_v50 = vld [vmem:[#allocation2 + $0x48] sm:$0xf]  ;;  %v1926_v26 = vsel %vm6913_vm11, %v5583_v16, %v1925_v59 }
 0x11f   :  { %1460 = vst.msk [vmem:[#allocation3 + $0x80] sm:$0xf] %vm714_vm12, %v1419_v51  ;;  %v5645_v40 = vor.u32 %v6273_v17, %v5642_v2  ;;  %v1922_v13 = vsel %vm6913_vm11, %v5582_v52, %v1921_v3  ;;  %v1184_v49 = vrot.slane %v1183_v12, 4  ;;  %v1014_v2 = vld [vmem:[#allocation2 + $0x78] sm:$0xf] }
 0x120   :  { %1272 = vst.msk [vmem:[#allocation3 + $0xd0] sm:$0xf] %vm54_vm0, %v1175_v11  ;;  %v1015_v47 = vld [vmem:[#allocation2 + $0x7c] sm:$0x1]  ;;  %v1191_v6 = vshrl.u32 %v1014_v2, 16  ;;  %v1194_v21 = vshll.u32 %v1014_v2, 16 }
 0x121   :  { %2664 = vmatmul.bf16.gmra.mxu2 %v5641_v19  ;;  %2713 = vmatmul.bf16.gmra.mxu3 %v5645_v40  ;;  %1975 = vst.msk [vmem:[#allocation3 + $0xb0] sm:$0xf] %vm54_vm0, %v1922_v13  ;;  %v1189_v40 = vsel %vm6670_vm7, %v1184_v49, %v1188_v63  ;;  %v1481_v20 = vld [vmem:[#allocation2 + $0x70] sm:$0xf]  ;;  %v1200_v24 = vshll.u32 %v1015_v47, 16 }
 0x122   :  { %1273 = vst.msk [vmem:[#allocation3 + $0xe4] sm:$0xf] %vm54_vm0, %v1189_v40  ;;  %v1193_v14 = vrot.slane %v1191_v6, 4  ;;  %v1016_v25 = vld [vmem:[#allocation2 + $0x80] sm:$0xf] }
 0x123   :  { %v939_v38 = vpop.permute.xlu1 %938  ;;  %v6280_v55 = vld [vmem:[#allocation3 + $0x90] sm:$0xf0]  ;;  %v1017_v27 = vld [vmem:[#allocation2 + $0x84] sm:$0x1]  ;;  %1976 = vst.msk [vmem:[#allocation3 + $0xc4] sm:$0xf] %vm54_vm0, %v1926_v26 }
 0x124   :  { %980 = vst.msk [vmem:[#allocation3 + $0x7c] sm:$0xf] %vm714_vm12, %v939_v38  ;;  %v5654_v44 = vld [vmem:[#allocation3 + $0x8c] sm:$0xf0]  ;;  %v1776_v46 = vpop.permute.xlu2 %1775  ;;  %v1196_v38 = vrot.slane %v1194_v21, 5  ;;  %v1205_v30 = vshrl.u32 %v1016_v25, 16 }
 0x125   :  { %1815 = vst.msk [vmem:[#allocation3 + $0xac] sm:$0xf] %vm714_vm12, %v1776_v46  ;;  %v1482_v23 = vld [vmem:[#allocation2 + $0x78] sm:$0xf]  ;;  %v1208_v0 = vshll.u32 %v1016_v25, 16  ;;  %v1202_v43 = vrot.slane %v1200_v24, 5 }
 0x126   :  { %v1774_v56 = vpop.permute.xlu0 %1773  ;;  %v5660_v15 = vld [vmem:[#allocation3 + $0x80] sm:$0xf]  ;;  %v1197_v31 = vor.u32 %v1196_v38, %v1193_v14  ;;  %v1214_v32 = vshll.u32 %v1017_v27, 16  ;;  %1497 = vst.msk [vmem:[#allocation3 + $0xd4] sm:$0xf] %vm54_vm0, %v1481_v20  ;;  %v1207_v33 = vrot.slane %v1205_v30, 4 }
 0x127   :  { %1814 = vst.msk [vmem:[#allocation3 + $0x98] sm:$0xf] %vm714_vm12, %v1774_v56  ;;  %v5661_v18 = vor.u32 %v6280_v55, %v5660_v15  ;;  %v1210_v56 = vrot.slane %v1208_v0, 5  ;;  %v1843_v34 = vld [vmem:[#allocation2 + $0x70] sm:$0xe] }
 0x128   :  { %v5688_v36 = vld [vmem:[#allocation3 + $0xb0] sm:$0xf]  ;;  %1498 = vst.msk [vmem:[#allocation3 + $0xe8] sm:$0xf] %vm54_vm0, %v1482_v23  ;;  %v1198_v37 = vrot.slane %v1197_v31, 4  ;;  %v1216_v39 = vrot.slane %v1214_v32, 5 }
 0x129   :  { %v1211_v41 = vor.u32 %v1210_v56, %v1207_v33  ;;  %v1845_v45 = vld [vmem:[#allocation2 + $0x78] sm:$0xe]  ;;  %v1846_v48 = vld [vmem:[#allocation2 + $0x7c] sm:$0x1]  ;;  %v5584_v52 = vrot.slane %v1843_v34, 9 }
 0x12a   :  { %v1203_v46 = vsel %vm6670_vm7, %v1198_v37, %v1202_v43  ;;  %v5585_v53 = vrot.slane %v1845_v45, 9  ;;  %v6286_v1 = vld [vmem:[#allocation3 + $0xc0] sm:$0xf0]  ;;  %v1483_v22 = vld [vmem:[#allocation2 + $0x80] sm:$0xf] }
 0x12b   :  { %v1425_v60 = vpop.permute.xlu1 %1424  ;;  %v6277_v4 = vld [vmem:[#allocation3 + $0x7c] sm:$0xf]  ;;  %1274 = vst.msk [vmem:[#allocation3 + $0xf8] sm:$0xf] %vm54_vm0, %v1203_v46  ;;  %v1212_v55 = vrot.slane %v1211_v41, 4 }
 0x12c   :  { %1463 = vst.msk [vmem:[#allocation3 + $0xbc] sm:$0xf] %vm714_vm12, %v1425_v60  ;;  %v5657_v62 = vor.u32 %v6277_v4, %v5654_v44  ;;  %v1429_v9 = vpop.permute.xlu2 %1428  ;;  %v1844_v44 = vld [vmem:[#allocation2 + $0x74] sm:$0x1]  ;;  %v6283_v63 = vld [vmem:[#allocation3 + $0xac] sm:$0xf]  ;;  %v5689_v4 = vor.u32 %v6286_v1, %v5688_v36 }
 0x12d   :  { %1465 = vst.msk [vmem:[#allocation3 + $0xe4] sm:$0xf] %vm714_vm12, %v1429_v9  ;;  %v1929_v8 = vrot.slane %v1844_v44, 5  ;;  %v1217_v11 = vsel %vm6670_vm7, %v1212_v55, %v1216_v39  ;;  %v1018_v15 = vld [vmem:[#allocation2 + $0x88] sm:$0xf] }
 0x12e   :  { %v1423_v51 = vpop.permute.xlu0 %1422  ;;  %2620 = vmatmul.bf16.gmra.mxu1 %v5657_v62  ;;  %v5662_v17 = vld [vmem:[#allocation3 + $0x94] sm:$0xf0]  ;;  %5897 = vmatmul.msk.bf16.gmra.mxu0 %vm2523_vm13, %v5669_v10  ;;  %v1484_v62 = vld [vmem:[#allocation2 + $0x88] sm:$0xf]  ;;  %v1019_v13 = vld [vmem:[#allocation2 + $0x8c] sm:$0x1] }
 0x12f   :  { %1462 = vst.msk [vmem:[#allocation3 + $0xa8] sm:$0xf] %vm714_vm12, %v1423_v51  ;;  %v5665_v19 = vor.u32 %v6278_v58, %v5662_v17  ;;  %v7319_v54 = vpop.f32.mrf.mxu0  ;;  %v1933_v58 = vrot.slane %v1846_v48, 5  ;;  %v1930_v3 = vsel %vm6913_vm11, %v5584_v52, %v1929_v8  ;;  %v1219_v16 = vshrl.u32 %v1018_v15, 16  ;;  %v1020_v17 = vld [vmem:[#allocation2 + $0x90] sm:$0xf] }
 0x130   :  { %4192 = vst.msk [vmem:[#allocation3 + $0x98] sm:$0xf] %vm54_vm0, %v4176_v50  ;;  %v1222_v59 = vshll.u32 %v1018_v15, 16  ;;  %v1228_v50 = vshll.u32 %v1019_v13, 16  ;;  %v1021_v9 = vld [vmem:[#allocation2 + $0x94] sm:$0x1] }
 0x131   :  { %2669 = vmatmul.bf16.gmra.mxu2 %v5661_v18  ;;  %2718 = vmatmul.bf16.gmra.mxu3 %v5665_v19  ;;  %v1934_v12 = vsel %vm6913_vm11, %v5585_v53, %v1933_v58  ;;  %1977 = vst.msk [vmem:[#allocation3 + $0xd8] sm:$0xf] %vm54_vm0, %v1930_v3  ;;  %v1221_v19 = vrot.slane %v1219_v16, 4  ;;  %v1233_v26 = vshrl.u32 %v1020_v17, 16  ;;  %v1236_v20 = vshll.u32 %v1020_v17, 16 }
 0x132   :  { %1275 = vst.msk [vmem:[#allocation3 + $0x10c] sm:$0xf] %vm54_vm0, %v1217_v11  ;;  %v1224_v40 = vrot.slane %v1222_v59, 5  ;;  %v1230_v24 = vrot.slane %v1228_v50, 5  ;;  %v1242_v14 = vshll.u32 %v1021_v9, 16 }
 0x133   :  { %v1427_v29 = vpop.permute.xlu1 %1426  ;;  %v6285_v61 = vld [vmem:[#allocation3 + $0xb8] sm:$0xf0]  ;;  %1978 = vst.msk [vmem:[#allocation3 + $0xec] sm:$0xf] %vm54_vm0, %v1934_v12  ;;  %v1235_v25 = vrot.slane %v1233_v26, 4  ;;  %v1238_v38 = vrot.slane %v1236_v20, 5 }
 0x134   :  { %1464 = vst.msk [vmem:[#allocation3 + $0xd0] sm:$0xf] %vm714_vm12, %v1427_v29  ;;  %v1431_v57 = vpop.permute.xlu2 %1430  ;;  %v1225_v21 = vor.u32 %v1224_v40, %v1221_v19  ;;  %v7341_v27 = vld [vmem:[%s8276_s2] ss:$0 sm:$0xff]  ;;  %v1244_v30 = vrot.slane %v1242_v14, 5 }
 0x135   :  { %1466 = vst.msk [vmem:[#allocation3 + $0xf8] sm:$0xf] %vm714_vm12, %v1431_v57  ;;  %v1847_v0 = vld [vmem:[#allocation2 + $0x80] sm:$0xe]  ;;  %v1239_v32 = vor.u32 %v1238_v38, %v1235_v25  ;;  %v1848_v33 = vld [vmem:[#allocation2 + $0x84] sm:$0x1] }
 0x136   :  { %v1778_v35 = vpop.permute.xlu0 %1777  ;;  %v5680_v60 = vld [vmem:[#allocation3 + $0xa8] sm:$0xf]  ;;  %1499 = vst.msk [vmem:[#allocation3 + $0xfc] sm:$0xf] %vm54_vm0, %v1483_v22  ;;  %v1226_v23 = vrot.slane %v1225_v21, 4  ;;  %v5586_v37 = vrot.slane %v1847_v0, 9 }
 0x137   :  { %1816 = vst.msk [vmem:[#allocation3 + $0xc0] sm:$0xf] %vm714_vm12, %v1778_v35  ;;  %v5681_v2 = vor.u32 %v6285_v61, %v5680_v60  ;;  %v7343_v29 = vpop.f32.mrf.mxu0  ;;  %v1849_v56 = vld [vmem:[#allocation2 + $0x88] sm:$0xe]  ;;  %v1850_v34 = vld [vmem:[#allocation2 + $0x8c] sm:$0x1] }
 0x138   :  { %1500 = vst.msk [vmem:[#allocation3 + $0x110] sm:$0xf] %vm54_vm0, %v1484_v62  ;;  %v1231_v36 = vsel %vm6670_vm7, %v1226_v23, %v1230_v24  ;;  %v1937_v39 = vrot.slane %v1848_v33, 5  ;;  %v5708_v44 = vld [vmem:[#allocation3 + $0xd8] sm:$0xf]  ;;  %v1240_v45 = vrot.slane %v1239_v32, 4 }
 0x139   :  { %1276 = vst.msk [vmem:[#allocation3 + $0x120] sm:$0xf] %vm54_vm0, %v1231_v36  ;;  %v5587_v46 = vrot.slane %v1849_v56, 9  ;;  %v1941_v52 = vrot.slane %v1850_v34, 5  ;;  %v1486_v61 = vld [vmem:[#allocation2 + $0x98] sm:$0xf] }
 0x13a   :  { %v6291_v57 = vld [vmem:[#allocation3 + $0xe8] sm:$0xf0]  ;;  %v1938_v48 = vsel %vm6913_vm11, %v5586_v37, %v1937_v39  ;;  %v1245_v58 = vsel %vm6670_vm7, %v1240_v45, %v1244_v30  ;;  %v1485_v3 = vld [vmem:[#allocation2 + $0x90] sm:$0xf]  ;;  %v1852_v60 = vld [vmem:[#allocation2 + $0x94] sm:$0x1] }
 0x13b   :  { %v1782_v10 = vpop.permute.xlu1 %1781  ;;  %1979 = vst.msk [vmem:[#allocation3 + $0x100] sm:$0xf] %vm54_vm0, %v1938_v48  ;;  %v1942_v1 = vsel %vm6913_vm11, %v5587_v46, %v1941_v52  ;;  %v1853_v11 = vld [vmem:[#allocation2 + $0x98] sm:$0xe]  ;;  %v1854_v12 = vld [vmem:[#allocation2 + $0x9c] sm:$0x1] }
 0x13c   :  { %1818 = vst.msk [vmem:[#allocation3 + $0xe8] sm:$0xf] %vm714_vm12, %v1782_v10  ;;  %v1786_v6 = vpop.permute.xlu2 %1785  ;;  %v5709_v10 = vor.u32 %v6291_v57, %v5708_v44  ;;  %v1945_v15 = vrot.slane %v1852_v60, 5  ;;  %v5589_v13 = vrot.slane %v1853_v11, 9  ;;  %v1949_v16 = vrot.slane %v1854_v12, 5 }
 0x13d   :  { %1820 = vst.msk [vmem:[#allocation3 + $0x110] sm:$0xf] %vm714_vm12, %v1786_v6  ;;  %v5700_v50 = vld [vmem:[#allocation3 + $0xd0] sm:$0xf]  ;;  %v4551_v6 = vld [vmem:[#allocation2 + $0x98] sm:$0xe] }
 0x13e   :  { %v5682_v49 = vld [vmem:[#allocation3 + $0xbc] sm:$0xf0]  ;;  %5898 = vmatmul.msk.bf16.gmra.mxu0 %vm2523_vm13, %v5689_v4  ;;  %v1780_v51 = vpop.permute.xlu0 %1779  ;;  %v2626_v47 = vpop.f32.mrf.mxu3  ;;  %1277 = vst.msk [vmem:[#allocation3 + $0x134] sm:$0xf] %vm54_vm0, %v1245_v58  ;;  %v4552_v9 = vld [vmem:[#allocation2 + $0x9c] sm:$0x1] }
 0x13f   :  { %v5685_v18 = vor.u32 %v6283_v63, %v5682_v49  ;;  %1817 = vst.msk [vmem:[#allocation3 + $0xd4] sm:$0xf] %vm714_vm12, %v1780_v51  ;;  %v1851_v63 = vld [vmem:[#allocation2 + $0x90] sm:$0xe]  ;;  %v6290_v49 = vld [vmem:[#allocation3 + $0xe0] sm:$0xf0] }
 0x140   :  { %1980 = vst.msk [vmem:[#allocation3 + $0x114] sm:$0xf] %vm54_vm0, %v1942_v1  ;;  %v5588_v62 = vrot.slane %v1851_v63, 9  ;;  %v5701_v19 = vor.u32 %v6290_v49, %v5700_v50  ;;  %v5949_v20 = vrot.slane %v4551_v6, 9  ;;  %v4647_v21 = vrot.slane %v4552_v9, 5 }
 0x141   :  { %2674 = vmatmul.bf16.gmra.mxu2 %v5681_v2  ;;  %2723 = vmatmul.bf16.gmra.mxu3 %v5685_v18  ;;  %1502 = vst.msk [vmem:[#allocation3 + $0x138] sm:$0xf] %vm54_vm0, %v1486_v61  ;;  %v1950_v18 = vsel %vm6913_vm11, %v5589_v13, %v1949_v16  ;;  %v5720_v37 = vld [vmem:[#allocation3 + $0xf8] sm:$0xf]  ;;  %v3114_v12 = vld [vmem:[#allocation2 + $0x4] sm:$0x1] }
 0x142   :  { %1501 = vst.msk [vmem:[#allocation3 + $0x124] sm:$0xf] %vm54_vm0, %v1485_v3  ;;  %v1946_v17 = vsel %vm6913_vm11, %v5588_v62, %v1945_v15  ;;  %v4648_v23 = vsel %vm6913_vm11, %v5949_v20, %v4647_v21  ;;  %v5728_v0 = vld [vmem:[#allocation3 + $0x100] sm:$0xf]  ;;  %v3155_v13 = vshll.u32 %v3114_v12, 16 }
 0x143   :  { %v5702_v55 = vld [vmem:[#allocation3 + $0xe4] sm:$0xf0]  ;;  %1981 = vst.msk [vmem:[#allocation3 + $0x128] sm:$0xf] %vm54_vm0, %v1946_v17  ;;  %v2988_v12 = vld [vmem:[#allocation2 + $0xc] sm:$0x1] }
 0x144   :  { %v2577_v31 = vpop.f32.mrf.mxu2  ;;  %v1784_v43 = vpop.permute.xlu1 %1783  ;;  %1982 = vst.msk [vmem:[#allocation3 + $0x13c] sm:$0xf] %vm54_vm0, %v1950_v18  ;;  %v5722_v33 = vld [vmem:[#allocation3 + $0x10c] sm:$0xf0]  ;;  %v3157_v18 = vrot.slane %v3155_v13, 5 }
 0x145   :  { %v2578_v35 = vadd.f32 %v7341_v27, %v2577_v31  ;;  %1819 = vst.msk [vmem:[#allocation3 + $0xfc] sm:$0xf] %vm714_vm12, %v1784_v43 }
 0x146   :  { %v1433_v41 = vpop.permute.xlu0 %1432  ;;  %v6288_v53 = vld [vmem:[#allocation3 + $0xd4] sm:$0xf]  ;;  %v7361_v4 = vpop.f32.mrf.mxu3 }
 0x147   :  { %1467 = vst.msk [vmem:[#allocation3 + $0x10c] sm:$0xf] %vm714_vm12, %v1433_v41  ;;  %v7353_v8 = vadd.f32 %v2626_v47, %v2578_v35  ;;  %v5705_v51 = vor.u32 %v6288_v53, %v5702_v55  ;;  %v1788_v47 = vpop.permute.xlu2 %1787  ;;  %v6296_v31 = vld [vmem:[#allocation3 + $0x110] sm:$0xf0]  ;;  %v4184_v41 = vld [vmem:[#allocation2 + $0x98] sm:$0xf] }
 0x148   :  { %1821 = vst.msk [vmem:[#allocation3 + $0x124] sm:$0xf] %vm714_vm12, %v1788_v47  ;;  %v5729_v56 = vor.u32 %v6296_v31, %v5728_v0  ;;  %v3113_v55 = vld [vmem:[#allocation2] sm:$0xf] }
 0x149   :  { %v3146_v63 = vshrl.u32 %v3113_v55, 16  ;;  %v3149_v1 = vshll.u32 %v3113_v55, 16 }
 0x14a   :  { %v5748_v61 = vld [vmem:[#allocation3 + $0x128] sm:$0xf] }
 0x14b   :  { %v7364_v22 = vpop.f32.mrf.mxu0  ;;  %v6301_v43 = vld [vmem:[#allocation3 + $0x138] sm:$0xf0]  ;;  %v3148_v3 = vrot.slane %v3146_v63, 4  ;;  %v3151_v60 = vrot.slane %v3149_v1, 5 }
 0x14c   :  { %v7367_v59 = vpop.f32.mrf.mxu2  ;;  %v1437_v40 = vpop.permute.xlu1 %1436  ;;  %4680 = vst.msk [vmem:[#allocation3 + $0x13c] sm:$0xf] %vm54_vm0, %v4648_v23  ;;  %v6293_v32 = vld [vmem:[#allocation3 + $0xfc] sm:$0xf]  ;;  %v5749_v11 = vor.u32 %v6301_v43, %v5748_v61  ;;  %v2558_v23 = vadd.f32 %v7341_v27, %v7319_v54  ;;  %v2563_v1 = vadd.f32 %v7341_v27, %v7364_v22 }
 0x14d   :  { %1469 = vst.msk [vmem:[#allocation3 + $0x134] sm:$0xf] %vm714_vm12, %v1437_v40  ;;  %v5725_v44 = vor.u32 %v6293_v32, %v5722_v33  ;;  %v3152_v15 = vor.u32 %v3151_v60, %v3148_v3 }
 0x14e   :  { %5899 = vmatmul.msk.bf16.gmra.mxu0 %vm2523_vm13, %v5709_v10  ;;  %v1435_v2 = vpop.permute.xlu0 %1434  ;;  %v6295_v39 = vld [vmem:[#allocation3 + $0x108] sm:$0xf0] }
 0x14f   :  { %1468 = vst.msk [vmem:[#allocation3 + $0x120] sm:$0xf] %vm714_vm12, %v1435_v2  ;;  %v5721_v46 = vor.u32 %v6295_v39, %v5720_v37  ;;  %v6298_v10 = vld [vmem:[#allocation3 + $0x124] sm:$0xf]  ;;  %v3153_v2 = vrot.slane %v3152_v15, 4  ;;  %v2560_v39 = vadd.f32 %v7341_v27, %v7343_v29 }
 0x151   :  { %2679 = vmatmul.bf16.gmra.mxu2 %v5701_v19  ;;  %2728 = vmatmul.bf16.gmra.mxu3 %v5705_v51  ;;  %v3158_v40 = vsel %vm6670_vm7, %v3153_v2, %v3157_v18 }
 0x152   :  { %3369 = vrot.lane.b32.xlu1 %v3158_v40, %s6520_s26 }
 0x153   :  { %v7379_v26 = vpop.f32.mrf.mxu0 }
 0x154   :  { %v2582_v24 = vpop.f32.mrf.mxu2  ;;  %v2631_v14 = vpop.f32.mrf.mxu3  ;;  %v6300_v51 = vld [vmem:[#allocation3 + $0x130] sm:$0xf0] }
 0x155   :  { %v2583_v25 = vadd.f32 %v7341_v27, %v2582_v24 }
 0x156   :  { %v1790_v38 = vpop.permute.xlu0 %1789  ;;  %v5740_v49 = vld [vmem:[#allocation3 + $0x120] sm:$0xf] }
 0x157   :  { %v7385_v30 = vadd.f32 %v2631_v14, %v2583_v25  ;;  %1822 = vst.msk [vmem:[#allocation3 + $0x138] sm:$0xf] %vm714_vm12, %v1790_v38  ;;  %v5741_v19 = vor.u32 %v6300_v51, %v5740_v49 }
 0x15b   :  { %v7389_v34 = vpop.f32.mrf.mxu0 }
 0x15c   :  { %v7391_v35 = vpop.f32.mrf.mxu2  ;;  %v7393_v36 = vpop.f32.mrf.mxu3 }
 0x15e   :  { %5900 = vmatmul.msk.bf16.gmra.mxu0 %vm2523_vm13, %v5729_v56  ;;  %v5742_v45 = vld [vmem:[#allocation3 + $0x134] sm:$0xf0] }
 0x15f   :  { %4200 = vst.msk [vmem:[#allocation3 + $0x138] sm:$0xf] %vm54_vm0, %v4184_v41  ;;  %v5745_v17 = vor.u32 %v6298_v10, %v5742_v45 }
 0x161   :  { %2684 = vmatmul.bf16.gmra.mxu2 %v5721_v46  ;;  %2733 = vmatmul.bf16.gmra.mxu3 %v5725_v44 }
 0x163   :  { %v7397_v57 = vpop.f32.mrf.mxu0 }
 0x164   :  { %v2587_v48 = vpop.f32.mrf.mxu2  ;;  %v2636_v52 = vpop.f32.mrf.mxu3 }
 0x165   :  { %v2588_v53 = vadd.f32 %v7341_v27, %v2587_v48 }
 0x167   :  { %v7400_v58 = vadd.f32 %v2636_v52, %v2588_v53 }
 0x16b   :  { %v7402_v62 = vpop.f32.mrf.mxu0 }
 0x16c   :  { %v7404_v16 = vpop.f32.mrf.mxu2  ;;  %v7406_v50 = vpop.f32.mrf.mxu3 }
 0x16e   :  { %5901 = vmatmul.msk.bf16.gmra.mxu0 %vm2523_vm13, %v5749_v11  ;;  %v2985_v11 = vld [vmem:[#allocation2 + $0x8] sm:$0xf] }
 0x171   :  { %2689 = vmatmul.bf16.gmra.mxu2 %v5741_v19  ;;  %2738 = vmatmul.bf16.gmra.mxu3 %v5745_v17 }
 0x173   :  { %v7412_v47 = vpop.f32.mrf.mxu0 }
 0x174   :  { %v2592_v6 = vpop.f32.mrf.mxu2  ;;  %v2641_v9 = vpop.f32.mrf.mxu3 }
 0x175   :  { %v2593_v20 = vadd.f32 %v7341_v27, %v2592_v6 }
 0x177   :  { %v7415_v21 = vadd.f32 %v2641_v9, %v2593_v20 }
 0x17b   :  { %v2606_v24 = vpop.f32.mrf.mxu1  ;;  %v2753_v14 = vpop.f32.mrf.mxu0 }
 0x17c   :  { %v7417_v25 = vpop.f32.mrf.mxu2  ;;  %v7419_v38 = vpop.f32.mrf.mxu3  ;;  %v2607_v0 = vadd.f32 %v2606_v24, %v2558_v23  ;;  %v2565_v24 = vadd.f32 %v7341_v27, %v7379_v26 }
 0x183   :  { %v2608_v31 = vpop.f32.mrf.mxu1  ;;  %v2755_v43 = vpop.f32.mrf.mxu0 }
 0x184   :  { %v2655_v32 = vpop.f32.mrf.mxu2  ;;  %v2704_v33 = vpop.f32.mrf.mxu3  ;;  %v2609_v45 = vadd.f32 %v2608_v31, %v2560_v39  ;;  %v2991_v31 = vld [vmem:[#allocation2 + $0x10] sm:$0xf] }
 0x185   :  { %v2656_v56 = vadd.f32 %v2655_v32, %v2607_v0 }
 0x187   :  { %v2705_v37 = vadd.f32 %v2704_v33, %v2656_v56 }
 0x189   :  { %v2754_v41 = vadd.f32 %v2753_v14, %v2705_v37 }
 0x18b   :  { %v2793_v44 = vmax.f32 %v2754_v41, 0.0  ;;  %v2611_v46 = vpop.f32.mrf.mxu1  ;;  %v2758_v48 = vpop.f32.mrf.mxu0 }
 0x18c   :  { %v2657_v52 = vpop.f32.mrf.mxu2  ;;  %v2706_v53 = vpop.f32.mrf.mxu3  ;;  %v2612_v49 = vadd.f32 %v2611_v46, %v2563_v1  ;;  %v2568_v1 = vadd.f32 %v7341_v27, %v7389_v34 }
 0x18d   :  { %v2809_v55 = vpack.c.bf16 %v2793_v44, %v2793_v44  ;;  %v2658_v61 = vadd.f32 %v2657_v52, %v2609_v45 }
 0x18f   :  { %v2826_v54 = vshrl.u32 %v2809_v55, 16  ;;  %v2707_v63 = vadd.f32 %v2706_v53, %v2658_v61  ;;  %v2829_v60 = vshll.u32 %v2809_v55, 16 }
 0x191   :  { %v2828_v3 = vrot.slane %v2826_v54, 7  ;;  %v2756_v10 = vadd.f32 %v2755_v43, %v2707_v63  ;;  %v2994_v43 = vld [vmem:[#allocation2 + $0x14] sm:$0x1] }
 0x193   :  { %v2831_v29 = vor.u32 %v2829_v60, %v2828_v3  ;;  %v2832_v15 = vrot.slane %v2828_v3, 4  ;;  %v2794_v13 = vmax.f32 %v2756_v10, 0.0  ;;  %v2613_v51 = vpop.f32.mrf.mxu1  ;;  %v2760_v17 = vpop.f32.mrf.mxu0 }
 0x194   :  { %v2660_v2 = vpop.f32.mrf.mxu2  ;;  %v2709_v18 = vpop.f32.mrf.mxu3  ;;  %v2614_v37 = vadd.f32 %v2613_v51, %v2565_v24 }
 0x195   :  { %v2986_v19 = vsel %vm6593_vm2, %v2831_v29, %v2985_v11  ;;  %v2989_v40 = vsel %vm6722_vm8, %v2832_v15, %v2988_v12  ;;  %v2810_v22 = vpack.c.bf16 %v2794_v13, %v2794_v13  ;;  %v2661_v6 = vadd.f32 %v2660_v2, %v2612_v49  ;;  %v2997_v13 = vld [vmem:[#allocation2 + $0x18] sm:$0xf]  ;;  %v3000_v49 = vld [vmem:[#allocation2 + $0x1c] sm:$0x1] }
 0x196   :  { %2990 = vst [vmem:[#allocation2 + $0xc] sm:$0x1] %v2989_v40 }
 0x197   :  { %2987 = vst [vmem:[#allocation2 + $0x8] sm:$0xf] %v2986_v19  ;;  %v2834_v9 = vshrl.u32 %v2810_v22, 16  ;;  %v2710_v20 = vadd.f32 %v2709_v18, %v2661_v6  ;;  %v2837_v23 = vshll.u32 %v2810_v22, 16 }
 0x199   :  { %v2836_v14 = vrot.slane %v2834_v9, 7  ;;  %v2759_v0 = vadd.f32 %v2758_v48, %v2710_v20 }
 0x19b   :  { %v2839_v32 = vor.u32 %v2837_v23, %v2836_v14  ;;  %v2840_v33 = vrot.slane %v2836_v14, 4  ;;  %v2795_v56 = vmax.f32 %v2759_v0, 0.0  ;;  %v2616_v39 = vpop.f32.mrf.mxu1  ;;  %v2763_v41 = vpop.f32.mrf.mxu0 }
 0x19c   :  { %v2662_v44 = vpop.f32.mrf.mxu2  ;;  %v2711_v45 = vpop.f32.mrf.mxu3  ;;  %v2617_v40 = vadd.f32 %v2616_v39, %v2568_v1 }
 0x19d   :  { %v2992_v46 = vsel %vm6593_vm2, %v2839_v32, %v2991_v31  ;;  %v2995_v52 = vsel %vm6722_vm8, %v2840_v33, %v2994_v43  ;;  %v2811_v26 = vpack.c.bf16 %v2795_v56, %v2795_v56  ;;  %v2663_v53 = vadd.f32 %v2662_v44, %v2614_v37  ;;  %v3116_v55 = vld [vmem:[#allocation2 + $0xc] sm:$0x1] }
 0x19e   :  { %2993 = vst [vmem:[#allocation2 + $0x10] sm:$0xf] %v2992_v46  ;;  %v3115_v48 = vld [vmem:[#allocation2 + $0x8] sm:$0xf]  ;;  %v3169_v60 = vshll.u32 %v3116_v55, 16  ;;  %v2570_v44 = vadd.f32 %v7341_v27, %v7397_v57 }
 0x19f   :  { %2996 = vst [vmem:[#allocation2 + $0x14] sm:$0x1] %v2995_v52  ;;  %v2842_v61 = vshrl.u32 %v2811_v26, 16  ;;  %v2712_v54 = vadd.f32 %v2711_v45, %v2663_v53  ;;  %v3160_v63 = vshrl.u32 %v3115_v48, 16  ;;  %v3163_v3 = vshll.u32 %v3115_v48, 16 }
 0x1a0   :  { %v3082_v10 = vld [vmem:[#allocation2 + $0x8] sm:$0xf]  ;;  %v2845_v12 = vshll.u32 %v2811_v26, 16  ;;  %v3171_v24 = vrot.slane %v3169_v60, 5 }
 0x1a1   :  { %v2844_v11 = vrot.slane %v2842_v61, 7  ;;  %v2761_v29 = vadd.f32 %v2760_v17, %v2712_v54  ;;  %v3162_v15 = vrot.slane %v3160_v63, 4  ;;  %3098 = vst.msk [vmem:[#allocation3 + $0x14] sm:$0xf] %vm54_vm0, %v3082_v10  ;;  %v3165_v51 = vrot.slane %v3163_v3, 5 }
 0x1a2   :  { %v3003_v61 = vld [vmem:[#allocation2 + $0x20] sm:$0xf]  ;;  %v3006_v54 = vld [vmem:[#allocation2 + $0x24] sm:$0x1] }
 0x1a3   :  { %v2847_v2 = vor.u32 %v2845_v12, %v2844_v11  ;;  %v2848_v18 = vrot.slane %v2844_v11, 4  ;;  %v2796_v19 = vmax.f32 %v2761_v29, 0.0  ;;  %v2618_v22 = vpop.f32.mrf.mxu1  ;;  %v2765_v6 = vpop.f32.mrf.mxu0  ;;  %v3166_v20 = vor.u32 %v3165_v51, %v3162_v15 }
 0x1a4   :  { %v2665_v9 = vpop.f32.mrf.mxu2  ;;  %v2714_v34 = vpop.f32.mrf.mxu3  ;;  %v2619_v63 = vadd.f32 %v2618_v22, %v2570_v44 }
 0x1a5   :  { %v2998_v14 = vsel %vm6593_vm2, %v2847_v2, %v2997_v13  ;;  %v3001_v17 = vsel %vm6722_vm8, %v2848_v18, %v3000_v49  ;;  %v2812_v23 = vpack.c.bf16 %v2796_v19, %v2796_v19  ;;  %v2666_v0 = vadd.f32 %v2665_v9, %v2617_v40  ;;  %v3117_v31 = vld [vmem:[#allocation2 + $0x10] sm:$0xf] }
 0x1a6   :  { %2999 = vst [vmem:[#allocation2 + $0x18] sm:$0xf] %v2998_v14  ;;  %v3167_v43 = vrot.slane %v3166_v20, 4  ;;  %v3118_v32 = vld [vmem:[#allocation2 + $0x14] sm:$0x1]  ;;  %v3174_v33 = vshrl.u32 %v3117_v31, 16 }
 0x1a7   :  { %3002 = vst [vmem:[#allocation2 + $0x1c] sm:$0x1] %v3001_v17  ;;  %v2850_v56 = vshrl.u32 %v2812_v23, 16  ;;  %v2715_v37 = vadd.f32 %v2714_v34, %v2666_v0  ;;  %v3177_v39 = vshll.u32 %v3117_v31, 16  ;;  %v3183_v52 = vshll.u32 %v3118_v32, 16 }
 0x1a8   :  { %v3172_v45 = vsel %vm6670_vm7, %v3167_v43, %v3171_v24  ;;  %v3176_v46 = vrot.slane %v3174_v33, 4  ;;  %v2853_v53 = vshll.u32 %v2812_v23, 16  ;;  %v3083_v57 = vld [vmem:[#allocation2 + $0x10] sm:$0xf]  ;;  %v2573_v24 = vadd.f32 %v7341_v27, %v7402_v62  ;;  %v3009_v33 = vld [vmem:[#allocation2 + $0x28] sm:$0xf] }
 0x1a9   :  { %v2852_v26 = vrot.slane %v2850_v56, 7  ;;  %v2764_v55 = vadd.f32 %v2763_v41, %v2715_v37  ;;  %3371 = vrot.lane.b32.xlu2 %v3172_v45, %s6520_s26  ;;  %v3179_v48 = vrot.slane %v3177_v39, 5  ;;  %v3185_v15 = vrot.slane %v3183_v52, 5  ;;  %3099 = vst.msk [vmem:[#allocation3 + $0x28] sm:$0xf] %vm54_vm0, %v3083_v57 }
 0x1aa   :  { %v3012_v56 = vld [vmem:[#allocation2 + $0x2c] sm:$0x1] }
 0x1ab   :  { %v2855_v1 = vor.u32 %v2853_v53, %v2852_v26  ;;  %v2856_v3 = vrot.slane %v2852_v26, 4  ;;  %v2797_v60 = vmax.f32 %v2764_v55, 0.0  ;;  %v3180_v10 = vor.u32 %v3179_v48, %v3176_v46  ;;  %v7449_v11 = vpop.f32.mrf.mxu0  ;;  %v2621_v2 = vpop.f32.mrf.mxu1 }
 0x1ac   :  { %v2667_v12 = vpop.f32.mrf.mxu2  ;;  %v2716_v29 = vpop.f32.mrf.mxu3  ;;  %v2622_v37 = vadd.f32 %v2621_v2, %v2573_v24 }
 0x1ad   :  { %v3004_v41 = vsel %vm6593_vm2, %v2855_v1, %v3003_v61  ;;  %v3007_v13 = vsel %vm6722_vm8, %v2856_v3, %v3006_v54  ;;  %v2813_v49 = vpack.c.bf16 %v2797_v60, %v2797_v60  ;;  %v2668_v51 = vadd.f32 %v2667_v12, %v2619_v63  ;;  %v3119_v18 = vld [vmem:[#allocation2 + $0x18] sm:$0xf] }
 0x1ae   :  { %3005 = vst [vmem:[#allocation2 + $0x20] sm:$0xf] %v3004_v41  ;;  %v3181_v19 = vrot.slane %v3180_v10, 4  ;;  %v3120_v40 = vld [vmem:[#allocation2 + $0x1c] sm:$0x1]  ;;  %v3188_v22 = vshrl.u32 %v3119_v18, 16  ;;  %v2575_v41 = vadd.f32 %v7341_v27, %v7412_v47 }
 0x1af   :  { %3008 = vst [vmem:[#allocation2 + $0x24] sm:$0x1] %v3007_v13  ;;  %v2858_v9 = vshrl.u32 %v2813_v49, 16  ;;  %v2717_v34 = vadd.f32 %v2716_v29, %v2668_v51  ;;  %v3191_v20 = vshll.u32 %v3119_v18, 16  ;;  %v3197_v23 = vshll.u32 %v3120_v40, 16 }
 0x1b0   :  { %v3186_v14 = vsel %vm6670_vm7, %v3181_v19, %v3185_v15  ;;  %v3190_v17 = vrot.slane %v3188_v22, 4  ;;  %v2861_v31 = vshll.u32 %v2813_v49, 16  ;;  %v3084_v39 = vld [vmem:[#allocation2 + $0x18] sm:$0xf]  ;;  %v3015_v22 = vld [vmem:[#allocation2 + $0x30] sm:$0xf] }
 0x1b1   :  { %v2860_v0 = vrot.slane %v2858_v9, 7  ;;  %v2766_v43 = vadd.f32 %v2765_v6, %v2717_v34  ;;  %3373 = vrot.lane.b32.xlu0 %v3186_v14, %s6520_s26  ;;  %v3193_v32 = vrot.slane %v3191_v20, 5  ;;  %3100 = vst.msk [vmem:[#allocation3 + $0x3c] sm:$0xf] %vm54_vm0, %v3084_v39  ;;  %v3199_v55 = vrot.slane %v3197_v23, 5 }
 0x1b2   :  { %v3018_v9 = vld [vmem:[#allocation2 + $0x34] sm:$0x1] }
 0x1b3   :  { %v2863_v44 = vor.u32 %v2861_v31, %v2860_v0  ;;  %v2864_v45 = vrot.slane %v2860_v0, 4  ;;  %v2798_v46 = vmax.f32 %v2766_v43, 0.0  ;;  %v3194_v52 = vor.u32 %v3193_v32, %v3190_v17  ;;  %v2770_v62 = vpop.f32.mrf.mxu0  ;;  %v2623_v29 = vpop.f32.mrf.mxu1 }
 0x1b4   :  { %v2670_v26 = vpop.f32.mrf.mxu2  ;;  %v2719_v53 = vpop.f32.mrf.mxu3  ;;  %v2624_v34 = vadd.f32 %v2623_v29, %v2575_v41 }
 0x1b5   :  { %v3010_v6 = vsel %vm6593_vm2, %v2863_v44, %v3009_v33  ;;  %v3013_v48 = vsel %vm6722_vm8, %v2864_v45, %v3012_v56  ;;  %v2814_v61 = vpack.c.bf16 %v2798_v46, %v2798_v46  ;;  %v2671_v54 = vadd.f32 %v2670_v26, %v2622_v37  ;;  %v3121_v63 = vld [vmem:[#allocation2 + $0x20] sm:$0xf] }
 0x1b6   :  { %v3085_v1 = vld [vmem:[#allocation2 + $0x20] sm:$0xf]  ;;  %3011 = vst [vmem:[#allocation2 + $0x28] sm:$0xf] %v3010_v6  ;;  %v3195_v3 = vrot.slane %v3194_v52, 4  ;;  %v3202_v10 = vshrl.u32 %v3121_v63, 16 }
 0x1b7   :  { %v3122_v60 = vld [vmem:[#allocation2 + $0x24] sm:$0x1]  ;;  %3014 = vst [vmem:[#allocation2 + $0x2c] sm:$0x1] %v3013_v48  ;;  %v2866_v57 = vshrl.u32 %v2814_v61, 16  ;;  %v2720_v12 = vadd.f32 %v2719_v53, %v2671_v54  ;;  %v3205_v15 = vshll.u32 %v3121_v63, 16 }
 0x1b8   :  { %v3200_v13 = vsel %vm6670_vm7, %v3195_v3, %v3199_v55  ;;  %v3204_v49 = vrot.slane %v3202_v10, 4  ;;  %v3211_v51 = vshll.u32 %v3122_v60, 16  ;;  %3101 = vst.msk [vmem:[#allocation3 + $0x50] sm:$0xf] %vm54_vm0, %v3085_v1  ;;  %v2869_v18 = vshll.u32 %v2814_v61, 16 }
 0x1b9   :  { %v2868_v2 = vrot.slane %v2866_v57, 7  ;;  %v2769_v19 = vadd.f32 %v7449_v11, %v2720_v12  ;;  %3375 = vrot.lane.b32.xlu1 %v3200_v13, %s6520_s26  ;;  %v3207_v40 = vrot.slane %v3205_v15, 5  ;;  %v3129_v48 = vld [vmem:[#allocation2 + $0x50] sm:$0xf]  ;;  %v3021_v3 = vld [vmem:[#allocation2 + $0x38] sm:$0xf] }
 0x1ba   :  { %v3213_v31 = vrot.slane %v3211_v51, 5  ;;  %v3258_v1 = vshrl.u32 %v3129_v48, 16  ;;  %v3024_v60 = vld [vmem:[#allocation2 + $0x3c] sm:$0x1]  ;;  %v3261_v10 = vshll.u32 %v3129_v48, 16 }
 0x1bb   :  { %v2871_v20 = vor.u32 %v2869_v18, %v2868_v2  ;;  %v2872_v24 = vrot.slane %v2868_v2, 4  ;;  %v2799_v47 = vmax.f32 %v2769_v19, 0.0  ;;  %v3208_v14 = vor.u32 %v3207_v40, %v3204_v49  ;;  %v7473_v17 = vpop.f32.mrf.mxu0  ;;  %v3130_v13 = vld [vmem:[#allocation2 + $0x54] sm:$0x1] }
 0x1bc   :  { %v2672_v23 = vpop.f32.mrf.mxu2  ;;  %v2721_v0 = vpop.f32.mrf.mxu3  ;;  %v2580_v49 = vadd.f32 %v7341_v27, %v7367_v59  ;;  %v3260_v18 = vrot.slane %v3258_v1, 4  ;;  %v3263_v19 = vrot.slane %v3261_v10, 5  ;;  %v3267_v59 = vshll.u32 %v3130_v13, 16 }
 0x1bd   :  { %v3016_v43 = vsel %vm6593_vm2, %v2871_v20, %v3015_v22  ;;  %v3019_v11 = vsel %vm6722_vm8, %v2872_v24, %v3018_v9  ;;  %v2815_v32 = vpack.c.bf16 %v2799_v47, %v2799_v47  ;;  %v2673_v33 = vadd.f32 %v2672_v23, %v2624_v34  ;;  %v3123_v56 = vld [vmem:[#allocation2 + $0x28] sm:$0xf] }
 0x1be   :  { %3017 = vst [vmem:[#allocation2 + $0x30] sm:$0xf] %v3016_v43  ;;  %v3209_v37 = vrot.slane %v3208_v14, 4  ;;  %v3124_v39 = vld [vmem:[#allocation2 + $0x2c] sm:$0x1]  ;;  %v3216_v44 = vshrl.u32 %v3123_v56, 16  ;;  %v3264_v14 = vor.u32 %v3263_v19, %v3260_v18 }
 0x1bf   :  { %3020 = vst [vmem:[#allocation2 + $0x34] sm:$0x1] %v3019_v11  ;;  %v2874_v45 = vshrl.u32 %v2815_v32, 16  ;;  %v2722_v46 = vadd.f32 %v2721_v0, %v2673_v33  ;;  %v3219_v52 = vshll.u32 %v3123_v56, 16  ;;  %v2877_v26 = vshll.u32 %v2815_v32, 16 }
 0x1c0   :  { %v3214_v53 = vsel %vm6670_vm7, %v3209_v37, %v3213_v31  ;;  %v3218_v55 = vrot.slane %v3216_v44, 4  ;;  %v3225_v6 = vshll.u32 %v3124_v39, 16  ;;  %v3027_v11 = vld [vmem:[#allocation2 + $0x40] sm:$0xf]  ;;  %v3030_v39 = vld [vmem:[#allocation2 + $0x44] sm:$0x1] }
 0x1c1   :  { %v2876_v61 = vrot.slane %v2874_v45, 7  ;;  %v2771_v54 = vadd.f32 %v2770_v62, %v2722_v46  ;;  %3377 = vrot.lane.b32.xlu2 %v3214_v53, %s6520_s26  ;;  %v3221_v63 = vrot.slane %v3219_v52, 5  ;;  %v2629_v45 = vadd.f32 %v7361_v4, %v2580_v49  ;;  %v3086_v53 = vld [vmem:[#allocation2 + $0x28] sm:$0xf] }
 0x1c2   :  { %v3227_v62 = vrot.slane %v3225_v6, 5  ;;  %v3265_v52 = vrot.slane %v3264_v14, 4  ;;  %3102 = vst.msk [vmem:[#allocation3 + $0x64] sm:$0xf] %vm54_vm0, %v3086_v53  ;;  %v3036_v14 = vld [vmem:[#allocation2 + $0x5c] sm:$0x1] }
 0x1c3   :  { %v2879_v57 = vor.u32 %v2877_v26, %v2876_v61  ;;  %v2880_v12 = vrot.slane %v2876_v61, 4  ;;  %v2800_v29 = vmax.f32 %v2771_v54, 0.0  ;;  %v3222_v15 = vor.u32 %v3221_v63, %v3218_v55  ;;  %v7482_v41 = vpop.f32.mrf.mxu0 }
 0x1c4   :  { %v2675_v51 = vpop.f32.mrf.mxu2  ;;  %v2724_v2 = vpop.f32.mrf.mxu3  ;;  %v3269_v26 = vrot.slane %v3267_v59, 5 }
 0x1c5   :  { %v3022_v40 = vsel %vm6593_vm2, %v2879_v57, %v3021_v3  ;;  %v3025_v22 = vsel %vm6722_vm8, %v2880_v12, %v3024_v60  ;;  %v2816_v9 = vpack.c.bf16 %v2800_v29, %v2800_v29  ;;  %v2676_v34 = vadd.f32 %v2675_v51, %v7353_v8  ;;  %v3125_v20 = vld [vmem:[#allocation2 + $0x30] sm:$0xf]  ;;  %v6385_v57 = vld [vmem:[#allocation7 + $0x38] sm:$0xff] }
 0x1c6   :  { %3023 = vst [vmem:[#allocation2 + $0x38] sm:$0xf] %v3022_v40  ;;  %v3223_v24 = vrot.slane %v3222_v15, 4  ;;  %v3230_v47 = vshrl.u32 %v3125_v20, 16  ;;  %v3126_v31 = vld [vmem:[#allocation2 + $0x34] sm:$0x1]  ;;  %v3270_v13 = vsel %vm6670_vm7, %v3265_v52, %v3269_v26  ;;  %5245 = vmatpush.bf16.msrb.mxu1 %v6385_v57 }
 0x1c7   :  { %3026 = vst [vmem:[#allocation2 + $0x3c] sm:$0x1] %v3025_v22  ;;  %v2882_v23 = vshrl.u32 %v2816_v9, 16  ;;  %v2725_v0 = vadd.f32 %v2724_v2, %v2676_v34  ;;  %v3233_v43 = vshll.u32 %v3125_v20, 16  ;;  %v2885_v37 = vshll.u32 %v2816_v9, 16 }
 0x1c8   :  { %v3228_v32 = vsel %vm6670_vm7, %v3223_v24, %v3227_v62  ;;  %v3232_v33 = vrot.slane %v3230_v47, 4  ;;  %v3239_v46 = vshll.u32 %v3126_v31, 16  ;;  %v6384_v24 = vld [vmem:[#allocation7 + $0x30] sm:$0xff]  ;;  %v3033_v47 = vld [vmem:[#allocation2 + $0x58] sm:$0xf] }
 0x1c9   :  { %v2884_v56 = vrot.slane %v2882_v23, 7  ;;  %v2774_v8 = vadd.f32 %v7473_v17, %v2725_v0  ;;  %3379 = vrot.lane.b32.xlu0 %v3228_v32, %s6520_s26  ;;  %v3235_v44 = vrot.slane %v3233_v43, 5 }
 0x1ca   :  { %v3241_v29 = vrot.slane %v3239_v46, 5  ;;  %5246 = vmatpush.bf16.msrb.mxu1 %v6384_v24  ;;  %v2585_v46 = vadd.f32 %v7341_v27, %v7391_v35 }
 0x1cb   :  { %v2887_v55 = vor.u32 %v2885_v37, %v2884_v56  ;;  %v2888_v6 = vrot.slane %v2884_v56, 4  ;;  %v2801_v48 = vmax.f32 %v2774_v8, 0.0  ;;  %v3236_v61 = vor.u32 %v3235_v44, %v3232_v33  ;;  %v2778_v60 = vpop.f32.mrf.mxu0  ;;  %v3087_v8 = vld [vmem:[#allocation2 + $0x30] sm:$0xf] }
 0x1cc   :  { %v2677_v54 = vpop.f32.mrf.mxu2  ;;  %v2726_v63 = vpop.f32.mrf.mxu3  ;;  %3103 = vst.msk [vmem:[#allocation3 + $0x78] sm:$0xf] %vm54_vm0, %v3087_v8  ;;  %v2634_v27 = vadd.f32 %v7393_v36, %v2585_v46  ;;  %v7527_v36 = vld [vmem:[#allocation2 + $0x8] sm:$0xe] }
 0x1cd   :  { %v3028_v17 = vsel %vm6593_vm2, %v2887_v55, %v3027_v11  ;;  %v3031_v1 = vsel %vm6722_vm8, %v2888_v6, %v3030_v39  ;;  %v2817_v3 = vpack.c.bf16 %v2801_v48, %v2801_v48  ;;  %v2678_v4 = vadd.f32 %v2677_v54, %v2629_v45  ;;  %v3127_v10 = vld [vmem:[#allocation2 + $0x38] sm:$0xf]  ;;  %v6383_v39 = vld [vmem:[#allocation7 + $0x28] sm:$0xff]  ;;  %v4201_v54 = vld [vmem:[#allocation2 + $0x10] sm:$0xf] }
 0x1ce   :  { %3032 = vst [vmem:[#allocation2 + $0x44] sm:$0x1] %v3031_v1  ;;  %v3237_v12 = vrot.slane %v3236_v61, 4  ;;  %v3244_v15 = vshrl.u32 %v3127_v10, 16  ;;  %v3128_v2 = vld [vmem:[#allocation2 + $0x3c] sm:$0x1]  ;;  %5247 = vmatpush.bf16.msrb.mxu1 %v6383_v39 }
 0x1cf   :  { %3029 = vst [vmem:[#allocation2 + $0x40] sm:$0xf] %v3028_v17  ;;  %v2890_v49 = vshrl.u32 %v2817_v3, 16  ;;  %v2727_v51 = vadd.f32 %v2726_v63, %v2678_v4  ;;  %v3247_v62 = vshll.u32 %v3127_v10, 16  ;;  %v3088_v40 = vld [vmem:[#allocation2 + $0x38] sm:$0xf] }
 0x1d0   :  { %v3242_v18 = vsel %vm6670_vm7, %v3237_v12, %v3241_v29  ;;  %v3246_v19 = vrot.slane %v3244_v15, 4  ;;  %v2893_v9 = vshll.u32 %v2817_v3, 16  ;;  %3104 = vst.msk [vmem:[#allocation3 + $0x8c] sm:$0xf] %vm54_vm0, %v3088_v40  ;;  %v3253_v59 = vshll.u32 %v3128_v2, 16  ;;  %v6382_v61 = vld [vmem:[#allocation7 + $0x20] sm:$0xff] }
 0x1d1   :  { %v2892_v22 = vrot.slane %v2890_v49, 7  ;;  %v2776_v34 = vadd.f32 %v7482_v41, %v2727_v51  ;;  %3381 = vrot.lane.b32.xlu1 %v3242_v18, %s6520_s26  ;;  %v3249_v20 = vrot.slane %v3247_v62, 5  ;;  %3385 = vrot.lane.b32.xlu0 %v3270_v13, %s6520_s26  ;;  %v3039_v63 = vld [vmem:[#allocation2 + $0x60] sm:$0xf]  ;;  %v3042_v17 = vld [vmem:[#allocation2 + $0x64] sm:$0x1] }
 0x1d2   :  { %v3255_v45 = vrot.slane %v3253_v59, 5  ;;  %5248 = vmatpush.bf16.msrb.mxu1 %v6382_v61  ;;  %v4234_v57 = vshrl.u32 %v4201_v54, 16  ;;  %v7521_v12 = vld [vmem:[#allocation2 + $0xc] sm:$0x1]  ;;  %v6381_v51 = vld [vmem:[#allocation7 + $0x18] sm:$0xff]  ;;  %v4237_v62 = vshll.u32 %v4201_v54, 16 }
 0x1d3   :  { %v2895_v23 = vor.u32 %v2893_v9, %v2892_v22  ;;  %v2896_v0 = vrot.slane %v2892_v22, 4  ;;  %v2802_v31 = vmax.f32 %v2776_v34, 0.0  ;;  %v3250_v43 = vor.u32 %v3249_v20, %v3246_v19  ;;  %v2780_v53 = vpop.f32.mrf.mxu0  ;;  %v7530_v20 = vld [vmem:[#allocation2 + $0x10] sm:$0xe] }
 0x1d4   :  { %v2680_v11 = vpop.f32.mrf.mxu2  ;;  %v2729_v32 = vpop.f32.mrf.mxu3  ;;  %v4043_v22 = vrot.slane %v7521_v12, 5  ;;  %v4236_v24 = vrot.slane %v4234_v57, 4  ;;  %v3446_v12 = vld [vmem:[#allocation2 + $0x34] sm:$0x1] }
 0x1d5   :  { %v3034_v41 = vsel %vm6593_vm2, %v2895_v23, %v3033_v47  ;;  %v3037_v33 = vsel %vm6722_vm8, %v2896_v0, %v3036_v14  ;;  %v2818_v56 = vpack.c.bf16 %v2802_v31, %v2802_v31  ;;  %v2681_v37 = vadd.f32 %v2680_v11, %v7385_v30  ;;  %v7533_v11 = vld [vmem:[#allocation2 + $0x14] sm:$0x1] }
 0x1d6   :  { %3038 = vst [vmem:[#allocation2 + $0x5c] sm:$0x1] %v3037_v33  ;;  %v3251_v44 = vrot.slane %v3250_v43, 4  ;;  %5249 = vmatpush.bf16.msrb.mxu1 %v6381_v51  ;;  %v5918_v47 = vrot.slane %v7527_v36, 9  ;;  %v6380_v43 = vld [vmem:[#allocation7 + $0x10] sm:$0xff] }
 0x1d7   :  { %3035 = vst [vmem:[#allocation2 + $0x58] sm:$0xf] %v3034_v41  ;;  %v2898_v52 = vshrl.u32 %v2818_v56, 16  ;;  %v2730_v26 = vadd.f32 %v2729_v32, %v2681_v37  ;;  %v2901_v30 = vshll.u32 %v2818_v56, 16  ;;  %v3045_v32 = vld [vmem:[#allocation2 + $0x68] sm:$0xf] }
 0x1d8   :  { %v3256_v55 = vsel %vm6670_vm7, %v3251_v44, %v3255_v45  ;;  %v3048_v41 = vld [vmem:[#allocation2 + $0x6c] sm:$0x1]  ;;  %v4239_v56 = vrot.slane %v4237_v62, 5  ;;  %v3370_v44 = vpop.permute.xlu1 %3369  ;;  %v5919_v45 = vrot.slane %v7530_v20, 9 }
 0x1d9   :  { %v2900_v6 = vrot.slane %v2898_v52, 7  ;;  %v2779_v48 = vadd.f32 %v2778_v60, %v2730_v26  ;;  %3383 = vrot.lane.b32.xlu2 %v3256_v55, %s6520_s26  ;;  %3417 = vst.msk [vmem:[#allocation3] sm:$0xf] %vm714_vm12, %v3370_v44  ;;  %v4047_v55 = vrot.slane %v7533_v11, 5 }
 0x1da   :  { %5250 = vmatpush.bf16.msrb.mxu1 %v6380_v43 }
 0x1db   :  { %v2903_v35 = vor.u32 %v2901_v30, %v2900_v6  ;;  %v2904_v1 = vrot.slane %v2900_v6, 4  ;;  %v2803_v3 = vmax.f32 %v2779_v48, 0.0  ;;  %v2783_v0 = vpop.f32.mrf.mxu0  ;;  %v4203_v6 = vld [vmem:[#allocation2 + $0x18] sm:$0xf] }
 0x1dc   :  { %v2682_v4 = vpop.f32.mrf.mxu2  ;;  %v2731_v10 = vpop.f32.mrf.mxu3 }
 0x1dd   :  { %v3040_v60 = vsel %vm6593_vm2, %v2903_v35, %v3039_v63  ;;  %v3043_v29 = vsel %vm6722_vm8, %v2904_v1, %v3042_v17  ;;  %v2819_v15 = vpack.c.bf16 %v2803_v3, %v2803_v3  ;;  %v2683_v13 = vadd.f32 %v2682_v4, %v2634_v27  ;;  %v3132_v49 = vld [vmem:[#allocation2 + $0x5c] sm:$0x1]  ;;  %v7546_v27 = vld [vmem:[%s8276_s2] ss:$0 sm:$0xff] }
 0x1de   :  { %3041 = vst [vmem:[#allocation2 + $0x60] sm:$0xf] %v3040_v60  ;;  %v3131_v2 = vld [vmem:[#allocation2 + $0x58] sm:$0xf]  ;;  %v3281_v34 = vshll.u32 %v3132_v49, 16  ;;  %v2590_v35 = vadd.f32 %v7546_v27, %v7404_v16 }
 0x1df   :  { %3044 = vst [vmem:[#allocation2 + $0x64] sm:$0x1] %v3043_v29  ;;  %v2906_v18 = vshrl.u32 %v2819_v15, 16  ;;  %v2732_v19 = vadd.f32 %v2731_v10, %v2683_v13  ;;  %v3272_v40 = vshrl.u32 %v3131_v2, 16  ;;  %v3275_v9 = vshll.u32 %v3131_v2, 16 }
 0x1e0   :  { %v2909_v59 = vshll.u32 %v2819_v15, 16  ;;  %v4240_v10 = vor.u32 %v4239_v56, %v4236_v24  ;;  %v4248_v15 = vshrl.u32 %v4203_v6, 16  ;;  %v4251_v2 = vshll.u32 %v4203_v6, 16  ;;  %v3054_v24 = vld [vmem:[#allocation2 + $0x74] sm:$0x1] }
 0x1e1   :  { %v2908_v14 = vrot.slane %v2906_v18, 7  ;;  %v2781_v23 = vadd.f32 %v2780_v53, %v2732_v19  ;;  %v3274_v31 = vrot.slane %v3272_v40, 4  ;;  %v3277_v33 = vrot.slane %v3275_v9, 5  ;;  %v4202_v40 = vld [vmem:[#allocation2 + $0x14] sm:$0x1] }
 0x1e2   :  { %v3283_v53 = vrot.slane %v3281_v34, 5  ;;  %v2639_v9 = vadd.f32 %v7406_v50, %v2590_v35  ;;  %v3051_v34 = vld [vmem:[#allocation2 + $0x70] sm:$0xf]  ;;  %v3090_v6 = vld [vmem:[#allocation2 + $0x58] sm:$0xf] }
 0x1e3   :  { %v2911_v37 = vor.u32 %v2909_v59, %v2908_v14  ;;  %v2912_v39 = vrot.slane %v2908_v14, 4  ;;  %v2804_v8 = vmax.f32 %v2781_v23, 0.0  ;;  %v3278_v26 = vor.u32 %v3277_v33, %v3274_v31  ;;  %v6378_v14 = vld [vmem:[#allocation7] sm:$0xff]  ;;  %3106 = vst.msk [vmem:[#allocation3 + $0xb4] sm:$0xf] %vm54_vm0, %v3090_v6 }
 0x1e4   :  { %v2685_v46 = vpop.f32.mrf.mxu2  ;;  %v2734_v52 = vpop.f32.mrf.mxu3  ;;  %v7555_v59 = vrot.slane %v4240_v10, 4  ;;  %v4205_v35 = vld [vmem:[#allocation2 + $0x20] sm:$0xf] }
 0x1e5   :  { %v3046_v30 = vsel %vm6593_vm2, %v2911_v37, %v3045_v32  ;;  %v3049_v48 = vsel %vm6722_vm8, %v2912_v39, %v3048_v41  ;;  %v2820_v61 = vpack.c.bf16 %v2804_v8, %v2804_v8  ;;  %v2686_v54 = vadd.f32 %v2685_v46, %v7400_v58  ;;  %v3133_v63 = vld [vmem:[#allocation2 + $0x60] sm:$0xf]  ;;  %v6379_v58 = vld [vmem:[#allocation7 + $0x8] sm:$0xff]  ;;  %v2785_v32 = vpop.f32.mrf.mxu0 }
 0x1e6   :  { %v3091_v17 = vld [vmem:[#allocation2 + $0x60] sm:$0xf]  ;;  %3047 = vst [vmem:[#allocation2 + $0x68] sm:$0xf] %v3046_v30  ;;  %v3279_v1 = vrot.slane %v3278_v26, 4  ;;  %v3286_v4 = vshrl.u32 %v3133_v63, 16  ;;  %5251 = vmatpush.bf16.msrb.mxu1 %v6379_v58 }
 0x1e7   :  { %v3134_v3 = vld [vmem:[#allocation2 + $0x64] sm:$0x1]  ;;  %3050 = vst [vmem:[#allocation2 + $0x6c] sm:$0x1] %v3049_v48  ;;  %v2914_v57 = vshrl.u32 %v2820_v61, 16  ;;  %v2735_v60 = vadd.f32 %v2734_v52, %v2686_v54  ;;  %v3289_v29 = vshll.u32 %v3133_v63, 16 }
 0x1e8   :  { %v3284_v13 = vsel %vm6670_vm7, %v3279_v1, %v3283_v53  ;;  %v3288_v49 = vrot.slane %v3286_v4, 4  ;;  %v3295_v51 = vshll.u32 %v3134_v3, 16  ;;  %3107 = vst.msk [vmem:[#allocation3 + $0xc8] sm:$0xf] %vm54_vm0, %v3091_v17  ;;  %v2917_v62 = vshll.u32 %v2820_v61, 16 }
 0x1e9   :  { %v2916_v16 = vrot.slane %v2914_v57, 7  ;;  %v2784_v18 = vadd.f32 %v2783_v0, %v2735_v60  ;;  %3387 = vrot.lane.b32.xlu1 %v3284_v13, %s6520_s26  ;;  %v3291_v19 = vrot.slane %v3289_v29, 5  ;;  %v4243_v37 = vshll.u32 %v4202_v40, 16  ;;  %v7561_v53 = vld [vmem:[#allocation2 + $0x1c] sm:$0x1] }
 0x1ea   :  { %v3297_v0 = vrot.slane %v3295_v51, 5  ;;  %v4250_v39 = vrot.slane %v4248_v15, 4  ;;  %v4253_v8 = vrot.slane %v4251_v2, 5  ;;  %5252 = vmatpush.bf16.msrb.mxu1 %v6378_v14  ;;  %v3057_v15 = vld [vmem:[#allocation2 + $0x78] sm:$0xf]  ;;  %v4262_v51 = vshrl.u32 %v4205_v35, 16 }
 0x1eb   :  { %v2919_v23 = vor.u32 %v2917_v62, %v2916_v16  ;;  %v2920_v31 = vrot.slane %v2916_v16, 4  ;;  %v2805_v43 = vmax.f32 %v2784_v18, 0.0  ;;  %v3292_v41 = vor.u32 %v3291_v19, %v3288_v49  ;;  %v3060_v13 = vld [vmem:[#allocation2 + $0x7c] sm:$0x1] }
 0x1ec   :  { %v2687_v33 = vpop.f32.mrf.mxu2  ;;  %v2736_v56 = vpop.f32.mrf.mxu3  ;;  %v4254_v10 = vor.u32 %v4253_v8, %v4250_v39  ;;  %v4257_v49 = vshll.u32 %v7561_v53, 16  ;;  %v4265_v14 = vshll.u32 %v4205_v35, 16  ;;  %v7583_v53 = vld [vmem:[#allocation2 + $0x20] sm:$0xe] }
 0x1ed   :  { %v3052_v44 = vsel %vm6593_vm2, %v2919_v23, %v3051_v34  ;;  %v3055_v50 = vsel %vm6722_vm8, %v2920_v31, %v3054_v24  ;;  %v2821_v46 = vpack.c.bf16 %v2805_v43, %v2805_v43  ;;  %v2688_v52 = vadd.f32 %v2687_v33, %v2639_v9  ;;  %v3135_v26 = vld [vmem:[#allocation2 + $0x68] sm:$0xf] }
 0x1ee   :  { %3053 = vst [vmem:[#allocation2 + $0x70] sm:$0xf] %v3052_v44  ;;  %v3293_v30 = vrot.slane %v3292_v41, 4  ;;  %v3136_v48 = vld [vmem:[#allocation2 + $0x6c] sm:$0x1]  ;;  %v3300_v61 = vshrl.u32 %v3135_v26, 16  ;;  %v2595_v33 = vadd.f32 %v7546_v27, %v7417_v25 }
 0x1ef   :  { %3056 = vst [vmem:[#allocation2 + $0x74] sm:$0x1] %v3055_v50  ;;  %v2922_v54 = vshrl.u32 %v2821_v46, 16  ;;  %v2737_v63 = vadd.f32 %v2736_v56, %v2688_v52  ;;  %v3303_v17 = vshll.u32 %v3135_v26, 16  ;;  %v3309_v4 = vshll.u32 %v3136_v48, 16  ;;  %v2788_v56 = vpop.f32.mrf.mxu0 }
 0x1f0   :  { %v3298_v1 = vsel %vm6670_vm7, %v3293_v30, %v3297_v0  ;;  %v3302_v3 = vrot.slane %v3300_v61, 4  ;;  %v2925_v60 = vshll.u32 %v2821_v46, 16  ;;  %v7568_v34 = vrot.slane %v4243_v37, 5  ;;  %v4206_v61 = vld [vmem:[#allocation2 + $0x24] sm:$0x1] }
 0x1f1   :  { %v2924_v57 = vrot.slane %v2922_v54, 7  ;;  %v2786_v29 = vadd.f32 %v2785_v32, %v2737_v63  ;;  %3389 = vrot.lane.b32.xlu2 %v3298_v1, %s6520_s26  ;;  %v3305_v58 = vrot.slane %v3303_v17, 5  ;;  %v3311_v9 = vrot.slane %v3309_v4, 5  ;;  %v3063_v63 = vld [vmem:[#allocation2 + $0x80] sm:$0xf] }
 0x1f2   :  { %v7570_v24 = vrot.slane %v4254_v10, 4  ;;  %v7579_v46 = vrot.slane %v4262_v51, 4  ;;  %v4267_v6 = vrot.slane %v4265_v14, 5  ;;  %v2644_v54 = vadd.f32 %v7419_v38, %v2595_v33  ;;  %v3066_v17 = vld [vmem:[#allocation2 + $0x84] sm:$0x1] }
 0x1f3   :  { %v2927_v2 = vor.u32 %v2925_v60, %v2924_v57  ;;  %v2928_v16 = vrot.slane %v2924_v57, 4  ;;  %v2806_v62 = vmax.f32 %v2786_v29, 0.0  ;;  %v3306_v18 = vor.u32 %v3305_v58, %v3302_v3  ;;  %v3092_v35 = vld [vmem:[#allocation2 + $0x68] sm:$0xf]  ;;  %v7587_v57 = vld [vmem:[#allocation2 + $0x18] sm:$0xe] }
 0x1f4   :  { %v2690_v19 = vpop.f32.mrf.mxu2  ;;  %v2739_v40 = vpop.f32.mrf.mxu3  ;;  %3108 = vst.msk [vmem:[#allocation3 + $0xdc] sm:$0xf] %vm54_vm0, %v3092_v35  ;;  %v6393_v58 = vld [vmem:[#allocation7 + $0x78] sm:$0xff]  ;;  %v5921_v51 = vrot.slane %v7583_v53, 9  ;;  %v4271_v38 = vshll.u32 %v4206_v61, 16 }
 0x1f5   :  { %v3058_v23 = vsel %vm6593_vm2, %v2927_v2, %v3057_v15  ;;  %v3061_v31 = vsel %vm6722_vm8, %v2928_v16, %v3060_v13  ;;  %v2822_v43 = vpack.c.bf16 %v2806_v62, %v2806_v62  ;;  %v2691_v32 = vadd.f32 %v2690_v19, %v7415_v21  ;;  %v3137_v41 = vld [vmem:[#allocation2 + $0x70] sm:$0xf]  ;;  %v6401_v15 = vld [vmem:[#allocation7 + $0xb8] sm:$0xff]  ;;  %5294 = vmatpush.bf16.msra.mxu2 %v6393_v58  ;;  %v3698_v53 = vld [vmem:[#allocation2 + $0x2c] sm:$0x1] }
 0x1f6   :  { %3059 = vst [vmem:[#allocation2 + $0x78] sm:$0xf] %v3058_v23  ;;  %v3307_v0 = vrot.slane %v3306_v18, 4  ;;  %v3138_v37 = vld [vmem:[#allocation2 + $0x74] sm:$0x1]  ;;  %v3314_v39 = vshrl.u32 %v3137_v41, 16  ;;  %5343 = vmatpush.bf16.msra.mxu3 %v6401_v15 }
 0x1f7   :  { %3062 = vst [vmem:[#allocation2 + $0x7c] sm:$0x1] %v3061_v31  ;;  %v2930_v8 = vshrl.u32 %v2822_v43, 16  ;;  %v2740_v44 = vadd.f32 %v2739_v40, %v2691_v32  ;;  %v3317_v50 = vshll.u32 %v3137_v41, 16  ;;  %v3323_v21 = vshll.u32 %v3138_v37, 16 }
 0x1f8   :  { %v3312_v52 = vsel %vm6670_vm7, %v3307_v0, %v3311_v9  ;;  %v3316_v26 = vrot.slane %v3314_v39, 4  ;;  %v2933_v27 = vshll.u32 %v2822_v43, 16  ;;  %v7590_v13 = vrot.slane %v4257_v49, 5  ;;  %v7597_v40 = vld [vmem:[#allocation2 + $0x24] sm:$0x1]  ;;  %v2790_v0 = vpop.f32.mrf.mxu0 }
 0x1f9   :  { %v2932_v25 = vrot.slane %v2930_v8, 7  ;;  %v2789_v30 = vadd.f32 %v2788_v56, %v2740_v44  ;;  %3391 = vrot.lane.b32.xlu0 %v3312_v52, %s6520_s26  ;;  %v3319_v48 = vrot.slane %v3317_v50, 5  ;;  %v3325_v29 = vrot.slane %v3323_v21, 5  ;;  %v7606_v21 = vld [vmem:[#allocation2 + $0x28] sm:$0xf] }
 0x1fa   :  { %v4268_v43 = vor.u32 %v4267_v6, %v7579_v46  ;;  %v5920_v56 = vrot.slane %v7587_v57, 9  ;;  %v4055_v44 = vrot.slane %v7597_v40, 5  ;;  %v3069_v6 = vld [vmem:[#allocation2 + $0x88] sm:$0xf]  ;;  %v7612_v35 = vld [vmem:[#allocation2 + $0x1c] sm:$0x1] }
 0x1fb   :  { %v2935_v1 = vor.u32 %v2933_v27, %v2932_v25  ;;  %v2936_v3 = vrot.slane %v2932_v25, 4  ;;  %v2807_v4 = vmax.f32 %v2789_v30, 0.0  ;;  %v3320_v10 = vor.u32 %v3319_v48, %v3316_v26  ;;  %v3072_v25 = vld [vmem:[#allocation2 + $0x8c] sm:$0x1] }
 0x1fc   :  { %v2692_v60 = vpop.f32.mrf.mxu2  ;;  %v2741_v14 = vpop.f32.mrf.mxu3  ;;  %v7608_v27 = vrot.slane %v4268_v43, 4  ;;  %v7610_v30 = vrot.slane %v4271_v38, 5 }
 0x1fd   :  { %v3064_v2 = vsel %vm6593_vm2, %v2935_v1, %v3063_v63  ;;  %v3067_v16 = vsel %vm6722_vm8, %v2936_v3, %v3066_v17  ;;  %v2823_v62 = vpack.c.bf16 %v2807_v4, %v2807_v4  ;;  %v2693_v18 = vadd.f32 %v2692_v60, %v2644_v54  ;;  %v3139_v19 = vld [vmem:[#allocation2 + $0x78] sm:$0xf]  ;;  %v3093_v1 = vld [vmem:[#allocation2 + $0x70] sm:$0xf] }
 0x1fe   :  { %v3094_v9 = vld [vmem:[#allocation2 + $0x78] sm:$0xf]  ;;  %3065 = vst [vmem:[#allocation2 + $0x80] sm:$0xf] %v3064_v2  ;;  %v3321_v23 = vrot.slane %v3320_v10, 4  ;;  %v3328_v31 = vshrl.u32 %v3139_v19, 16 }
 0x1ff   :  { %v3140_v49 = vld [vmem:[#allocation2 + $0x7c] sm:$0x1]  ;;  %3068 = vst [vmem:[#allocation2 + $0x84] sm:$0x1] %v3067_v16  ;;  %v2938_v32 = vshrl.u32 %v2823_v62, 16  ;;  %v2742_v41 = vadd.f32 %v2741_v14, %v2693_v18  ;;  %v3331_v33 = vshll.u32 %v3139_v19, 16 }
 0x200   :  { %v3326_v37 = vsel %vm6670_vm7, %v3321_v23, %v3325_v29  ;;  %v3330_v39 = vrot.slane %v3328_v31, 4  ;;  %v3337_v8 = vshll.u32 %v3140_v49, 16  ;;  %3110 = vst.msk [vmem:[#allocation3 + $0x104] sm:$0xf] %vm54_vm0, %v3094_v9  ;;  %v2941_v52 = vshll.u32 %v2823_v62, 16  ;;  %v6409_v4 = vld [vmem:[#allocation7 + $0xf8] sm:$0xff] }
 0x201   :  { %v2940_v50 = vrot.slane %v2938_v32, 7  ;;  %v2791_v26 = vadd.f32 %v2790_v0, %v2742_v41  ;;  %3393 = vrot.lane.b32.xlu1 %v3326_v37, %s6520_s26  ;;  %v3333_v46 = vrot.slane %v3331_v33, 5  ;;  %v6413_v10 = vld [vmem:[#allocation7 + $0x118] sm:$0xff]  ;;  %v4276_v60 = vshrl.u32 %v7606_v21, 16  ;;  %3109 = vst.msk [vmem:[#allocation3 + $0xf0] sm:$0xf] %vm54_vm0, %v3093_v1  ;;  %5392 = vmatpush.bf16.msra.mxu0 %v6409_v4 }
 0x202   :  { %v3339_v3 = vrot.slane %v3337_v8, 5  ;;  %v3691_v16 = vld [vmem:[#allocation2 + $0x10] sm:$0xf]  ;;  %5445 = vmatpush.bf16.msra.mxu1 %v6413_v10  ;;  %v4051_v49 = vrot.slane %v7612_v35, 5  ;;  %v4279_v41 = vshll.u32 %v7606_v21, 16 }
 0x203   :  { %v2943_v48 = vor.u32 %v2941_v52, %v2940_v50  ;;  %v2944_v61 = vrot.slane %v2940_v50, 4  ;;  %v2808_v54 = vmax.f32 %v2791_v26, 0.0  ;;  %v3372_v63 = vpop.permute.xlu2 %3371  ;;  %v3334_v17 = vor.u32 %v3333_v46, %v3330_v39  ;;  %v3075_v37 = vld [vmem:[#allocation2 + $0x90] sm:$0xf]  ;;  %v5952_v39 = vld [vmem:[#allocation3] sm:$0xf] }
 0x204   :  { %3418 = vst.msk [vmem:[#allocation3 + $0x14] sm:$0xf] %vm714_vm12, %v3372_v63  ;;  %v7625_v32 = vrot.slane %v4276_v60, 4  ;;  %v3078_v8 = vld [vmem:[#allocation2 + $0x94] sm:$0x1]  ;;  %v3736_v46 = vshrl.u32 %v3691_v16, 16 }
 0x205   :  { %v3070_v29 = vsel %vm6593_vm2, %v2943_v48, %v3069_v6  ;;  %v3073_v58 = vsel %vm6722_vm8, %v2944_v61, %v3072_v25  ;;  %v2824_v15 = vpack.c.bf16 %v2808_v54, %v2808_v54  ;;  %v3335_v38 = vrot.slane %v3334_v17, 4  ;;  %v3141_v2 = vld [vmem:[#allocation2 + $0x80] sm:$0xf]  ;;  %v3692_v26 = vld [vmem:[#allocation2 + $0x14] sm:$0x1] }
 0x206   :  { %3071 = vst [vmem:[#allocation2 + $0x88] sm:$0xf] %v3070_v29  ;;  %v3142_v62 = vld [vmem:[#allocation2 + $0x84] sm:$0x1]  ;;  %v3342_v18 = vshrl.u32 %v3141_v2, 16  ;;  %v3345_v19 = vshll.u32 %v3141_v2, 16 }
 0x207   :  { %3074 = vst [vmem:[#allocation2 + $0x8c] sm:$0x1] %v3073_v58  ;;  %v2946_v9 = vshrl.u32 %v2824_v15, 16  ;;  %v3340_v14 = vsel %vm6670_vm7, %v3335_v38, %v3339_v3  ;;  %v3351_v23 = vshll.u32 %v3142_v62, 16  ;;  %v2949_v0 = vshll.u32 %v2824_v15, 16  ;;  %v6392_v3 = vld [vmem:[#allocation7 + $0x70] sm:$0xff] }
 0x208   :  { %3395 = vrot.lane.b32.xlu2 %v3340_v14, %s6520_s26  ;;  %v3344_v31 = vrot.slane %v3342_v18, 4  ;;  %v3347_v43 = vrot.slane %v3345_v19, 5  ;;  %v3739_v61 = vshll.u32 %v3691_v16, 16  ;;  %v3437_v54 = vld [vmem:[#allocation2 + $0x10] sm:$0xe]  ;;  %v3738_v10 = vrot.slane %v3736_v46, 4  ;;  %5295 = vmatpush.bf16.msra.mxu2 %v6392_v3 }
 0x209   :  { %v2948_v33 = vrot.slane %v2946_v9, 7  ;;  %v3353_v52 = vrot.slane %v3351_v23, 5  ;;  %v3438_v63 = vld [vmem:[#allocation2 + $0x14] sm:$0x1]  ;;  %v3695_v60 = vld [vmem:[#allocation2 + $0x20] sm:$0xf] }
 0x20a   :  { %v3348_v50 = vor.u32 %v3347_v43, %v3344_v31  ;;  %v6400_v4 = vld [vmem:[#allocation7 + $0xb0] sm:$0xff]  ;;  %v3593_v15 = vld [vmem:[#allocation2 + $0x8] sm:$0xf]  ;;  %v3741_v2 = vrot.slane %v3739_v61, 5  ;;  %v3745_v62 = vshll.u32 %v3692_v26, 16  ;;  %v7668_v20 = vrot.slane %v4279_v41, 5 }
 0x20b   :  { %v2951_v6 = vor.u32 %v2949_v0, %v2948_v33  ;;  %v2952_v25 = vrot.slane %v2948_v33, 4  ;;  %v6340_v48 = vld [vmem:[#allocation3 + $0x10] sm:$0xf0]  ;;  %v3696_v18 = vld [vmem:[#allocation2 + $0x24] sm:$0x1]  ;;  %5344 = vmatpush.bf16.msra.mxu3 %v6400_v4 }
 0x20c   :  { %v5953_v17 = vor.u32 %v6340_v48, %v5952_v39  ;;  %v3349_v1 = vrot.slane %v3348_v50, 4  ;;  %v3742_v7 = vor.u32 %v3741_v2, %v3738_v10  ;;  %v3747_v23 = vrot.slane %v3745_v62, 5  ;;  %v3435_v31 = vld [vmem:[#allocation2 + $0x8] sm:$0xe]  ;;  %v4208_v0 = vld [vmem:[#allocation2 + $0x2c] sm:$0x1] }
 0x20d   :  { %v3076_v29 = vsel %vm6593_vm2, %v2951_v6, %v3075_v37  ;;  %v3079_v58 = vsel %vm6722_vm8, %v2952_v25, %v3078_v8  ;;  %v3143_v38 = vld [vmem:[#allocation2 + $0x88] sm:$0xf]  ;;  %v5904_v37 = vrot.slane %v3437_v54, 9  ;;  %v3507_v39 = vrot.slane %v3438_v63, 5  ;;  %v3436_v8 = vld [vmem:[#allocation2 + $0xc] sm:$0x1] }
 0x20e   :  { %3080 = vst [vmem:[#allocation2 + $0x94] sm:$0x1] %v3079_v58  ;;  %5253 = vmatmul.bf16.vlgmr.msrb.gmra.mxu1 %v5953_v17  ;;  %v3354_v16 = vsel %vm6670_vm7, %v3349_v1, %v3353_v52  ;;  %v3144_v19 = vld [vmem:[#allocation2 + $0x8c] sm:$0x1]  ;;  %v3356_v9 = vshrl.u32 %v3143_v38, 16  ;;  %v3359_v14 = vshll.u32 %v3143_v38, 16 }
 0x20f   :  { %3077 = vst [vmem:[#allocation2 + $0x90] sm:$0xf] %v3076_v29  ;;  %3397 = vrot.lane.b32.xlu0 %v3354_v16, %s6520_s26  ;;  %v3365_v5 = vshll.u32 %v3144_v19, 16  ;;  %v3743_v50 = vrot.slane %v3742_v7, 4  ;;  %v3764_v52 = vshrl.u32 %v3695_v60, 16  ;;  %v3508_v25 = vsel %vm6913_vm11, %v5904_v37, %v3507_v39 }
 0x210   :  { %3625 = vrot.lane.b32.xlu2 %v3593_v15, %s6520_s26  ;;  %v3358_v43 = vrot.slane %v3356_v9, 4  ;;  %v3361_v33 = vrot.slane %v3359_v14, 5  ;;  %v3441_v26 = vld [vmem:[#allocation2 + $0x20] sm:$0xe]  ;;  %v3442_v46 = vld [vmem:[#allocation2 + $0x24] sm:$0x1] }
 0x211   :  { %v3767_v48 = vshll.u32 %v3695_v60, 16  ;;  %v3773_v61 = vshll.u32 %v3696_v18, 16  ;;  %v4169_v17 = vld [vmem:[#allocation2 + $0x10] sm:$0xf]  ;;  %v3690_v1 = vld [vmem:[#allocation2 + $0xc] sm:$0x1]  ;;  %v3748_v3 = vsel %vm6670_vm7, %v3743_v50, %v3747_v23 }
 0x212   :  { %v3362_v6 = vor.u32 %v3361_v33, %v3358_v43  ;;  %3579 = vst.msk [vmem:[#allocation3 + $0x2c] sm:$0xf] %vm54_vm0, %v3508_v25  ;;  %v3766_v54 = vrot.slane %v3764_v52, 4  ;;  %v5903_v63 = vrot.slane %v3435_v31, 9  ;;  %v3503_v4 = vrot.slane %v3436_v8, 5 }
 0x213   :  { %v3367_v29 = vrot.slane %v3365_v5, 5  ;;  %v3594_v58 = vld [vmem:[#allocation2 + $0x10] sm:$0xf]  ;;  %v7643_v38 = vld [vmem:[#allocation2 + $0x34] sm:$0x1]  ;;  %v3769_v60 = vrot.slane %v3767_v48, 5  ;;  %v4048_v43 = vsel %vm6913_vm11, %v5919_v45, %v4047_v55 }
 0x214   :  { %v3363_v10 = vrot.slane %v3362_v6, 4  ;;  %v7641_v15 = vld [vmem:[#allocation2 + $0x30] sm:$0xe]  ;;  %3962 = vst.msk [vmem:[#allocation3 + $0x1c] sm:$0xf] %vm54_vm0, %v3748_v3  ;;  %v5906_v2 = vrot.slane %v3441_v26, 9  ;;  %v3504_v16 = vsel %vm6913_vm11, %v5903_v63, %v3503_v4 }
 0x215   :  { %v4285_v62 = vshll.u32 %v4208_v0, 16  ;;  %v7646_v18 = vld [vmem:[#allocation2 + $0x30] sm:$0xf]  ;;  %v3515_v19 = vrot.slane %v3442_v46, 5  ;;  %4185 = vst.msk [vmem:[#allocation3 + $0xc] sm:$0xf] %vm54_vm0, %v4169_v17  ;;  %v3770_v7 = vor.u32 %v3769_v60, %v3766_v54 }
 0x216   :  { %v3689_v9 = vld [vmem:[#allocation2 + $0x8] sm:$0xf]  ;;  %v3368_v14 = vsel %vm6670_vm7, %v3363_v10, %v3367_v29  ;;  %v6408_v5 = vld [vmem:[#allocation7 + $0xf0] sm:$0xff]  ;;  %3578 = vst.msk [vmem:[#allocation3 + $0x18] sm:$0xf] %vm54_vm0, %v3504_v16  ;;  %v3775_v33 = vrot.slane %v3773_v61, 5 }
 0x217   :  { %v3722_v23 = vshrl.u32 %v3689_v9, 16  ;;  %v3725_v31 = vshll.u32 %v3689_v9, 16  ;;  %3399 = vrot.lane.b32.xlu1 %v3368_v14, %s6520_s26  ;;  %3627 = vrot.lane.b32.xlu0 %v3594_v58, %s6520_s26  ;;  %v3516_v0 = vsel %vm6913_vm11, %v5906_v2, %v3515_v19  ;;  %v3731_v37 = vshll.u32 %v3690_v1, 16  ;;  %v3439_v39 = vld [vmem:[#allocation2 + $0x18] sm:$0xe]  ;;  %v6391_v10 = vld [vmem:[#allocation7 + $0x68] sm:$0xff] }
 0x218   :  { %v3440_v8 = vld [vmem:[#allocation2 + $0x1c] sm:$0x1]  ;;  %4107 = vrot.lane.b32.xlu2 %v4048_v43, %s6520_s26  ;;  %5393 = vmatpush.bf16.msra.mxu0 %v6408_v5  ;;  %v3771_v50 = vrot.slane %v3770_v7, 4  ;;  %3581 = vst.msk [vmem:[#allocation3 + $0x54] sm:$0xf] %vm54_vm0, %v3516_v0  ;;  %v5905_v26 = vrot.slane %v3439_v39, 9  ;;  %v4246_v2 = vsel %vm6670_vm7, %v7555_v59, %v7568_v34 }
 0x219   :  { %v3724_v52 = vrot.slane %v3722_v23, 4  ;;  %v3727_v11 = vrot.slane %v3725_v31, 5  ;;  %v5923_v45 = vrot.slane %v7641_v15, 9  ;;  %v4063_v55 = vrot.slane %v7643_v38, 5  ;;  %v4170_v6 = vld [vmem:[#allocation2 + $0x18] sm:$0xf]  ;;  %5296 = vmatpush.bf16.msra.mxu2 %v6391_v10 }
 0x21a   :  { %v3511_v46 = vrot.slane %v3440_v8, 5  ;;  %v7672_v25 = vrot.slane %v4285_v62, 5  ;;  %v4290_v48 = vshrl.u32 %v7646_v18, 16  ;;  %v3776_v61 = vsel %vm6670_vm7, %v3771_v50, %v3775_v33  ;;  %4186 = vst.msk [vmem:[#allocation3 + $0x20] sm:$0xf] %vm54_vm0, %v4170_v6  ;;  %v6399_v29 = vld [vmem:[#allocation7 + $0xa8] sm:$0xff] }
 0x21b   :  { %v3728_v17 = vor.u32 %v3727_v11, %v3724_v52  ;;  %v3693_v1 = vld [vmem:[#allocation2 + $0x18] sm:$0xf]  ;;  %v3378_v21 = vpop.permute.xlu2 %3377  ;;  %3964 = vst.msk [vmem:[#allocation3 + $0x44] sm:$0xf] %vm54_vm0, %v3776_v61  ;;  %v3733_v41 = vrot.slane %v3731_v37, 5  ;;  %v4044_v62 = vsel %vm6913_vm11, %v5918_v47, %v4043_v22  ;;  %5345 = vmatpush.bf16.msra.mxu3 %v6399_v29  ;;  %v3523_v31 = vrot.slane %v3446_v12, 5 }
 0x21c   :  { %v3512_v3 = vsel %vm6913_vm11, %v5905_v26, %v3511_v46  ;;  %v4171_v54 = vld [vmem:[#allocation2 + $0x20] sm:$0xf]  ;;  %v3694_v63 = vld [vmem:[#allocation2 + $0x1c] sm:$0x1]  ;;  %v3750_v4 = vshrl.u32 %v3693_v1, 16  ;;  %v3753_v60 = vshll.u32 %v3693_v1, 16  ;;  %v4282_v10 = vor.u32 %v7668_v20, %v7625_v32 }
 0x21d   :  { %3421 = vst.msk [vmem:[#allocation3 + $0x50] sm:$0xf] %vm714_vm12, %v3378_v21  ;;  %v3729_v58 = vrot.slane %v3728_v17, 4  ;;  %v3595_v16 = vld [vmem:[#allocation2 + $0x18] sm:$0xf]  ;;  %v3759_v43 = vshll.u32 %v3694_v63, 16 }
 0x21e   :  { %v3699_v19 = vld [vmem:[#allocation2 + $0x30] sm:$0xf]  ;;  %v3700_v9 = vld [vmem:[#allocation2 + $0x34] sm:$0x1]  ;;  %3580 = vst.msk [vmem:[#allocation3 + $0x40] sm:$0xf] %vm54_vm0, %v3512_v3 }
 0x21f   :  { %v3734_v14 = vsel %vm6670_vm7, %v3729_v58, %v3733_v41  ;;  %v3792_v5 = vshrl.u32 %v3699_v19, 16  ;;  %v3795_v7 = vshll.u32 %v3699_v19, 16  ;;  %v3801_v59 = vshll.u32 %v3700_v9, 16  ;;  %v3445_v34 = vld [vmem:[#allocation2 + $0x30] sm:$0xe]  ;;  %4457 = vrot.lane.b32.xlu0 %v4246_v2, %s6520_s26  ;;  %4105 = vrot.lane.b32.xlu1 %v4044_v62, %s6520_s26  ;;  %v6407_v9 = vld [vmem:[#allocation7 + $0xe8] sm:$0xff] }
 0x220   :  { %3961 = vst.msk [vmem:[#allocation3 + $0x8] sm:$0xf] %vm54_vm0, %v3734_v14  ;;  %v5908_v36 = vrot.slane %v3445_v34, 9  ;;  %v3752_v22 = vrot.slane %v3750_v4, 4  ;;  %3629 = vrot.lane.b32.xlu2 %v3595_v16, %s6520_s26  ;;  %v7700_v33 = vrot.slane %v4290_v48, 4  ;;  %v3755_v0 = vrot.slane %v3753_v60, 5  ;;  %5394 = vmatpush.bf16.msra.mxu0 %v6407_v9 }
 0x221   :  { %v3794_v47 = vrot.slane %v3792_v5, 4  ;;  %v3797_v23 = vrot.slane %v3795_v7, 5  ;;  %4187 = vst.msk [vmem:[#allocation3 + $0x34] sm:$0xf] %vm54_vm0, %v4171_v54  ;;  %v4521_v37 = vld [vmem:[#allocation2 + $0x10] sm:$0xe]  ;;  %v4260_v16 = vsel %vm6670_vm7, %v7570_v24, %v7590_v13  ;;  %v4056_v24 = vsel %vm6913_vm11, %v5921_v51, %v4055_v44 }
 0x222   :  { %v4522_v39 = vld [vmem:[#allocation2 + $0x14] sm:$0x1]  ;;  %v3524_v50 = vsel %vm6913_vm11, %v5908_v36, %v3523_v31  ;;  %v4523_v52 = vld [vmem:[#allocation2 + $0x18] sm:$0xe]  ;;  %v4524_v11 = vld [vmem:[#allocation2 + $0x1c] sm:$0x1]  ;;  %v3756_v17 = vor.u32 %v3755_v0, %v3752_v22  ;;  %v4274_v0 = vsel %vm6670_vm7, %v7608_v27, %v7610_v30 }
 0x223   :  { %v3798_v8 = vor.u32 %v3797_v23, %v3794_v47  ;;  %v5934_v26 = vrot.slane %v4521_v37, 9  ;;  %v4587_v46 = vrot.slane %v4522_v39, 5  ;;  %v3374_v6 = vpop.permute.xlu0 %3373  ;;  %v3803_v61 = vrot.slane %v3801_v59, 5  ;;  %3583 = vst.msk [vmem:[#allocation3 + $0x7c] sm:$0xf] %vm54_vm0, %v3524_v50  ;;  %v6412_v14 = vld [vmem:[#allocation7 + $0x110] sm:$0xff] }
 0x224   :  { %v5935_v1 = vrot.slane %v4523_v52, 9  ;;  %v4591_v21 = vrot.slane %v4524_v11, 5  ;;  %3419 = vst.msk [vmem:[#allocation3 + $0x28] sm:$0xf] %vm714_vm12, %v3374_v6  ;;  %v3596_v48 = vld [vmem:[#allocation2 + $0x20] sm:$0xf]  ;;  %5446 = vmatpush.bf16.msra.mxu1 %v6412_v14  ;;  %v4052_v50 = vsel %vm6913_vm11, %v5920_v56, %v4051_v49 }
 0x225   :  { %v7706_v41 = vld [vmem:[#allocation2 + $0x34] sm:$0x1]  ;;  %v3799_v3 = vrot.slane %v3798_v8, 4  ;;  %v3761_v54 = vrot.slane %v3759_v43, 5  ;;  %v4588_v63 = vsel %vm6913_vm11, %v5934_v26, %v4587_v46  ;;  %v3443_v4 = vld [vmem:[#allocation2 + $0x28] sm:$0xe] }
 0x226   :  { %v7712_v29 = vld [vmem:[#allocation2 + $0x38] sm:$0xf]  ;;  %v3757_v58 = vrot.slane %v3756_v17, 4  ;;  %v4592_v60 = vsel %vm6913_vm11, %v5935_v1, %v4591_v21  ;;  %4665 = vst.msk [vmem:[#allocation3 + $0x10] sm:$0xf] %vm54_vm0, %v4588_v63  ;;  %v5907_v62 = vrot.slane %v3443_v4, 9 }
 0x227   :  { %v3444_v2 = vld [vmem:[#allocation2 + $0x2c] sm:$0x1]  ;;  %v4293_v19 = vshll.u32 %v7646_v18, 16  ;;  %v3804_v32 = vsel %vm6670_vm7, %v3799_v3, %v3803_v61  ;;  %4666 = vst.msk [vmem:[#allocation3 + $0x24] sm:$0xf] %vm54_vm0, %v4592_v60  ;;  %3631 = vrot.lane.b32.xlu0 %v3596_v48, %s6520_s26  ;;  %4459 = vrot.lane.b32.xlu1 %v4260_v16, %s6520_s26  ;;  %v7740_v59 = vrot.slane %v4282_v10, 4 }
 0x228   :  { %v3519_v20 = vrot.slane %v3444_v2, 5  ;;  %3966 = vst.msk [vmem:[#allocation3 + $0x6c] sm:$0xf] %vm54_vm0, %v3804_v32  ;;  %v3762_v13 = vsel %vm6670_vm7, %v3757_v58, %v3761_v54  ;;  %v4172_v18 = vld [vmem:[#allocation2 + $0x28] sm:$0xf]  ;;  %4111 = vrot.lane.b32.xlu2 %v4056_v24, %s6520_s26  ;;  %v4299_v51 = vshll.u32 %v7706_v41, 16 }
 0x229   :  { %v4173_v5 = vld [vmem:[#allocation2 + $0x30] sm:$0xf]  ;;  %3963 = vst.msk [vmem:[#allocation3 + $0x30] sm:$0xf] %vm54_vm0, %v3762_v13  ;;  %v3697_v7 = vld [vmem:[#allocation2 + $0x28] sm:$0xf] }
 0x22a   :  { %v3520_v40 = vsel %vm6913_vm11, %v5907_v62, %v3519_v20  ;;  %v3778_v44 = vshrl.u32 %v3697_v7, 16  ;;  %v3781_v34 = vshll.u32 %v3697_v7, 16  ;;  %v7744_v12 = vld [vmem:[#allocation2 + $0x3c] sm:$0x1]  ;;  %v4304_v36 = vshrl.u32 %v7712_v29, 16  ;;  %v6390_v37 = vld [vmem:[#allocation7 + $0x60] sm:$0xff] }
 0x22b   :  { %3582 = vst.msk [vmem:[#allocation3 + $0x68] sm:$0xf] %vm54_vm0, %v3520_v40  ;;  %v3787_v22 = vshll.u32 %v3698_v53, 16  ;;  %v3376_v47 = vpop.permute.xlu1 %3375  ;;  %v4525_v43 = vld [vmem:[#allocation2 + $0x20] sm:$0xe]  ;;  %v7760_v11 = vrot.slane %v4293_v19, 5  ;;  %5297 = vmatpush.bf16.msra.mxu2 %v6390_v37  ;;  %v4064_v37 = vsel %vm6913_vm11, %v5923_v45, %v4063_v55 }
 0x22c   :  { %4188 = vst.msk [vmem:[#allocation3 + $0x48] sm:$0xf] %vm54_vm0, %v4172_v18  ;;  %v3780_v23 = vrot.slane %v3778_v44, 4  ;;  %v3783_v31 = vrot.slane %v3781_v34, 5  ;;  %v6398_v39 = vld [vmem:[#allocation7 + $0xa0] sm:$0xff]  ;;  %v4307_v26 = vshll.u32 %v7712_v29, 16 }
 0x22d   :  { %4189 = vst.msk [vmem:[#allocation3 + $0x5c] sm:$0xf] %vm54_vm0, %v4173_v5  ;;  %v4526_v8 = vld [vmem:[#allocation2 + $0x24] sm:$0x1]  ;;  %v3597_v52 = vld [vmem:[#allocation2 + $0x28] sm:$0xf]  ;;  %5346 = vmatpush.bf16.msra.mxu3 %v6398_v39  ;;  %v4296_v5 = vor.u32 %v7760_v11, %v7700_v33 }
 0x22e   :  { %3420 = vst.msk [vmem:[#allocation3 + $0x3c] sm:$0xf] %vm714_vm12, %v3376_v47  ;;  %v3703_v46 = vld [vmem:[#allocation2 + $0x40] sm:$0xf]  ;;  %v3704_v6 = vld [vmem:[#allocation2 + $0x44] sm:$0x1]  ;;  %v3784_v61 = vor.u32 %v3783_v31, %v3780_v23 }
 0x22f   :  { %v4313_v27 = vshll.u32 %v7744_v12, 16  ;;  %v3820_v30 = vshrl.u32 %v3703_v46, 16  ;;  %v3823_v17 = vshll.u32 %v3703_v46, 16  ;;  %v3829_v35 = vshll.u32 %v3704_v6, 16  ;;  %v4527_v1 = vld [vmem:[#allocation2 + $0x28] sm:$0xe]  ;;  %4461 = vrot.lane.b32.xlu0 %v4274_v0, %s6520_s26  ;;  %4109 = vrot.lane.b32.xlu1 %v4052_v50, %s6520_s26 }
 0x230   :  { %v3785_v57 = vrot.slane %v3784_v61, 4  ;;  %v3789_v56 = vrot.slane %v3787_v22, 5  ;;  %v4528_v49 = vld [vmem:[#allocation2 + $0x2c] sm:$0x1]  ;;  %v5936_v21 = vrot.slane %v4525_v43, 9  ;;  %v4595_v48 = vrot.slane %v4526_v8, 5  ;;  %3633 = vrot.lane.b32.xlu2 %v3597_v52, %s6520_s26 }
 0x231   :  { %v7767_v3 = vrot.slane %v4304_v36, 4  ;;  %v3822_v54 = vrot.slane %v3820_v30, 4  ;;  %v3825_v63 = vrot.slane %v3823_v17, 5  ;;  %v5937_v4 = vrot.slane %v4527_v1, 9  ;;  %v3447_v10 = vld [vmem:[#allocation2 + $0x38] sm:$0xe] }
 0x232   :  { %v3790_v29 = vsel %vm6670_vm7, %v3785_v57, %v3789_v56  ;;  %v4596_v58 = vsel %vm6913_vm11, %v5936_v21, %v4595_v48  ;;  %v4599_v60 = vrot.slane %v4528_v49, 5  ;;  %v3448_v2 = vld [vmem:[#allocation2 + $0x3c] sm:$0x1]  ;;  %v5909_v62 = vrot.slane %v3447_v10, 9  ;;  %v5972_v16 = vld [vmem:[#allocation3 + $0x28] sm:$0xf] }
 0x233   :  { %v7773_v19 = vld [vmem:[#allocation2 + $0x28] sm:$0xe]  ;;  %v7775_v9 = vld [vmem:[#allocation2 + $0x2c] sm:$0x1]  ;;  %v7777_v14 = vld [vmem:[#allocation2 + $0x40] sm:$0xf]  ;;  %v3826_v32 = vor.u32 %v3825_v63, %v3822_v54  ;;  %v3384_v13 = vpop.permute.xlu2 %3383  ;;  %v4288_v0 = vsel %vm6670_vm7, %v7740_v59, %v7672_v25 }
 0x234   :  { %v3831_v20 = vrot.slane %v3829_v35, 5  ;;  %3965 = vst.msk [vmem:[#allocation3 + $0x58] sm:$0xf] %vm54_vm0, %v3790_v29  ;;  %v3527_v24 = vrot.slane %v3448_v2, 5  ;;  %v4600_v40 = vsel %vm6913_vm11, %v5937_v4, %v4599_v60  ;;  %v4174_v7 = vld [vmem:[#allocation2 + $0x38] sm:$0xf] }
 0x235   :  { %v6345_v18 = vld [vmem:[#allocation3 + $0x38] sm:$0xf0]  ;;  %4667 = vst.msk [vmem:[#allocation3 + $0x38] sm:$0xf] %vm54_vm0, %v4596_v58  ;;  %v3701_v53 = vld [vmem:[#allocation2 + $0x38] sm:$0xf] }
 0x236   :  { %3424 = vst.msk [vmem:[#allocation3 + $0x8c] sm:$0xf] %vm714_vm12, %v3384_v13  ;;  %v5973_v44 = vor.u32 %v6345_v18, %v5972_v16  ;;  %v3598_v34 = vld [vmem:[#allocation2 + $0x30] sm:$0xf]  ;;  %v3827_v36 = vrot.slane %v3826_v32, 4  ;;  %v3528_v22 = vsel %vm6913_vm11, %v5909_v62, %v3527_v24  ;;  %v3806_v23 = vshrl.u32 %v3701_v53, 16 }
 0x237   :  { %v4175_v47 = vld [vmem:[#allocation2 + $0x40] sm:$0xf]  ;;  %v4309_v31 = vrot.slane %v4307_v26, 5  ;;  %4668 = vst.msk [vmem:[#allocation3 + $0x4c] sm:$0xf] %vm54_vm0, %v4600_v40  ;;  %v3809_v43 = vshll.u32 %v3701_v53, 16  ;;  %3635 = vrot.lane.b32.xlu0 %v3598_v34, %s6520_s26  ;;  %4463 = vrot.lane.b32.xlu1 %v4288_v0, %s6520_s26 }
 0x238   :  { %v3702_v33 = vld [vmem:[#allocation2 + $0x3c] sm:$0x1]  ;;  %5258 = vmatmul.bf16.gmra.mxu1 %v5973_v44  ;;  %v6406_v39 = vld [vmem:[#allocation7 + $0xe0] sm:$0xff]  ;;  %v3832_v8 = vsel %vm6670_vm7, %v3827_v36, %v3831_v20  ;;  %3584 = vst.msk [vmem:[#allocation3 + $0x90] sm:$0xf] %vm54_vm0, %v3528_v22  ;;  %v3808_v50 = vrot.slane %v3806_v23, 4  ;;  %4115 = vrot.lane.b32.xlu2 %v4064_v37, %s6520_s26 }
 0x239   :  { %v4529_v52 = vld [vmem:[#allocation2 + $0x30] sm:$0xe]  ;;  %v4297_v25 = vrot.slane %v4296_v5, 4  ;;  %v5922_v38 = vrot.slane %v7773_v19, 9  ;;  %v4059_v15 = vrot.slane %v7775_v9, 5  ;;  %v4318_v59 = vshrl.u32 %v7777_v14, 16  ;;  %5395 = vmatpush.bf16.msra.mxu0 %v6406_v39 }
 0x23a   :  { %3968 = vst.msk [vmem:[#allocation3 + $0x94] sm:$0xf] %vm54_vm0, %v3832_v8  ;;  %v4321_v45 = vshll.u32 %v7777_v14, 16  ;;  %v3811_v55 = vrot.slane %v3809_v43, 5  ;;  %v4530_v11 = vld [vmem:[#allocation2 + $0x34] sm:$0x1]  ;;  %v4310_v35 = vor.u32 %v4309_v31, %v7767_v3 }
 0x23b   :  { %4190 = vst.msk [vmem:[#allocation3 + $0x70] sm:$0xf] %vm54_vm0, %v4174_v7  ;;  %v7811_v26 = vld [vmem:[#allocation2 + $0x40] sm:$0xe]  ;;  %v7813_v46 = vld [vmem:[#allocation2 + $0x44] sm:$0x1]  ;;  %v3380_v21 = vpop.permute.xlu0 %3379 }
 0x23c   :  { %4191 = vst.msk [vmem:[#allocation3 + $0x84] sm:$0xf] %vm54_vm0, %v4175_v47  ;;  %v3815_v6 = vshll.u32 %v3702_v33, 16  ;;  %v4531_v61 = vld [vmem:[#allocation2 + $0x38] sm:$0xe]  ;;  %v5938_v30 = vrot.slane %v4529_v52, 9  ;;  %v3812_v49 = vor.u32 %v3811_v55, %v3808_v50 }
 0x23d   :  { %v4301_v17 = vrot.slane %v4299_v51, 5  ;;  %v7821_v1 = vrot.slane %v4313_v27, 5  ;;  %v7823_v57 = vld [vmem:[#allocation2 + $0x44] sm:$0x1]  ;;  %v7825_v56 = vld [vmem:[#allocation2 + $0x38] sm:$0xe]  ;;  %v4060_v51 = vsel %vm6913_vm11, %v5922_v38, %v4059_v15 }
 0x23e   :  { %v4320_v48 = vrot.slane %v4318_v59, 4  ;;  %v7827_v54 = vld [vmem:[#allocation2 + $0x3c] sm:$0x1]  ;;  %v4603_v4 = vrot.slane %v4530_v11, 5  ;;  %3422 = vst.msk [vmem:[#allocation3 + $0x64] sm:$0xf] %vm714_vm12, %v3380_v21 }
 0x23f   :  { %v4532_v63 = vld [vmem:[#allocation2 + $0x3c] sm:$0x1]  ;;  %v4302_v41 = vsel %vm6670_vm7, %v4297_v25, %v4301_v17  ;;  %v4323_v12 = vrot.slane %v4321_v45, 5  ;;  %v5939_v10 = vrot.slane %v4531_v61, 9  ;;  %v3599_v29 = vld [vmem:[#allocation2 + $0x38] sm:$0xf]  ;;  %4113 = vrot.lane.b32.xlu1 %v4060_v51, %s6520_s26 }
 0x240   :  { %v6389_v27 = vld [vmem:[#allocation7 + $0x58] sm:$0xff]  ;;  %v3813_v58 = vrot.slane %v3812_v49, 4  ;;  %v3817_v60 = vrot.slane %v3815_v6, 5  ;;  %v4604_v2 = vsel %vm6913_vm11, %v5938_v30, %v4603_v4  ;;  %v4607_v62 = vrot.slane %v4532_v63, 5  ;;  %4465 = vrot.lane.b32.xlu0 %v4302_v41, %s6520_s26  ;;  %3637 = vrot.lane.b32.xlu2 %v3599_v29, %s6520_s26  ;;  %v4215_v40 = vld [vmem:[#allocation2 + $0x48] sm:$0xf] }
 0x241   :  { %v6397_v3 = vld [vmem:[#allocation7 + $0x98] sm:$0xff]  ;;  %v4311_v19 = vrot.slane %v4310_v35, 4  ;;  %v5925_v9 = vrot.slane %v7811_v26, 9  ;;  %v4071_v14 = vrot.slane %v7813_v46, 5  ;;  %v4327_v32 = vshll.u32 %v7823_v57, 16  ;;  %5298 = vmatpush.bf16.msra.mxu2 %v6389_v27  ;;  %v6411_v35 = vld [vmem:[#allocation7 + $0x108] sm:$0xff] }
 0x242   :  { %v3451_v16 = vld [vmem:[#allocation2 + $0x58] sm:$0xe]  ;;  %5347 = vmatpush.bf16.msra.mxu3 %v6397_v3  ;;  %4669 = vst.msk [vmem:[#allocation3 + $0x60] sm:$0xf] %vm54_vm0, %v4604_v2  ;;  %v5924_v20 = vrot.slane %v7825_v56, 9  ;;  %v4067_v24 = vrot.slane %v7827_v54, 5  ;;  %v3818_v13 = vsel %vm6670_vm7, %v3813_v58, %v3817_v60  ;;  %v4608_v7 = vsel %vm6913_vm11, %v5939_v10, %v4607_v62  ;;  %5447 = vmatpush.bf16.msra.mxu1 %v6411_v35 }
 0x243   :  { %v3452_v18 = vld [vmem:[#allocation2 + $0x5c] sm:$0x1]  ;;  %v3705_v5 = vld [vmem:[#allocation2 + $0x58] sm:$0xf]  ;;  %3967 = vst.msk [vmem:[#allocation3 + $0x80] sm:$0xf] %vm54_vm0, %v3818_v13  ;;  %v4324_v36 = vor.u32 %v4323_v12, %v4320_v48  ;;  %v3382_v39 = vpop.permute.xlu1 %3381  ;;  %v3386_v50 = vpop.permute.xlu0 %3385  ;;  %v4316_v59 = vsel %vm6670_vm7, %v4311_v19, %v7821_v1  ;;  %v4072_v48 = vsel %vm6913_vm11, %v5925_v9, %v4071_v14 }
 0x244   :  { %v5911_v53 = vrot.slane %v3451_v16, 9  ;;  %v3834_v44 = vshrl.u32 %v3705_v5, 16  ;;  %v5992_v34 = vld [vmem:[#allocation3 + $0x50] sm:$0xf]  ;;  %v3707_v22 = vld [vmem:[#allocation2 + $0x60] sm:$0xf]  ;;  %v4068_v13 = vsel %vm6913_vm11, %v5924_v20, %v4067_v24 }
 0x245   :  { %v3708_v47 = vld [vmem:[#allocation2 + $0x64] sm:$0x1]  ;;  %v3453_v23 = vld [vmem:[#allocation2 + $0x60] sm:$0xe]  ;;  %v3848_v31 = vshrl.u32 %v3707_v22, 16  ;;  %v3851_v33 = vshll.u32 %v3707_v22, 16 }
 0x246   :  { %v3454_v43 = vld [vmem:[#allocation2 + $0x64] sm:$0x1]  ;;  %v5912_v0 = vrot.slane %v3453_v23, 9  ;;  %v3535_v37 = vrot.slane %v3452_v18, 5  ;;  %4670 = vst.msk [vmem:[#allocation3 + $0x74] sm:$0xf] %vm54_vm0, %v4608_v7 }
 0x247   :  { %v6350_v8 = vld [vmem:[#allocation3 + $0x60] sm:$0xf0]  ;;  %v3539_v52 = vrot.slane %v3454_v43, 5  ;;  %v3837_v25 = vshll.u32 %v3705_v5, 16  ;;  %3423 = vst.msk [vmem:[#allocation3 + $0x78] sm:$0xf] %vm714_vm12, %v3382_v39  ;;  %4467 = vrot.lane.b32.xlu1 %v4316_v59, %s6520_s26 }
 0x248   :  { %v5993_v38 = vor.u32 %v6350_v8, %v5992_v34  ;;  %v3600_v15 = vld [vmem:[#allocation2 + $0x40] sm:$0xf]  ;;  %v4332_v45 = vshrl.u32 %v4215_v40, 16  ;;  %v4335_v55 = vshll.u32 %v4215_v40, 16  ;;  %v7855_v26 = vrot.slane %v4324_v36, 4  ;;  %v6405_v17 = vld [vmem:[#allocation7 + $0xd8] sm:$0xff]  ;;  %4119 = vrot.lane.b32.xlu2 %v4072_v48, %s6520_s26 }
 0x249   :  { %v4217_v11 = vld [vmem:[#allocation2 + $0x60] sm:$0xf]  ;;  %v7857_v46 = vrot.slane %v4327_v32, 5  ;;  %3425 = vst.msk [vmem:[#allocation3 + $0xa0] sm:$0xf] %vm714_vm12, %v3386_v50  ;;  %v3850_v6 = vrot.slane %v3848_v31, 4  ;;  %v3540_v1 = vsel %vm6913_vm11, %v5912_v0, %v3539_v52  ;;  %v3536_v21 = vsel %vm6913_vm11, %v5911_v53, %v3535_v37  ;;  %3639 = vrot.lane.b32.xlu0 %v3600_v15, %s6520_s26  ;;  %5396 = vmatpush.bf16.msra.mxu0 %v6405_v17 }
 0x24a   :  { %v3836_v61 = vrot.slane %v3834_v44, 4  ;;  %5263 = vmatmul.bf16.gmra.mxu1 %v5993_v38  ;;  %v7860_v30 = vld [vmem:[#allocation2 + $0x60] sm:$0xe]  ;;  %v3853_v57 = vrot.slane %v3851_v33, 5  ;;  %v3857_v49 = vshll.u32 %v3708_v47, 16  ;;  %v4346_v63 = vshrl.u32 %v4217_v11, 16 }
 0x24b   :  { %v7870_v4 = vld [vmem:[#allocation2 + $0x68] sm:$0xf]  ;;  %v3706_v41 = vld [vmem:[#allocation2 + $0x5c] sm:$0x1]  ;;  %v3839_v51 = vrot.slane %v3837_v25, 5  ;;  %v4334_v27 = vrot.slane %v4332_v45, 4  ;;  %v3390_v32 = vpop.permute.xlu2 %3389  ;;  %v4330_v20 = vsel %vm6670_vm7, %v7855_v26, %v7857_v46 }
 0x24c   :  { %v4216_v12 = vld [vmem:[#allocation2 + $0x4c] sm:$0x1]  ;;  %v4337_v3 = vrot.slane %v4335_v55, 5  ;;  %v7873_v10 = vld [vmem:[#allocation2 + $0x64] sm:$0x1]  ;;  %v3854_v29 = vor.u32 %v3853_v57, %v3850_v6  ;;  %v4349_v16 = vshll.u32 %v4217_v11, 16 }
 0x24d   :  { %3587 = vst.msk [vmem:[#allocation3 + $0xcc] sm:$0xf] %vm54_vm0, %v3540_v1  ;;  %v4177_v58 = vld [vmem:[#allocation2 + $0x60] sm:$0xf]  ;;  %v3840_v60 = vor.u32 %v3839_v51, %v3836_v61  ;;  %v7877_v62 = vld [vmem:[#allocation2 + $0x64] sm:$0x1] }
 0x24e   :  { %3586 = vst.msk [vmem:[#allocation3 + $0xb8] sm:$0xf] %vm54_vm0, %v3536_v21  ;;  %v4533_v2 = vld [vmem:[#allocation2 + $0x40] sm:$0xe]  ;;  %v3855_v19 = vrot.slane %v3854_v29, 4  ;;  %v3859_v9 = vrot.slane %v3857_v49, 5  ;;  %v4338_v53 = vor.u32 %v4337_v3, %v4334_v27 }
 0x24f   :  { %4193 = vst.msk [vmem:[#allocation3 + $0xac] sm:$0xf] %vm54_vm0, %v4177_v58  ;;  %v3843_v14 = vshll.u32 %v3706_v41, 16  ;;  %v5927_v18 = vrot.slane %v7860_v30, 9  ;;  %v7887_v5 = vld [vmem:[#allocation2 + $0x58] sm:$0xe]  ;;  %4117 = vrot.lane.b32.xlu1 %v4068_v13, %s6520_s26 }
 0x250   :  { %v4360_v40 = vshrl.u32 %v7870_v4, 16  ;;  %v4534_v7 = vld [vmem:[#allocation2 + $0x44] sm:$0x1]  ;;  %3427 = vst.msk [vmem:[#allocation3 + $0xc8] sm:$0xf] %vm714_vm12, %v3390_v32  ;;  %v4341_v44 = vshll.u32 %v4216_v12, 16  ;;  %v3860_v54 = vsel %vm6670_vm7, %v3855_v19, %v3859_v9 }
 0x251   :  { %v6388_v34 = vld [vmem:[#allocation7 + $0x50] sm:$0xff]  ;;  %v3841_v56 = vrot.slane %v3840_v60, 4  ;;  %v3601_v24 = vld [vmem:[#allocation2 + $0x58] sm:$0xf]  ;;  %v4079_v22 = vrot.slane %v7873_v10, 5  ;;  %v4348_v47 = vrot.slane %v4346_v63, 4  ;;  %4469 = vrot.lane.b32.xlu0 %v4330_v20, %s6520_s26 }
 0x252   :  { %v6396_v36 = vld [vmem:[#allocation7 + $0x90] sm:$0xff]  ;;  %v5940_v23 = vrot.slane %v4533_v2, 9  ;;  %v4351_v31 = vrot.slane %v4349_v16, 5  ;;  %v4363_v33 = vshll.u32 %v7870_v4, 16  ;;  %5299 = vmatpush.bf16.msra.mxu2 %v6388_v34  ;;  %3970 = vst.msk [vmem:[#allocation3 + $0xbc] sm:$0xf] %vm54_vm0, %v3860_v54  ;;  %3641 = vrot.lane.b32.xlu2 %v3601_v24, %s6520_s26 }
 0x253   :  { %5348 = vmatpush.bf16.msra.mxu3 %v6396_v36  ;;  %v3845_v43 = vrot.slane %v3843_v14, 5  ;;  %v4611_v0 = vrot.slane %v4534_v7, 5  ;;  %v4355_v37 = vshll.u32 %v7877_v62, 16  ;;  %v5926_v39 = vrot.slane %v7887_v5, 9  ;;  %v4221_v8 = vld [vmem:[#allocation2 + $0x70] sm:$0xf] }
 0x254   :  { %v3095_v50 = vld [vmem:[#allocation2 + $0x80] sm:$0xf]  ;;  %v4339_v52 = vrot.slane %v4338_v53, 4  ;;  %v4343_v25 = vrot.slane %v4341_v44, 5  ;;  %v7905_v38 = vrot.slane %v4360_v40, 4  ;;  %v4352_v46 = vor.u32 %v4351_v31, %v4348_v47  ;;  %v6404_v16 = vld [vmem:[#allocation7 + $0xd0] sm:$0xff] }
 0x255   :  { %3111 = vst.msk [vmem:[#allocation3 + $0x118] sm:$0xf] %vm54_vm0, %v3095_v50  ;;  %v3846_v15 = vsel %vm6670_vm7, %v3841_v56, %v3845_v43  ;;  %v6012_v59 = vld [vmem:[#allocation3 + $0x78] sm:$0xf]  ;;  %v6355_v45 = vld [vmem:[#allocation3 + $0x88] sm:$0xf0]  ;;  %v4612_v26 = vsel %vm6913_vm11, %v5940_v23, %v4611_v0  ;;  %v4080_v2 = vsel %vm6913_vm11, %v5927_v18, %v4079_v22  ;;  %5397 = vmatpush.bf16.msra.mxu0 %v6404_v16 }
 0x256   :  { %v3711_v55 = vld [vmem:[#allocation2 + $0x70] sm:$0xf]  ;;  %v7912_v6 = vld [vmem:[#allocation2 + $0x5c] sm:$0x1]  ;;  %v7914_v61 = vrot.slane %v4363_v33, 5  ;;  %v4374_v49 = vshrl.u32 %v4221_v8, 16  ;;  %v6013_v63 = vor.u32 %v6355_v45, %v6012_v59  ;;  %v4344_v41 = vsel %vm6670_vm7, %v4339_v52, %v4343_v25 }
 0x257   :  { %v3457_v11 = vld [vmem:[#allocation2 + $0x70] sm:$0xe]  ;;  %v3712_v17 = vld [vmem:[#allocation2 + $0x74] sm:$0x1]  ;;  %v3876_v35 = vshrl.u32 %v3711_v55, 16  ;;  %v3879_v1 = vshll.u32 %v3711_v55, 16  ;;  %4471 = vrot.lane.b32.xlu1 %v4344_v41, %s6520_s26 }
 0x258   :  { %v3458_v57 = vld [vmem:[#allocation2 + $0x74] sm:$0x1]  ;;  %v5914_v21 = vrot.slane %v3457_v11, 9  ;;  %3969 = vst.msk [vmem:[#allocation3 + $0xa8] sm:$0xf] %vm54_vm0, %v3846_v15  ;;  %v4377_v12 = vshll.u32 %v4221_v8, 16  ;;  %v4366_v34 = vor.u32 %v7914_v61, %v7905_v38 }
 0x259   :  { %v3547_v48 = vrot.slane %v3458_v57, 5  ;;  %v3602_v4 = vld [vmem:[#allocation2 + $0x60] sm:$0xf]  ;;  %v7919_v51 = vld [vmem:[#allocation2 + $0x6c] sm:$0x1]  ;;  %v3878_v27 = vrot.slane %v3876_v35, 4 }
 0x25a   :  { %4671 = vst.msk [vmem:[#allocation3 + $0x88] sm:$0xf] %vm54_vm0, %v4612_v26  ;;  %v3881_v3 = vrot.slane %v3879_v1, 5  ;;  %v3885_v10 = vshll.u32 %v3712_v17, 16  ;;  %v3455_v58 = vld [vmem:[#allocation2 + $0x68] sm:$0xe]  ;;  %5268 = vmatmul.bf16.gmra.mxu1 %v6013_v63  ;;  %3643 = vrot.lane.b32.xlu0 %v3602_v4, %s6520_s26 }
 0x25b   :  { %v3548_v29 = vsel %vm6913_vm11, %v5914_v21, %v3547_v48  ;;  %v3456_v60 = vld [vmem:[#allocation2 + $0x6c] sm:$0x1]  ;;  %v4353_v62 = vrot.slane %v4352_v46, 4  ;;  %v5913_v19 = vrot.slane %v3455_v58, 9  ;;  %v4357_v14 = vrot.slane %v4355_v37, 5  ;;  %4123 = vrot.lane.b32.xlu2 %v4080_v2, %s6520_s26  ;;  %v3388_v33 = vpop.permute.xlu1 %3387 }
 0x25c   :  { %3589 = vst.msk [vmem:[#allocation3 + $0xf4] sm:$0xf] %vm54_vm0, %v3548_v29  ;;  %v3543_v9 = vrot.slane %v3456_v60, 5  ;;  %v4075_v32 = vrot.slane %v7912_v6, 5  ;;  %v4369_v13 = vshll.u32 %v7919_v51, 16  ;;  %v3882_v30 = vor.u32 %v3881_v3, %v3878_v27  ;;  %v6387_v37 = vld [vmem:[#allocation7 + $0x48] sm:$0xff] }
 0x25d   :  { %v4222_v40 = vld [vmem:[#allocation2 + $0x74] sm:$0x1]  ;;  %v4376_v18 = vrot.slane %v4374_v49, 4  ;;  %v4379_v7 = vrot.slane %v4377_v12, 5  ;;  %v4223_v53 = vld [vmem:[#allocation2 + $0x78] sm:$0xf]  ;;  %v4358_v15 = vsel %vm6670_vm7, %v4353_v62, %v4357_v14  ;;  %5300 = vmatpush.bf16.msra.mxu2 %v6387_v37 }
 0x25e   :  { %v3096_v44 = vld [vmem:[#allocation2 + $0x88] sm:$0xf]  ;;  %v7936_v36 = vld [vmem:[#allocation2 + $0x70] sm:$0xe]  ;;  %v7938_v54 = vld [vmem:[#allocation2 + $0x74] sm:$0x1]  ;;  %v3544_v24 = vsel %vm6913_vm11, %v5913_v19, %v3543_v9  ;;  %v4076_v59 = vsel %vm6913_vm11, %v5926_v39, %v4075_v32 }
 0x25f   :  { %3112 = vst.msk [vmem:[#allocation3 + $0x12c] sm:$0xf] %vm54_vm0, %v3096_v44  ;;  %v3883_v56 = vrot.slane %v3882_v30, 4  ;;  %v3887_v20 = vrot.slane %v3885_v10, 5  ;;  %v4178_v22 = vld [vmem:[#allocation2 + $0x68] sm:$0xf]  ;;  %v4380_v52 = vor.u32 %v4379_v7, %v4376_v18  ;;  %4121 = vrot.lane.b32.xlu1 %v4076_v59, %s6520_s26 }
 0x260   :  { %v7943_v47 = vld [vmem:[#allocation2 + $0x68] sm:$0xe]  ;;  %v7945_v23 = vld [vmem:[#allocation2 + $0x6c] sm:$0x1]  ;;  %v4224_v31 = vld [vmem:[#allocation2 + $0x7c] sm:$0x1] }
 0x261   :  { %3588 = vst.msk [vmem:[#allocation3 + $0xe0] sm:$0xf] %vm54_vm0, %v3544_v24  ;;  %v4383_v43 = vshll.u32 %v4222_v40, 16  ;;  %v4388_v0 = vshrl.u32 %v4223_v53, 16  ;;  %v6395_v8 = vld [vmem:[#allocation7 + $0x88] sm:$0xff]  ;;  %v3888_v50 = vsel %vm6670_vm7, %v3883_v56, %v3887_v20  ;;  %v4367_v45 = vrot.slane %v4366_v34, 4 }
 0x262   :  { %4194 = vst.msk [vmem:[#allocation3 + $0xc0] sm:$0xf] %vm54_vm0, %v4178_v22  ;;  %v4179_v25 = vld [vmem:[#allocation2 + $0x70] sm:$0xf]  ;;  %v3709_v38 = vld [vmem:[#allocation2 + $0x68] sm:$0xf]  ;;  %5349 = vmatpush.bf16.msra.mxu3 %v6395_v8  ;;  %4473 = vrot.lane.b32.xlu0 %v4358_v15, %s6520_s26  ;;  %v3396_v27 = vpop.permute.xlu2 %3395 }
 0x263   :  { %3426 = vst.msk [vmem:[#allocation3 + $0xb4] sm:$0xf] %vm714_vm12, %v3388_v33  ;;  %v4391_v55 = vshll.u32 %v4223_v53, 16  ;;  %v5929_v11 = vrot.slane %v7936_v36, 9  ;;  %v4087_v26 = vrot.slane %v7938_v54, 5  ;;  %v4397_v46 = vshll.u32 %v4224_v31, 16 }
 0x264   :  { %3972 = vst.msk [vmem:[#allocation3 + $0xe4] sm:$0xf] %vm54_vm0, %v3888_v50  ;;  %v3862_v6 = vshrl.u32 %v3709_v38, 16  ;;  %v3603_v5 = vld [vmem:[#allocation2 + $0x68] sm:$0xf]  ;;  %v4371_v39 = vrot.slane %v4369_v13, 5 }
 0x265   :  { %4195 = vst.msk [vmem:[#allocation3 + $0xd4] sm:$0xf] %vm54_vm0, %v4179_v25  ;;  %v7964_v61 = vrot.slane %v4383_v43, 5  ;;  %v5928_v17 = vrot.slane %v7943_v47, 9  ;;  %v4083_v35 = vrot.slane %v7945_v23, 5  ;;  %3645 = vrot.lane.b32.xlu2 %v3603_v5, %s6520_s26  ;;  %v7969_v49 = vrot.slane %v4380_v52, 4 }
 0x266   :  { %v6032_v57 = vld [vmem:[#allocation3 + $0xa0] sm:$0xf]  ;;  %v4390_v1 = vrot.slane %v4388_v0, 4  ;;  %v3710_v21 = vld [vmem:[#allocation2 + $0x6c] sm:$0x1]  ;;  %v4393_v48 = vrot.slane %v4391_v55, 5  ;;  %v4372_v16 = vsel %vm6670_vm7, %v4367_v45, %v4371_v39  ;;  %v4088_v19 = vsel %vm6913_vm11, %v5929_v11, %v4087_v26 }
 0x267   :  { %v7971_v63 = vld [vmem:[#allocation2 + $0x78] sm:$0xe]  ;;  %v7973_v4 = vld [vmem:[#allocation2 + $0x7c] sm:$0x1]  ;;  %v3715_v41 = vld [vmem:[#allocation2 + $0x80] sm:$0xf]  ;;  %4475 = vrot.lane.b32.xlu1 %v4372_v16, %s6520_s26 }
 0x268   :  { %v3716_v51 = vld [vmem:[#allocation2 + $0x84] sm:$0x1]  ;;  %v3865_v12 = vshll.u32 %v3709_v38, 16  ;;  %v7975_v3 = vrot.slane %v4397_v46, 5  ;;  %v3904_v10 = vshrl.u32 %v3715_v41, 16  ;;  %v3907_v29 = vshll.u32 %v3715_v41, 16 }
 0x269   :  { %v3461_v58 = vld [vmem:[#allocation2 + $0x80] sm:$0xe]  ;;  %v3864_v60 = vrot.slane %v3862_v6, 4  ;;  %3430 = vst.msk [vmem:[#allocation3 + $0x104] sm:$0xf] %vm714_vm12, %v3396_v27  ;;  %v3913_v30 = vshll.u32 %v3716_v51, 16  ;;  %v4394_v54 = vor.u32 %v4393_v48, %v4390_v1 }
 0x26a   :  { %v7977_v2 = vld [vmem:[#allocation2 + $0x60] sm:$0xe]  ;;  %v6360_v62 = vld [vmem:[#allocation3 + $0xb0] sm:$0xf0]  ;;  %v4538_v9 = vld [vmem:[#allocation2 + $0x64] sm:$0x1]  ;;  %v3626_v5 = vpop.permute.xlu2 %3625 }
 0x26b   :  { %v6033_v14 = vor.u32 %v6360_v62, %v6032_v57  ;;  %v3604_v32 = vld [vmem:[#allocation2 + $0x70] sm:$0xf]  ;;  %v3906_v13 = vrot.slane %v3904_v10, 4  ;;  %v3909_v40 = vrot.slane %v3907_v29, 5  ;;  %v3462_v18 = vld [vmem:[#allocation2 + $0x84] sm:$0x1]  ;;  %v3392_v41 = vpop.permute.xlu0 %3391 }
 0x26c   :  { %v5916_v7 = vrot.slane %v3461_v58, 9  ;;  %v3555_v53 = vrot.slane %v3462_v18, 5  ;;  %v3867_v44 = vrot.slane %v3865_v12, 5  ;;  %v3871_v34 = vshll.u32 %v3710_v21, 16  ;;  %v4539_v36 = vld [vmem:[#allocation2 + $0x68] sm:$0xe]  ;;  %3647 = vrot.lane.b32.xlu0 %v3604_v32, %s6520_s26 }
 0x26d   :  { %5273 = vmatmul.bf16.gmra.mxu1 %v6033_v14  ;;  %v5930_v56 = vrot.slane %v7971_v63, 9  ;;  %v4091_v20 = vrot.slane %v7973_v4, 5  ;;  %v6403_v24 = vld [vmem:[#allocation7 + $0xc8] sm:$0xff]  ;;  %v6410_v22 = vld [vmem:[#allocation7 + $0x100] sm:$0xff]  ;;  %v3910_v31 = vor.u32 %v3909_v40, %v3906_v13  ;;  %v3915_v0 = vrot.slane %v3913_v30, 5  ;;  %4127 = vrot.lane.b32.xlu2 %v4088_v19, %s6520_s26 }
 0x26e   :  { %v4540_v33 = vld [vmem:[#allocation2 + $0x6c] sm:$0x1]  ;;  %v4225_v43 = vld [vmem:[#allocation2 + $0x80] sm:$0xf]  ;;  %v3556_v37 = vsel %vm6913_vm11, %v5916_v7, %v3555_v53  ;;  %v3868_v8 = vor.u32 %v3867_v44, %v3864_v60  ;;  %v5942_v50 = vrot.slane %v7977_v2, 9  ;;  %5398 = vmatpush.bf16.msra.mxu0 %v6403_v24  ;;  %v4619_v59 = vrot.slane %v4538_v9, 5  ;;  %5448 = vmatpush.bf16.msra.mxu1 %v6410_v22 }
 0x26f   :  { %v3459_v52 = vld [vmem:[#allocation2 + $0x78] sm:$0xe]  ;;  %v7992_v25 = vld [vmem:[#allocation2 + $0x80] sm:$0xe]  ;;  %v7994_v38 = vld [vmem:[#allocation2 + $0x84] sm:$0x1]  ;;  %v4386_v13 = vsel %vm6670_vm7, %v7969_v49, %v7964_v61  ;;  %v4084_v40 = vsel %vm6913_vm11, %v5928_v17, %v4083_v35 }
 0x270   :  { %v3911_v15 = vrot.slane %v3910_v31, 4  ;;  %3591 = vst.msk [vmem:[#allocation3 + $0x11c] sm:$0xf] %vm54_vm0, %v3556_v37  ;;  %v3460_v45 = vld [vmem:[#allocation2 + $0x7c] sm:$0x1]  ;;  %v3869_v11 = vrot.slane %v3868_v8, 4  ;;  %v4620_v62 = vsel %vm6913_vm11, %v5942_v50, %v4619_v59  ;;  %4125 = vrot.lane.b32.xlu1 %v4084_v40, %s6520_s26 }
 0x271   :  { %v4227_v55 = vld [vmem:[#allocation2 + $0x88] sm:$0xf]  ;;  %v3873_v26 = vrot.slane %v3871_v34, 5  ;;  %v5943_v46 = vrot.slane %v4539_v36, 9  ;;  %v4623_v6 = vrot.slane %v4540_v33, 5  ;;  %v7997_v39 = vrot.slane %v4394_v54, 4 }
 0x272   :  { %v7999_v57 = vld [vmem:[#allocation2 + $0x84] sm:$0x1]  ;;  %v4402_v1 = vshrl.u32 %v4225_v43, 16  ;;  %v3916_v21 = vsel %vm6670_vm7, %v3911_v15, %v3915_v0  ;;  %v3713_v48 = vld [vmem:[#allocation2 + $0x78] sm:$0xf]  ;;  %v4405_v51 = vshll.u32 %v4225_v43, 16  ;;  %v4108_v31 = vpop.permute.xlu2 %4107 }
 0x273   :  { %3673 = vst.msk [vmem:[#allocation3 + $0x4] sm:$0xf] %vm714_vm12, %v3626_v5  ;;  %v3874_v12 = vsel %vm6670_vm7, %v3869_v11, %v3873_v26  ;;  %v5915_v27 = vrot.slane %v3459_v52, 9  ;;  %v3551_v10 = vrot.slane %v3460_v45, 5  ;;  %v4416_v29 = vshrl.u32 %v4227_v55, 16  ;;  %v6386_v60 = vld [vmem:[#allocation7 + $0x40] sm:$0xff]  ;;  %v3394_v37 = vpop.permute.xlu1 %3393 }
 0x274   :  { %3428 = vst.msk [vmem:[#allocation3 + $0xdc] sm:$0xf] %vm714_vm12, %v3392_v41  ;;  %v4419_v58 = vshll.u32 %v4227_v55, 16  ;;  %v6394_v2 = vld [vmem:[#allocation7 + $0x80] sm:$0xff]  ;;  %v3605_v16 = vld [vmem:[#allocation2 + $0x78] sm:$0xf]  ;;  %v4624_v14 = vsel %vm6913_vm11, %v5943_v46, %v4623_v6  ;;  %5301 = vmatpush.bf16.msra.mxu2 %v6386_v60  ;;  %4477 = vrot.lane.b32.xlu0 %v4386_v13, %s6520_s26 }
 0x275   :  { %v5931_v19 = vrot.slane %v7992_v25, 9  ;;  %v4095_v9 = vrot.slane %v7994_v38, 5  ;;  %3974 = vst.msk [vmem:[#allocation3 + $0x10c] sm:$0xf] %vm54_vm0, %v3916_v21  ;;  %v3890_v32 = vshrl.u32 %v3713_v48, 16  ;;  %v8024_v30 = vrot.slane %v4402_v1, 4  ;;  %5350 = vmatpush.bf16.msra.mxu3 %v6394_v2  ;;  %3649 = vrot.lane.b32.xlu2 %v3605_v16, %s6520_s26 }
 0x276   :  { %v4411_v18 = vshll.u32 %v7999_v57, 16  ;;  %3971 = vst.msk [vmem:[#allocation3 + $0xd0] sm:$0xf] %vm54_vm0, %v3874_v12  ;;  %v3714_v7 = vld [vmem:[#allocation2 + $0x7c] sm:$0x1]  ;;  %v4407_v61 = vrot.slane %v4405_v51, 5  ;;  %v3552_v47 = vsel %vm6913_vm11, %v5915_v27, %v3551_v10  ;;  %v4400_v57 = vsel %vm6670_vm7, %v7997_v39, %v7975_v3 }
 0x277   :  { %4673 = vst.msk [vmem:[#allocation3 + $0xb0] sm:$0xf] %vm54_vm0, %v4620_v62  ;;  %v3892_v23 = vrot.slane %v3890_v32, 4  ;;  %v3893_v17 = vshll.u32 %v3713_v48, 16  ;;  %v8034_v35 = vrot.slane %v4416_v29, 4  ;;  %v8036_v49 = vrot.slane %v4419_v58, 5 }
 0x278   :  { %4674 = vst.msk [vmem:[#allocation3 + $0xc4] sm:$0xf] %vm54_vm0, %v4624_v14  ;;  %v4180_v53 = vld [vmem:[#allocation2 + $0x78] sm:$0xf]  ;;  %v6052_v44 = vld [vmem:[#allocation3 + $0xc8] sm:$0xf]  ;;  %v4408_v26 = vor.u32 %v4407_v61, %v8024_v30  ;;  %4479 = vrot.lane.b32.xlu1 %v4400_v57, %s6520_s26  ;;  %v4096_v12 = vsel %vm6913_vm11, %v5931_v19, %v4095_v9 }
 0x279   :  { %v4228_v34 = vld [vmem:[#allocation2 + $0x8c] sm:$0x1]  ;;  %v3719_v36 = vld [vmem:[#allocation2 + $0x90] sm:$0xf]  ;;  %v3720_v54 = vld [vmem:[#allocation2 + $0x94] sm:$0x1]  ;;  %v4422_v10 = vor.u32 %v8036_v49, %v8034_v35 }
 0x27a   :  { %v3895_v24 = vrot.slane %v3893_v17, 5  ;;  %v3899_v22 = vshll.u32 %v3714_v7, 16  ;;  %v3932_v33 = vshrl.u32 %v3719_v36, 16  ;;  %v3935_v43 = vshll.u32 %v3719_v36, 16  ;;  %3590 = vst.msk [vmem:[#allocation3 + $0x108] sm:$0xf] %vm54_vm0, %v3552_v47  ;;  %v3630_v9 = vpop.permute.xlu2 %3629 }
 0x27b   :  { %v4541_v0 = vld [vmem:[#allocation2 + $0x70] sm:$0xe]  ;;  %4154 = vst.msk [vmem:[#allocation3 + $0x1c] sm:$0xf] %vm714_vm12, %v4108_v31  ;;  %v6365_v8 = vld [vmem:[#allocation3 + $0xd8] sm:$0xf0]  ;;  %v4092_v36 = vsel %vm6913_vm11, %v5930_v56, %v4091_v20 }
 0x27c   :  { %v4181_v50 = vld [vmem:[#allocation2 + $0x80] sm:$0xf]  ;;  %v3896_v52 = vor.u32 %v3895_v24, %v3892_v23  ;;  %v4542_v38 = vld [vmem:[#allocation2 + $0x74] sm:$0x1]  ;;  %3429 = vst.msk [vmem:[#allocation3 + $0xf0] sm:$0xf] %vm714_vm12, %v3394_v37  ;;  %v6053_v15 = vor.u32 %v6365_v8, %v6052_v44 }
 0x27d   :  { %v3606_v59 = vld [vmem:[#allocation2 + $0x80] sm:$0xf]  ;;  %v3934_v45 = vrot.slane %v3932_v33, 4  ;;  %v3937_v55 = vrot.slane %v3935_v43, 5  ;;  %v3941_v11 = vshll.u32 %v3720_v54, 16  ;;  %v3901_v6 = vrot.slane %v3899_v22, 5  ;;  %4131 = vrot.lane.b32.xlu2 %v4096_v12, %s6520_s26 }
 0x27e   :  { %4196 = vst.msk [vmem:[#allocation3 + $0xe8] sm:$0xf] %vm54_vm0, %v4180_v53  ;;  %v3897_v46 = vrot.slane %v3896_v52, 4  ;;  %v5944_v5 = vrot.slane %v4541_v0, 9  ;;  %5278 = vmatmul.bf16.gmra.mxu1 %v6053_v15  ;;  %v4425_v1 = vshll.u32 %v4228_v34, 16  ;;  %v6402_v21 = vld [vmem:[#allocation7 + $0xc0] sm:$0xff]  ;;  %3651 = vrot.lane.b32.xlu0 %v3606_v59, %s6520_s26 }
 0x27f   :  { %v3938_v48 = vor.u32 %v3937_v55, %v3934_v45  ;;  %v4543_v41 = vld [vmem:[#allocation2 + $0x78] sm:$0xe]  ;;  %v4627_v51 = vrot.slane %v4542_v38, 5  ;;  %v4413_v27 = vrot.slane %v4411_v18, 5  ;;  %v8056_v29 = vld [vmem:[#allocation2 + $0x90] sm:$0xe]  ;;  %5399 = vmatpush.bf16.msra.mxu0 %v6402_v21 }
 0x280   :  { %v3902_v3 = vsel %vm6670_vm7, %v3897_v46, %v3901_v6  ;;  %v4544_v39 = vld [vmem:[#allocation2 + $0x7c] sm:$0x1]  ;;  %v8061_v58 = vld [vmem:[#allocation2 + $0x94] sm:$0x1]  ;;  %v3943_v25 = vrot.slane %v3941_v11, 5  ;;  %v4409_v62 = vrot.slane %v4408_v26, 4  ;;  %4129 = vrot.lane.b32.xlu1 %v4092_v36, %s6520_s26 }
 0x281   :  { %v3939_v60 = vrot.slane %v3938_v48, 4  ;;  %4197 = vst.msk [vmem:[#allocation3 + $0xfc] sm:$0xf] %vm54_vm0, %v4181_v50  ;;  %v4628_v2 = vsel %vm6913_vm11, %v5944_v5, %v4627_v51  ;;  %v4229_v16 = vld [vmem:[#allocation2 + $0x90] sm:$0xf]  ;;  %v5945_v19 = vrot.slane %v4543_v41, 9  ;;  %v3398_v43 = vpop.permute.xlu0 %3397 }
 0x282   :  { %3973 = vst.msk [vmem:[#allocation3 + $0xf8] sm:$0xf] %vm54_vm0, %v3902_v3  ;;  %v8067_v14 = vrot.slane %v4425_v1, 5  ;;  %v4631_v13 = vrot.slane %v4544_v39, 5  ;;  %v3463_v40 = vld [vmem:[#allocation2 + $0x88] sm:$0xe]  ;;  %v4414_v34 = vsel %vm6670_vm7, %v4409_v62, %v4413_v27  ;;  %v4112_v15 = vpop.permute.xlu2 %4111 }
 0x283   :  { %v3944_v32 = vsel %vm6670_vm7, %v3939_v60, %v3943_v25  ;;  %4675 = vst.msk [vmem:[#allocation3 + $0xd8] sm:$0xf] %vm54_vm0, %v4628_v2  ;;  %v8073_v30 = vrot.slane %v4422_v10, 4  ;;  %v5933_v18 = vrot.slane %v8056_v29, 9  ;;  %v3464_v7 = vld [vmem:[#allocation2 + $0x8c] sm:$0x1] }
 0x284   :  { %3675 = vst.msk [vmem:[#allocation3 + $0x2c] sm:$0xf] %vm714_vm12, %v3630_v9  ;;  %v4103_v61 = vrot.slane %v8061_v58, 5  ;;  %v4632_v47 = vsel %vm6913_vm11, %v5945_v19, %v4631_v13  ;;  %v5917_v23 = vrot.slane %v3463_v40, 9  ;;  %v3559_v17 = vrot.slane %v3464_v7, 5 }
 0x285   :  { %3976 = vst.msk [vmem:[#allocation3 + $0x134] sm:$0xf] %vm54_vm0, %v3944_v32  ;;  %v3607_v35 = vld [vmem:[#allocation2 + $0x88] sm:$0xf]  ;;  %v4430_v49 = vshrl.u32 %v4229_v16, 16  ;;  %v4433_v53 = vshll.u32 %v4229_v16, 16  ;;  %v4428_v41 = vsel %vm6670_vm7, %v8073_v30, %v8067_v14 }
 0x286   :  { %4676 = vst.msk [vmem:[#allocation3 + $0xec] sm:$0xf] %vm54_vm0, %v4632_v47  ;;  %v4182_v44 = vld [vmem:[#allocation2 + $0x88] sm:$0xf]  ;;  %v3560_v54 = vsel %vm6913_vm11, %v5917_v23, %v3559_v17  ;;  %v4183_v24 = vld [vmem:[#allocation2 + $0x90] sm:$0xf]  ;;  %4481 = vrot.lane.b32.xlu0 %v4414_v34, %s6520_s26  ;;  %3653 = vrot.lane.b32.xlu2 %v3607_v35, %s6520_s26  ;;  %v4104_v16 = vsel %vm6913_vm11, %v5933_v18, %v4103_v61 }
 0x287   :  { %4198 = vst.msk [vmem:[#allocation3 + $0x110] sm:$0xf] %vm54_vm0, %v4182_v44  ;;  %v3717_v22 = vld [vmem:[#allocation2 + $0x88] sm:$0xf]  ;;  %v4231_v31 = vld [vmem:[#allocation2 + $0x98] sm:$0xf] }
 0x288   :  { %3592 = vst.msk [vmem:[#allocation3 + $0x130] sm:$0xf] %vm54_vm0, %v3560_v54  ;;  %v3718_v4 = vld [vmem:[#allocation2 + $0x8c] sm:$0x1]  ;;  %v3918_v33 = vshrl.u32 %v3717_v22, 16  ;;  %v3921_v63 = vshll.u32 %v3717_v22, 16  ;;  %4483 = vrot.lane.b32.xlu1 %v4428_v41, %s6520_s26 }
 0x289   :  { %v6072_v56 = vld [vmem:[#allocation3 + $0xf0] sm:$0xf]  ;;  %4199 = vst.msk [vmem:[#allocation3 + $0x124] sm:$0xf] %vm54_vm0, %v4183_v24  ;;  %v4545_v20 = vld [vmem:[#allocation2 + $0x80] sm:$0xe]  ;;  %v3400_v58 = vpop.permute.xlu1 %3399  ;;  %v3628_v30 = vpop.permute.xlu0 %3627 }
 0x28a   :  { %v6370_v0 = vld [vmem:[#allocation3 + $0x100] sm:$0xf0]  ;;  %v4432_v37 = vrot.slane %v4430_v49, 4  ;;  %v3920_v8 = vrot.slane %v3918_v33, 4  ;;  %v3923_v50 = vrot.slane %v3921_v63, 5  ;;  %v3927_v52 = vshll.u32 %v3718_v4, 16  ;;  %v3634_v7 = vpop.permute.xlu2 %3633 }
 0x28b   :  { %v4546_v38 = vld [vmem:[#allocation2 + $0x84] sm:$0x1]  ;;  %3431 = vst.msk [vmem:[#allocation3 + $0x118] sm:$0xf] %vm714_vm12, %v3398_v43  ;;  %v4435_v59 = vrot.slane %v4433_v53, 5  ;;  %v5946_v55 = vrot.slane %v4545_v20, 9  ;;  %v6073_v5 = vor.u32 %v6370_v0, %v6072_v56 }
 0x28c   :  { %v4547_v45 = vld [vmem:[#allocation2 + $0x88] sm:$0xe]  ;;  %4156 = vst.msk [vmem:[#allocation3 + $0x44] sm:$0xf] %vm714_vm12, %v4112_v15  ;;  %v3924_v11 = vor.u32 %v3923_v50, %v3920_v8  ;;  %v4548_v26 = vld [vmem:[#allocation2 + $0x8c] sm:$0x1] }
 0x28d   :  { %v4635_v46 = vrot.slane %v4546_v38, 5  ;;  %v5947_v6 = vrot.slane %v4547_v45, 9  ;;  %v4230_v57 = vld [vmem:[#allocation2 + $0x94] sm:$0x1]  ;;  %v4444_v1 = vshrl.u32 %v4231_v31, 16  ;;  %v4447_v21 = vshll.u32 %v4231_v31, 16  ;;  %v8142_v38 = vpop.f32.mrf.mxu1 }
 0x28e   :  { %v4639_v48 = vrot.slane %v4548_v26, 5  ;;  %v3925_v51 = vrot.slane %v3924_v11, 4  ;;  %v3929_v12 = vrot.slane %v3927_v52, 5  ;;  %v4549_v10 = vld [vmem:[#allocation2 + $0x90] sm:$0xe]  ;;  %5283 = vmatmul.bf16.gmra.mxu1 %v6073_v5  ;;  %v4436_v60 = vor.u32 %v4435_v59, %v4432_v37  ;;  %4135 = vrot.lane.b32.xlu2 %v4104_v16, %s6520_s26 }
 0x28f   :  { %v4636_v27 = vsel %vm6913_vm11, %v5946_v55, %v4635_v46  ;;  %v4550_v3 = vld [vmem:[#allocation2 + $0x94] sm:$0x1]  ;;  %v3608_v39 = vld [vmem:[#allocation2 + $0x90] sm:$0xf]  ;;  %v5948_v2 = vrot.slane %v4549_v10, 9  ;;  %v4439_v32 = vshll.u32 %v4230_v57, 16 }
 0x290   :  { %v4640_v25 = vsel %vm6913_vm11, %v5947_v6, %v4639_v48  ;;  %4677 = vst.msk [vmem:[#allocation3 + $0x100] sm:$0xf] %vm54_vm0, %v4636_v27  ;;  %v4643_v62 = vrot.slane %v4550_v3, 5  ;;  %3655 = vrot.lane.b32.xlu0 %v3608_v39, %s6520_s26  ;;  %v4005_v19 = vld [vmem:[#allocation2 + $0x88] sm:$0xe]  ;;  %v3930_v14 = vsel %vm6670_vm7, %v3925_v51, %v3929_v12  ;;  %v4446_v13 = vrot.slane %v4444_v1, 4 }
 0x291   :  { %v4006_v9 = vld [vmem:[#allocation2 + $0x8c] sm:$0x1]  ;;  %4678 = vst.msk [vmem:[#allocation3 + $0x114] sm:$0xf] %vm54_vm0, %v4640_v25  ;;  %v4449_v40 = vrot.slane %v4447_v21, 5  ;;  %v4437_v61 = vrot.slane %v4436_v60, 4  ;;  %v4458_v54 = vpop.permute.xlu0 %4457  ;;  %v4106_v24 = vpop.permute.xlu1 %4105 }
 0x292   :  { %3975 = vst.msk [vmem:[#allocation3 + $0x120] sm:$0xf] %vm54_vm0, %v3930_v14  ;;  %v4644_v29 = vsel %vm6913_vm11, %v5948_v2, %v4643_v62  ;;  %v4232_v18 = vld [vmem:[#allocation2 + $0x9c] sm:$0x1]  ;;  %v5932_v47 = vrot.slane %v4005_v19, 9  ;;  %v4099_v23 = vrot.slane %v4006_v9, 5  ;;  %v4116_v4 = vpop.permute.xlu2 %4115 }
 0x293   :  { %4679 = vst.msk [vmem:[#allocation3 + $0x128] sm:$0xf] %vm54_vm0, %v4644_v29  ;;  %v4441_v17 = vrot.slane %v4439_v32, 5  ;;  %v4450_v35 = vor.u32 %v4449_v40, %v4446_v13  ;;  %v4453_v49 = vshll.u32 %v4232_v18, 16  ;;  %v6092_v22 = vld [vmem:[#allocation3 + $0x118] sm:$0xf] }
 0x294   :  { %3432 = vst.msk [vmem:[#allocation3 + $0x12c] sm:$0xf] %vm714_vm12, %v3400_v58  ;;  %v4100_v44 = vsel %vm6913_vm11, %v5932_v47, %v4099_v23  ;;  %v6338_v63 = vld [vmem:[#allocation3 + $0x4] sm:$0xf]  ;;  %v6341_v50 = vld [vmem:[#allocation3 + $0x18] sm:$0xf0] }
 0x295   :  { %3674 = vst.msk [vmem:[#allocation3 + $0x18] sm:$0xf] %vm714_vm12, %v3628_v30  ;;  %v4442_v53 = vsel %vm6670_vm7, %v4437_v61, %v4441_v17  ;;  %4133 = vrot.lane.b32.xlu1 %v4100_v44, %s6520_s26  ;;  %v4451_v34 = vrot.slane %v4450_v35, 4  ;;  %v4455_v36 = vrot.slane %v4453_v49, 5  ;;  %v6343_v59 = vld [vmem:[#allocation3 + $0x2c] sm:$0xf]  ;;  %v8149_v27 = vpop.f32.mrf.mxu1 }
 0x296   :  { %3677 = vst.msk [vmem:[#allocation3 + $0x54] sm:$0xf] %vm714_vm12, %v3634_v7  ;;  %v6342_v55 = vld [vmem:[#allocation3 + $0x20] sm:$0xf0]  ;;  %v5968_v57 = vld [vmem:[#allocation3 + $0x10] sm:$0xf] }
 0x297   :  { %4505 = vst.msk [vmem:[#allocation3 + $0xc] sm:$0xf] %vm714_vm12, %v4458_v54  ;;  %v4456_v20 = vsel %vm6670_vm7, %v4451_v34, %v4455_v36  ;;  %v5969_v1 = vor.u32 %v6342_v55, %v5968_v57  ;;  %v6346_v12 = vld [vmem:[#allocation3 + $0x40] sm:$0xf0]  ;;  %v6347_v2 = vld [vmem:[#allocation3 + $0x48] sm:$0xf0] }
 0x298   :  { %4485 = vrot.lane.b32.xlu0 %v4442_v53, %s6520_s26  ;;  %4153 = vst.msk [vmem:[#allocation3 + $0x8] sm:$0xf] %vm714_vm12, %v4106_v24  ;;  %v5988_v13 = vld [vmem:[#allocation3 + $0x38] sm:$0xf]  ;;  %v6352_v53 = vld [vmem:[#allocation3 + $0x70] sm:$0xf0] }
 0x299   :  { %4158 = vst.msk [vmem:[#allocation3 + $0x6c] sm:$0xf] %vm714_vm12, %v4116_v4  ;;  %v3632_v43 = vpop.permute.xlu0 %3631  ;;  %v4460_v0 = vpop.permute.xlu1 %4459  ;;  %v5989_v40 = vor.u32 %v6347_v2, %v5988_v13 }
 0x29a   :  { %3676 = vst.msk [vmem:[#allocation3 + $0x40] sm:$0xf] %vm714_vm12, %v3632_v43  ;;  %v3638_v37 = vpop.permute.xlu2 %3637 }
 0x29b   :  { %v6375_v31 = vld [vmem:[#allocation3 + $0x128] sm:$0xf0]  ;;  %4506 = vst.msk [vmem:[#allocation3 + $0x20] sm:$0xf] %vm714_vm12, %v4460_v0 }
 0x29c   :  { %v6093_v33 = vor.u32 %v6375_v31, %v6092_v22  ;;  %v5954_v56 = vld [vmem:[#allocation3 + $0x14] sm:$0xf0]  ;;  %3679 = vst.msk [vmem:[#allocation3 + $0x7c] sm:$0xf] %vm714_vm12, %v3638_v37  ;;  %v6008_v31 = vld [vmem:[#allocation3 + $0x60] sm:$0xf] }
 0x29d   :  { %v5957_v28 = vor.u32 %v6338_v63, %v5954_v56  ;;  %4487 = vrot.lane.b32.xlu1 %v4456_v20, %s6520_s26  ;;  %v6348_v60 = vld [vmem:[#allocation3 + $0x54] sm:$0xf]  ;;  %v6009_v4 = vor.u32 %v6352_v53, %v6008_v31  ;;  %v6357_v37 = vld [vmem:[#allocation3 + $0x98] sm:$0xf0] }
 0x29e   :  { %5288 = vmatmul.bf16.gmra.mxu1 %v6093_v33  ;;  %v6339_v46 = vld [vmem:[#allocation3 + $0xc] sm:$0xf] }
 0x29f   :  { %5302 = vmatmul.bf16.vlgmr.msra.gmra.mxu2 %v5957_v28  ;;  %v5960_v8 = vld [vmem:[#allocation3 + $0x8] sm:$0xf] }
 0x2a0   :  { %v5961_v52 = vor.u32 %v6341_v50, %v5960_v8  ;;  %v6351_v7 = vld [vmem:[#allocation3 + $0x68] sm:$0xf0] }
 0x2a1   :  { %v4462_v42 = vpop.permute.xlu0 %4461  ;;  %v4110_v15 = vpop.permute.xlu1 %4109  ;;  %v5974_v45 = vld [vmem:[#allocation3 + $0x3c] sm:$0xf0] }
 0x2a2   :  { %5351 = vmatmul.bf16.vlgmr.msra.gmra.mxu3 %v5961_v52  ;;  %4507 = vst.msk [vmem:[#allocation3 + $0x34] sm:$0xf] %vm714_vm12, %v4462_v42  ;;  %v4120_v11 = vpop.permute.xlu2 %4119  ;;  %v5977_v26 = vor.u32 %v6343_v59, %v5974_v45  ;;  %v5962_v6 = vld [vmem:[#allocation3 + $0x1c] sm:$0xf0] }
 0x2a3   :  { %4155 = vst.msk [vmem:[#allocation3 + $0x30] sm:$0xf] %vm714_vm12, %v4110_v15  ;;  %v5965_v5 = vor.u32 %v6339_v46, %v5962_v6  ;;  %v6353_v35 = vld [vmem:[#allocation3 + $0x7c] sm:$0xf]  ;;  %v6028_v15 = vld [vmem:[#allocation3 + $0x88] sm:$0xf] }
 0x2a4   :  { %4160 = vst.msk [vmem:[#allocation3 + $0x94] sm:$0xf] %vm714_vm12, %v4120_v11  ;;  %v6029_v6 = vor.u32 %v6357_v37, %v6028_v15 }
 0x2a5   :  { %5400 = vmatmul.bf16.vlgmr.msra.gmra.mxu0 %v5965_v5 }
 0x2a9   :  { %v3636_v21 = vpop.permute.xlu0 %3635  ;;  %v4464_v48 = vpop.permute.xlu1 %4463  ;;  %v6344_v19 = vld [vmem:[#allocation3 + $0x34] sm:$0xf] }
 0x2aa   :  { %3678 = vst.msk [vmem:[#allocation3 + $0x68] sm:$0xf] %vm714_vm12, %v3636_v21  ;;  %v5980_v51 = vld [vmem:[#allocation3 + $0x30] sm:$0xf] }
 0x2ab   :  { %4508 = vst.msk [vmem:[#allocation3 + $0x48] sm:$0xf] %vm714_vm12, %v4464_v48  ;;  %v5981_v10 = vor.u32 %v6346_v12, %v5980_v51  ;;  %v6356_v20 = vld [vmem:[#allocation3 + $0x90] sm:$0xf0] }
 0x2ac   :  { %v3642_v41 = vpop.permute.xlu2 %3641 }
 0x2ad   :  { %3681 = vst.msk [vmem:[#allocation3 + $0xa4] sm:$0xf] %vm714_vm12, %v3642_v41 }
 0x2ae   :  { %6254 = vmatmul.msk.bf16.vlgmr.msra.gmra.mxu1 %vm2523_vm13, %v5969_v1 }
 0x2af   :  { %5307 = vmatmul.bf16.gmra.mxu2 %v5977_v26 }
 0x2b1   :  { %v4114_v39 = vpop.permute.xlu1 %4113  ;;  %v5994_v25 = vld [vmem:[#allocation3 + $0x64] sm:$0xf0] }
 0x2b2   :  { %5356 = vmatmul.bf16.gmra.mxu3 %v5981_v10  ;;  %v4466_v3 = vpop.permute.xlu0 %4465  ;;  %v5997_v16 = vor.u32 %v6348_v60, %v5994_v25  ;;  %v5982_v9 = vld [vmem:[#allocation3 + $0x44] sm:$0xf0]  ;;  %4157 = vst.msk [vmem:[#allocation3 + $0x58] sm:$0xf] %vm714_vm12, %v4114_v39  ;;  %v6362_v60 = vld [vmem:[#allocation3 + $0xc0] sm:$0xf0] }
 0x2b3   :  { %4509 = vst.msk [vmem:[#allocation3 + $0x5c] sm:$0xf] %vm714_vm12, %v4466_v3  ;;  %v5985_v32 = vor.u32 %v6344_v19, %v5982_v9 }
 0x2b4   :  { %v6358_v52 = vld [vmem:[#allocation3 + $0xa4] sm:$0xf] }
 0x2b5   :  { %v4124_v62 = vpop.permute.xlu2 %4123  ;;  %v8155_v14 = vpop.f32.mrf.mxu1  ;;  %5405 = vmatmul.bf16.gmra.mxu0 %v5985_v32  ;;  %v6048_v32 = vld [vmem:[#allocation3 + $0xb0] sm:$0xf] }
 0x2b6   :  { %4162 = vst.msk [vmem:[#allocation3 + $0xbc] sm:$0xf] %vm714_vm12, %v4124_v62  ;;  %v6049_v13 = vor.u32 %v6362_v60, %v6048_v32 }
 0x2b9   :  { %v4468_v58 = vpop.permute.xlu1 %4467  ;;  %v6000_v18 = vld [vmem:[#allocation3 + $0x58] sm:$0xf] }
 0x2ba   :  { %4510 = vst.msk [vmem:[#allocation3 + $0x70] sm:$0xf] %vm714_vm12, %v4468_v58  ;;  %v6001_v47 = vor.u32 %v6351_v7, %v6000_v18  ;;  %v6349_v36 = vld [vmem:[#allocation3 + $0x5c] sm:$0xf] }
 0x2bb   :  { %v3640_v29 = vpop.permute.xlu0 %3639 }
 0x2bc   :  { %3680 = vst.msk [vmem:[#allocation3 + $0x90] sm:$0xf] %vm714_vm12, %v3640_v29 }
 0x2bd   :  { %v8161_v61 = vpop.f32.mrf.mxu1  ;;  %v6361_v48 = vld [vmem:[#allocation3 + $0xb8] sm:$0xf0] }
 0x2be   :  { %6255 = vmatmul.msk.bf16.gmra.mxu1 %vm2523_vm13, %v5989_v40 }
 0x2bf   :  { %5312 = vmatmul.bf16.gmra.mxu2 %v5997_v16  ;;  %v3646_v30 = vpop.permute.xlu2 %3645 }
 0x2c0   :  { %3683 = vst.msk [vmem:[#allocation3 + $0xcc] sm:$0xf] %vm714_vm12, %v3646_v30 }
 0x2c1   :  { %v4118_v17 = vpop.permute.xlu1 %4117  ;;  %v6002_v54 = vld [vmem:[#allocation3 + $0x6c] sm:$0xf0] }
 0x2c2   :  { %5361 = vmatmul.bf16.gmra.mxu3 %v6001_v47  ;;  %4159 = vst.msk [vmem:[#allocation3 + $0x80] sm:$0xf] %vm714_vm12, %v4118_v17  ;;  %v6005_v22 = vor.u32 %v6349_v36, %v6002_v54 }
 0x2c3   :  { %v4470_v23 = vpop.permute.xlu0 %4469  ;;  %v6014_v49 = vld [vmem:[#allocation3 + $0x8c] sm:$0xf0] }
 0x2c4   :  { %4511 = vst.msk [vmem:[#allocation3 + $0x84] sm:$0xf] %vm714_vm12, %v4470_v23  ;;  %v6017_v34 = vor.u32 %v6353_v35, %v6014_v49  ;;  %v6367_v49 = vld [vmem:[#allocation3 + $0xe8] sm:$0xf0] }
 0x2c5   :  { %5410 = vmatmul.bf16.gmra.mxu0 %v6005_v22  ;;  %v6068_v22 = vld [vmem:[#allocation3 + $0xd8] sm:$0xf] }
 0x2c6   :  { %v6069_v31 = vor.u32 %v6367_v49, %v6068_v22 }
 0x2c7   :  { %v4128_v44 = vpop.permute.xlu2 %4127  ;;  %v8166_v24 = vpop.f32.mrf.mxu1  ;;  %v6363_v3 = vld [vmem:[#allocation3 + $0xcc] sm:$0xf] }
 0x2c8   :  { %4164 = vst.msk [vmem:[#allocation3 + $0xe4] sm:$0xf] %vm714_vm12, %v4128_v44 }
 0x2c9   :  { %v4472_v63 = vpop.permute.xlu1 %4471  ;;  %v6020_v28 = vld [vmem:[#allocation3 + $0x80] sm:$0xf] }
 0x2ca   :  { %4512 = vst.msk [vmem:[#allocation3 + $0x98] sm:$0xf] %vm714_vm12, %v4472_v63  ;;  %v6021_v0 = vor.u32 %v6356_v20, %v6020_v28 }
 0x2cb   :  { %v6354_v55 = vld [vmem:[#allocation3 + $0x84] sm:$0xf] }
 0x2cc   :  { %v3644_v33 = vpop.permute.xlu0 %3643 }
 0x2cd   :  { %3682 = vst.msk [vmem:[#allocation3 + $0xb8] sm:$0xf] %vm714_vm12, %v3644_v33 }
 0x2ce   :  { %6256 = vmatmul.msk.bf16.gmra.mxu1 %vm2523_vm13, %v6009_v4 }
 0x2cf   :  { %5317 = vmatmul.bf16.gmra.mxu2 %v6017_v34  ;;  %v3650_v56 = vpop.permute.xlu2 %3649  ;;  %v8172_v43 = vpop.f32.mrf.mxu1  ;;  %v6366_v30 = vld [vmem:[#allocation3 + $0xe0] sm:$0xf0] }
 0x2d0   :  { %3685 = vst.msk [vmem:[#allocation3 + $0xf4] sm:$0xf] %vm714_vm12, %v3650_v56 }
 0x2d1   :  { %v4122_v50 = vpop.permute.xlu1 %4121  ;;  %v6022_v11 = vld [vmem:[#allocation3 + $0x94] sm:$0xf0] }
 0x2d2   :  { %5366 = vmatmul.bf16.gmra.mxu3 %v6021_v0  ;;  %4161 = vst.msk [vmem:[#allocation3 + $0xa8] sm:$0xf] %vm714_vm12, %v4122_v50  ;;  %v6025_v46 = vor.u32 %v6354_v55, %v6022_v11  ;;  %v6088_v11 = vld [vmem:[#allocation3 + $0x100] sm:$0xf] }
 0x2d4   :  { %v4474_v8 = vpop.permute.xlu0 %4473  ;;  %v6034_v42 = vld [vmem:[#allocation3 + $0xb4] sm:$0xf0] }
 0x2d5   :  { %4513 = vst.msk [vmem:[#allocation3 + $0xac] sm:$0xf] %vm714_vm12, %v4474_v8  ;;  %v6037_v45 = vor.u32 %v6358_v52, %v6034_v42  ;;  %5415 = vmatmul.bf16.gmra.mxu0 %v6025_v46  ;;  %v6372_v52 = vld [vmem:[#allocation3 + $0x110] sm:$0xf0] }
 0x2d6   :  { %v6089_v46 = vor.u32 %v6372_v52, %v6088_v11 }
 0x2d7   :  { %v4132_v59 = vpop.permute.xlu2 %4131  ;;  %v8177_v26 = vpop.f32.mrf.mxu1  ;;  %v6368_v17 = vld [vmem:[#allocation3 + $0xf4] sm:$0xf] }
 0x2d8   :  { %4166 = vst.msk [vmem:[#allocation3 + $0x10c] sm:$0xf] %vm714_vm12, %v4132_v59 }
 0x2d9   :  { %v4476_v57 = vpop.permute.xlu1 %4475  ;;  %v6040_v21 = vld [vmem:[#allocation3 + $0xa8] sm:$0xf] }
 0x2da   :  { %4514 = vst.msk [vmem:[#allocation3 + $0xc0] sm:$0xf] %vm714_vm12, %v4476_v57  ;;  %v6041_v51 = vor.u32 %v6361_v48, %v6040_v21  ;;  %v6377_v48 = vld [vmem:[#allocation3 + $0x138] sm:$0xf0] }
 0x2dc   :  { %v6359_v62 = vld [vmem:[#allocation3 + $0xac] sm:$0xf] }
 0x2de   :  { %6257 = vmatmul.msk.bf16.gmra.mxu1 %vm2523_vm13, %v6029_v6  ;;  %v3648_v5 = vpop.permute.xlu0 %3647 }
 0x2df   :  { %5322 = vmatmul.bf16.gmra.mxu2 %v6037_v45  ;;  %3684 = vst.msk [vmem:[#allocation3 + $0xe0] sm:$0xf] %vm714_vm12, %v3648_v5  ;;  %v8183_v41 = vpop.f32.mrf.mxu1  ;;  %v6371_v56 = vld [vmem:[#allocation3 + $0x108] sm:$0xf0] }
 0x2e0   :  { %v3654_v1 = vpop.permute.xlu2 %3653 }
 0x2e1   :  { %3687 = vst.msk [vmem:[#allocation3 + $0x11c] sm:$0xf] %vm714_vm12, %v3654_v1  ;;  %v6042_v16 = vld [vmem:[#allocation3 + $0xbc] sm:$0xf0] }
 0x2e2   :  { %5371 = vmatmul.bf16.gmra.mxu3 %v6041_v51  ;;  %v4126_v10 = vpop.permute.xlu1 %4125  ;;  %v6045_v9 = vor.u32 %v6359_v62, %v6042_v16 }
 0x2e3   :  { %4163 = vst.msk [vmem:[#allocation3 + $0xd0] sm:$0xf] %vm714_vm12, %v4126_v10  ;;  %v6108_v10 = vld [vmem:[#allocation3 + $0x128] sm:$0xf] }
 0x2e4   :  { %v6109_v60 = vor.u32 %v6377_v48, %v6108_v10 }
 0x2e5   :  { %5420 = vmatmul.bf16.gmra.mxu0 %v6045_v9 }
 0x2e6   :  { %v4478_v12 = vpop.permute.xlu0 %4477  ;;  %v6054_v39 = vld [vmem:[#allocation3 + $0xdc] sm:$0xf0] }
 0x2e7   :  { %4515 = vst.msk [vmem:[#allocation3 + $0xd4] sm:$0xf] %vm714_vm12, %v4478_v12  ;;  %v6057_v2 = vor.u32 %v6363_v3, %v6054_v39 }
 0x2e8   :  { %v4136_v25 = vpop.permute.xlu2 %4135  ;;  %v6373_v8 = vld [vmem:[#allocation3 + $0x11c] sm:$0xf] }
 0x2e9   :  { %4168 = vst.msk [vmem:[#allocation3 + $0x134] sm:$0xf] %vm714_vm12, %v4136_v25 }
 0x2ea   :  { %v8188_v19 = vpop.f32.mrf.mxu1  ;;  %v4480_v29 = vpop.permute.xlu1 %4479  ;;  %v6060_v58 = vld [vmem:[#allocation3 + $0xd0] sm:$0xf] }
 0x2eb   :  { %4516 = vst.msk [vmem:[#allocation3 + $0xe8] sm:$0xf] %vm714_vm12, %v4480_v29  ;;  %v6061_v7 = vor.u32 %v6366_v30, %v6060_v58 }
 0x2ee   :  { %6258 = vmatmul.msk.bf16.gmra.mxu1 %vm2523_vm13, %v6049_v13  ;;  %v6364_v44 = vld [vmem:[#allocation3 + $0xd4] sm:$0xf] }
 0x2ef   :  { %5327 = vmatmul.bf16.gmra.mxu2 %v6057_v2  ;;  %v8219_v2 = vld [vmem:[%s8278_s4] ss:$0 sm:$0xff]  ;;  %s6524_s4 = smov [#allocation9]  }
 0x2f0   :  { %v3652_v40 = vpop.permute.xlu0 %3651  ;;  %v6376_v57 = vld [vmem:[#allocation3 + $0x130] sm:$0xf0]  ;;  %v5255_v16 = vadd.f32 %v8219_v2, %v8142_v38  ;;  %s5526_s12 = sshll.u32 %s6524_s4, 4  ;;  %s5527_s12 = int_to_ptr.vmem [resolvable:$true] %s5526_s12 }
 0x2f1   :  { %3686 = vst.msk [vmem:[#allocation3 + $0x108] sm:$0xf] %vm714_vm12, %v3652_v40 }
 0x2f2   :  { %v8194_v18 = vpop.f32.mrf.mxu1  ;;  %5376 = vmatmul.bf16.gmra.mxu3 %v6061_v7  ;;  %v4130_v23 = vpop.permute.xlu1 %4129  ;;  %v6062_v34 = vld [vmem:[#allocation3 + $0xe4] sm:$0xf0]  ;;  %v5257_v7 = vadd.f32 %v8219_v2, %v8149_v27 }
 0x2f3   :  { %4165 = vst.msk [vmem:[#allocation3 + $0xf8] sm:$0xf] %vm714_vm12, %v4130_v23  ;;  %v6065_v54 = vor.u32 %v6364_v44, %v6062_v34 }
 0x2f5   :  { %5425 = vmatmul.bf16.gmra.mxu0 %v6065_v54  ;;  %v5260_v54 = vadd.f32 %v8219_v2, %v8155_v14 }
 0x2f8   :  { %v4482_v47 = vpop.permute.xlu0 %4481  ;;  %v6074_v35 = vld [vmem:[#allocation3 + $0x104] sm:$0xf0] }
 0x2f9   :  { %4517 = vst.msk [vmem:[#allocation3 + $0xfc] sm:$0xf] %vm714_vm12, %v4482_v47  ;;  %v6077_v53 = vor.u32 %v6368_v17, %v6074_v35 }
 0x2fa   :  { %v4484_v33 = vpop.permute.xlu1 %4483  ;;  %v6080_v63 = vld [vmem:[#allocation3 + $0xf8] sm:$0xf] }
 0x2fb   :  { %v8198_v36 = vpop.f32.mrf.mxu1  ;;  %4518 = vst.msk [vmem:[#allocation3 + $0x110] sm:$0xf] %vm714_vm12, %v4484_v33  ;;  %v6081_v20 = vor.u32 %v6371_v56, %v6080_v63 }
 0x2fe   :  { %6259 = vmatmul.msk.bf16.gmra.mxu1 %vm2523_vm13, %v6069_v31 }
 0x2ff   :  { %5332 = vmatmul.bf16.gmra.mxu2 %v6077_v53 }
 0x300   :  { %v6369_v15 = vld [vmem:[#allocation3 + $0xfc] sm:$0xf] }
 0x302   :  { %v3656_v4 = vpop.permute.xlu0 %3655  ;;  %5381 = vmatmul.bf16.gmra.mxu3 %v6081_v20  ;;  %v6082_v59 = vld [vmem:[#allocation3 + $0x10c] sm:$0xf0] }
 0x303   :  { %3688 = vst.msk [vmem:[#allocation3 + $0x130] sm:$0xf] %vm714_vm12, %v3656_v4  ;;  %v8203_v28 = vpop.f32.mrf.mxu1  ;;  %v6085_v55 = vor.u32 %v6369_v15, %v6082_v59 }
 0x305   :  { %5430 = vmatmul.bf16.gmra.mxu0 %v6085_v55 }
 0x307   :  { %v4134_v37 = vpop.permute.xlu1 %4133 }
 0x308   :  { %4167 = vst.msk [vmem:[#allocation3 + $0x120] sm:$0xf] %vm714_vm12, %v4134_v37  ;;  %v5262_v37 = vadd.f32 %v8219_v2, %v8161_v61 }
 0x30a   :  { %v4486_v0 = vpop.permute.xlu0 %4485  ;;  %v6094_v50 = vld [vmem:[#allocation3 + $0x12c] sm:$0xf0] }
 0x30b   :  { %4519 = vst.msk [vmem:[#allocation3 + $0x124] sm:$0xf] %vm714_vm12, %v4486_v0  ;;  %v6097_v42 = vor.u32 %v6373_v8, %v6094_v50  ;;  %v8207_v45 = vpop.f32.mrf.mxu1 }
 0x30e   :  { %6260 = vmatmul.msk.bf16.gmra.mxu1 %vm2523_vm13, %v6089_v46  ;;  %v5265_v46 = vadd.f32 %v8219_v2, %v8166_v24 }
 0x30f   :  { %5337 = vmatmul.bf16.gmra.mxu2 %v6097_v42  ;;  %v4488_v6 = vpop.permute.xlu1 %4487  ;;  %v6100_v5 = vld [vmem:[#allocation3 + $0x120] sm:$0xf] }
 0x310   :  { %4520 = vst.msk [vmem:[#allocation3 + $0x138] sm:$0xf] %vm714_vm12, %v4488_v6  ;;  %v6101_v21 = vor.u32 %v6376_v57, %v6100_v5 }
 0x312   :  { %5386 = vmatmul.bf16.gmra.mxu3 %v6101_v21  ;;  %v6374_v51 = vld [vmem:[#allocation3 + $0x124] sm:$0xf] }
 0x313   :  { %v8211_v1 = vpop.f32.mrf.mxu1 }
 0x317   :  { %v6102_v12 = vld [vmem:[#allocation3 + $0x134] sm:$0xf0] }
 0x318   :  { %v6105_v3 = vor.u32 %v6374_v51, %v6102_v12 }
 0x31a   :  { %5435 = vmatmul.bf16.gmra.mxu0 %v6105_v3  ;;  %v5267_v3 = vadd.f32 %v8219_v2, %v8172_v43 }
 0x31b   :  { %v8213_v39 = vpop.f32.mrf.mxu1 }
 0x31e   :  { %6261 = vmatmul.msk.bf16.gmra.mxu1 %vm2523_vm13, %v6109_v60 }
 0x322   :  { %v5303_v25 = vpop.f32.mrf.mxu2  ;;  %v5401_v29 = vpop.f32.mrf.mxu0 }
 0x323   :  { %v8221_v62 = vpop.f32.mrf.mxu1  ;;  %v5304_v9 = vadd.f32 %v5303_v25, %v5255_v16 }
 0x325   :  { %v5352_v13 = vpop.f32.mrf.mxu3 }
 0x326   :  { %v5353_v40 = vadd.f32 %v5352_v13, %v5304_v9 }
 0x328   :  { %v5402_v58 = vadd.f32 %v5401_v29, %v5353_v40 }
 0x32a   :  { %v5305_v32 = vpop.f32.mrf.mxu2  ;;  %v5403_v44 = vpop.f32.mrf.mxu0 }
 0x32b   :  { %v5450_v30 = vpop.f32.mrf.mxu1  ;;  %v5306_v23 = vadd.f32 %v5305_v32, %v5257_v7 }
 0x32c   :  { %v5451_v47 = vadd.f32 %v5450_v30, %v5402_v58  ;;  %v5270_v58 = vadd.f32 %v8219_v2, %v8177_v26 }
 0x32d   :  { %v5354_v49 = vpop.f32.mrf.mxu3 }
 0x32e   :  { %v5490_v17 = vmax.f32 %v5451_v47, 0.0  ;;  %v5355_v53 = vadd.f32 %v5354_v49, %v5306_v23 }
 0x330   :  { %5506 = vst.msk [vmem:[#allocation9] sm:$0xff] %vm2523_vm13, %v5490_v17  ;;  %v5404_v38 = vadd.f32 %v5403_v44, %v5355_v53  ;;  %v5272_v44 = vadd.f32 %v8219_v2, %v8183_v41 }
 0x332   :  { %v5308_v35 = vpop.f32.mrf.mxu2  ;;  %v5406_v56 = vpop.f32.mrf.mxu0 }
 0x333   :  { %v5452_v34 = vpop.f32.mrf.mxu1  ;;  %v5309_v31 = vadd.f32 %v5308_v35, %v5260_v54 }
 0x334   :  { %v5453_v22 = vadd.f32 %v5452_v34, %v5404_v38 }
 0x335   :  { %v5357_v63 = vpop.f32.mrf.mxu3 }
 0x336   :  { %v5491_v4 = vmax.f32 %v5453_v22, 0.0  ;;  %v5358_v27 = vadd.f32 %v5357_v63, %v5309_v31 }
 0x338   :  { %5507 = vst.msk [vmem:[#allocation9 + $0x8] sm:$0xff] %vm2523_vm13, %v5491_v4  ;;  %v5407_v20 = vadd.f32 %v5406_v56, %v5358_v27  ;;  %v5275_v27 = vadd.f32 %v8219_v2, %v8188_v19 }
 0x33a   :  { %v5310_v33 = vpop.f32.mrf.mxu2  ;;  %v5408_v59 = vpop.f32.mrf.mxu0 }
 0x33b   :  { %v5455_v0 = vpop.f32.mrf.mxu1  ;;  %v5311_v50 = vadd.f32 %v5310_v33, %v5262_v37 }
 0x33c   :  { %v5456_v8 = vadd.f32 %v5455_v0, %v5407_v20 }
 0x33d   :  { %v5359_v15 = vpop.f32.mrf.mxu3 }
 0x33e   :  { %v5492_v52 = vmax.f32 %v5456_v8, 0.0  ;;  %v5360_v14 = vadd.f32 %v5359_v15, %v5311_v50  ;;  %v5277_v15 = vadd.f32 %v8219_v2, %v8194_v18 }
 0x340   :  { %5508 = vst.msk [vmem:[#allocation9 + $0x10] sm:$0xff] %vm2523_vm13, %v5492_v52  ;;  %v5409_v55 = vadd.f32 %v5408_v59, %v5360_v14 }
 0x342   :  { %v5313_v42 = vpop.f32.mrf.mxu2  ;;  %v5411_v51 = vpop.f32.mrf.mxu0 }
 0x343   :  { %v5457_v11 = vpop.f32.mrf.mxu1  ;;  %v5314_v5 = vadd.f32 %v5313_v42, %v5265_v46 }
 0x344   :  { %v5458_v6 = vadd.f32 %v5457_v11, %v5409_v55 }
 0x345   :  { %v5362_v48 = vpop.f32.mrf.mxu3 }
 0x346   :  { %v5493_v57 = vmax.f32 %v5458_v6, 0.0  ;;  %v5363_v61 = vadd.f32 %v5362_v48, %v5314_v5 }
 0x348   :  { %5509 = vst.msk [vmem:[#allocation9 + $0x18] sm:$0xff] %vm2523_vm13, %v5493_v57  ;;  %v5412_v12 = vadd.f32 %v5411_v51, %v5363_v61 }
 0x34a   :  { %v5315_v21 = vpop.f32.mrf.mxu2  ;;  %v5413_v13 = vpop.f32.mrf.mxu0 }
 0x34b   :  { %v5460_v10 = vpop.f32.mrf.mxu1  ;;  %v5316_v25 = vadd.f32 %v5315_v21, %v5267_v3  ;;  %v5280_v21 = vadd.f32 %v8219_v2, %v8198_v36 }
 0x34c   :  { %v5461_v60 = vadd.f32 %v5460_v10, %v5412_v12 }
 0x34d   :  { %v5364_v32 = vpop.f32.mrf.mxu3 }
 0x34e   :  { %v5494_v16 = vmax.f32 %v5461_v60, 0.0  ;;  %v5365_v24 = vadd.f32 %v5364_v32, %v5316_v25 }
 0x350   :  { %5510 = vst.msk [vmem:[#allocation9 + $0x20] sm:$0xff] %vm2523_vm13, %v5494_v16  ;;  %v5414_v40 = vadd.f32 %v5413_v13, %v5365_v24  ;;  %v5282_v16 = vadd.f32 %v8219_v2, %v8203_v28 }
 0x352   :  { %v5318_v9 = vpop.f32.mrf.mxu2  ;;  %v5416_v35 = vpop.f32.mrf.mxu0 }
 0x353   :  { %v5462_v29 = vpop.f32.mrf.mxu1  ;;  %v5319_v7 = vadd.f32 %v5318_v9, %v5270_v58 }
 0x354   :  { %v5463_v30 = vadd.f32 %v5462_v29, %v5414_v40 }
 0x355   :  { %v5367_v17 = vpop.f32.mrf.mxu3 }
 0x356   :  { %v5495_v47 = vmax.f32 %v5463_v30, 0.0  ;;  %v5368_v43 = vadd.f32 %v5367_v17, %v5319_v7  ;;  %v5285_v7 = vadd.f32 %v8219_v2, %v8207_v45 }
 0x358   :  { %5511 = vst.msk [vmem:[#allocation9 + $0x28] sm:$0xff] %vm2523_vm13, %v5495_v47  ;;  %v5417_v49 = vadd.f32 %v5416_v35, %v5368_v43 }
 0x35a   :  { %v5320_v23 = vpop.f32.mrf.mxu2  ;;  %v5418_v4 = vpop.f32.mrf.mxu0 }
 0x35b   :  { %v5465_v53 = vpop.f32.mrf.mxu1  ;;  %v5321_v34 = vadd.f32 %v5320_v23, %v5272_v44 }
 0x35c   :  { %v5466_v38 = vadd.f32 %v5465_v53, %v5417_v49 }
 0x35d   :  { %v5369_v31 = vpop.f32.mrf.mxu3 }
 0x35e   :  { %v5496_v54 = vmax.f32 %v5466_v38, 0.0  ;;  %v5370_v26 = vadd.f32 %v5369_v31, %v5321_v34  ;;  %v5287_v38 = vadd.f32 %v8219_v2, %v8211_v1 }
 0x360   :  { %5512 = vst.msk [vmem:[#allocation9 + $0x30] sm:$0xff] %vm2523_vm13, %v5496_v54  ;;  %v5419_v33 = vadd.f32 %v5418_v4, %v5370_v26 }
 0x362   :  { %v5323_v22 = vpop.f32.mrf.mxu2  ;;  %v5421_v50 = vpop.f32.mrf.mxu0 }
 0x363   :  { %v5467_v63 = vpop.f32.mrf.mxu1  ;;  %v5324_v20 = vadd.f32 %v5323_v22, %v5275_v27  ;;  %v5290_v27 = vadd.f32 %v8219_v2, %v8213_v39 }
 0x364   :  { %v5468_v56 = vadd.f32 %v5467_v63, %v5419_v33 }
 0x365   :  { %v5372_v8 = vpop.f32.mrf.mxu3 }
 0x366   :  { %v5497_v0 = vmax.f32 %v5468_v56, 0.0  ;;  %v5373_v41 = vadd.f32 %v5372_v8, %v5324_v20 }
 0x368   :  { %5513 = vst.msk [vmem:[#allocation9 + $0x38] sm:$0xff] %vm2523_vm13, %v5497_v0  ;;  %v5422_v52 = vadd.f32 %v5421_v50, %v5373_v41 }
 0x36a   :  { %v5325_v37 = vpop.f32.mrf.mxu2  ;;  %v5423_v6 = vpop.f32.mrf.mxu0 }
 0x36b   :  { %v5470_v42 = vpop.f32.mrf.mxu1  ;;  %v5326_v59 = vadd.f32 %v5325_v37, %v5277_v15 }
 0x36c   :  { %v5471_v14 = vadd.f32 %v5470_v42, %v5422_v52  ;;  %v5292_v42 = vadd.f32 %v8219_v2, %v8221_v62 }
 0x36d   :  { %v5374_v46 = vpop.f32.mrf.mxu3 }
 0x36e   :  { %v5498_v55 = vmax.f32 %v5471_v14, 0.0  ;;  %v5375_v19 = vadd.f32 %v5374_v46, %v5326_v59 }
 0x370   :  { %5514 = vst.msk [vmem:[#allocation9 + $0x40] sm:$0xff] %vm2523_vm13, %v5498_v55  ;;  %v5424_v5 = vadd.f32 %v5423_v6, %v5375_v19 }
 0x372   :  { %v5328_v11 = vpop.f32.mrf.mxu2  ;;  %v5426_v3 = vpop.f32.mrf.mxu0 }
 0x373   :  { %v5472_v57 = vpop.f32.mrf.mxu1  ;;  %v5329_v61 = vadd.f32 %v5328_v11, %v5280_v21 }
 0x374   :  { %v5473_v48 = vadd.f32 %v5472_v57, %v5424_v5 }
 0x375   :  { %v5377_v10 = vpop.f32.mrf.mxu3 }
 0x376   :  { %v5499_v51 = vmax.f32 %v5473_v48, 0.0  ;;  %v5378_v18 = vadd.f32 %v5377_v10, %v5329_v61 }
 0x378   :  { %5515 = vst.msk [vmem:[#allocation9 + $0x48] sm:$0xff] %vm2523_vm13, %v5499_v51  ;;  %v5427_v60 = vadd.f32 %v5426_v3, %v5378_v18 }
 0x37a   :  { %v5330_v12 = vpop.f32.mrf.mxu2  ;;  %v5428_v29 = vpop.f32.mrf.mxu0 }
 0x37b   :  { %v5475_v25 = vpop.f32.mrf.mxu1  ;;  %v5331_v32 = vadd.f32 %v5330_v12, %v5282_v16 }
 0x37c   :  { %v5476_v9 = vadd.f32 %v5475_v25, %v5427_v60 }
 0x37d   :  { %v5379_v40 = vpop.f32.mrf.mxu3 }
 0x37e   :  { %v5500_v24 = vmax.f32 %v5476_v9, 0.0  ;;  %v5380_v36 = vadd.f32 %v5379_v40, %v5331_v32 }
 0x380   :  { %5516 = vst.msk [vmem:[#allocation9 + $0x50] sm:$0xff] %vm2523_vm13, %v5500_v24  ;;  %v5429_v58 = vadd.f32 %v5428_v29, %v5380_v36 }
 0x382   :  { %v5333_v13 = vpop.f32.mrf.mxu2  ;;  %v5431_v49 = vpop.f32.mrf.mxu0 }
 0x383   :  { %v5477_v30 = vpop.f32.mrf.mxu1  ;;  %v5334_v23 = vadd.f32 %v5333_v13, %v5285_v7 }
 0x384   :  { %v5478_v47 = vadd.f32 %v5477_v30, %v5429_v58 }
 0x385   :  { %v5382_v35 = vpop.f32.mrf.mxu3 }
 0x386   :  { %v5501_v17 = vmax.f32 %v5478_v47, 0.0  ;;  %v5383_v28 = vadd.f32 %v5382_v35, %v5334_v23 }
 0x388   :  { %5517 = vst.msk [vmem:[#allocation9 + $0x58] sm:$0xff] %vm2523_vm13, %v5501_v17  ;;  %v5432_v53 = vadd.f32 %v5431_v49, %v5383_v28 }
 0x38a   :  { %v5335_v43 = vpop.f32.mrf.mxu2  ;;  %v5433_v4 = vpop.f32.mrf.mxu0 }
 0x38b   :  { %v5480_v44 = vpop.f32.mrf.mxu1  ;;  %v5336_v54 = vadd.f32 %v5335_v43, %v5287_v38 }
 0x38c   :  { %v5481_v34 = vadd.f32 %v5480_v44, %v5432_v53 }
 0x38d   :  { %v5384_v31 = vpop.f32.mrf.mxu3 }
 0x38e   :  { %v5502_v22 = vmax.f32 %v5481_v34, 0.0  ;;  %v5385_v45 = vadd.f32 %v5384_v31, %v5336_v54 }
 0x390   :  { %5518 = vst.msk [vmem:[#allocation9 + $0x60] sm:$0xff] %vm2523_vm13, %v5502_v22  ;;  %v5434_v33 = vadd.f32 %v5433_v4, %v5385_v45 }
 0x392   :  { %v5338_v26 = vpop.f32.mrf.mxu2 }
 0x393   :  { %v5482_v63 = vpop.f32.mrf.mxu1  ;;  %v5339_v20 = vadd.f32 %v5338_v26, %v5290_v27 }
 0x394   :  { %v5483_v56 = vadd.f32 %v5482_v63, %v5434_v33 }
 0x395   :  { %v5387_v37 = vpop.f32.mrf.mxu3 }
 0x396   :  { %v5503_v0 = vmax.f32 %v5483_v56, 0.0  ;;  %v5388_v1 = vadd.f32 %v5387_v37, %v5339_v20 }
 0x397   :  { %v5436_v8 = vpop.f32.mrf.mxu0 }
 0x398   :  { %5519 = vst.msk [vmem:[#allocation9 + $0x68] sm:$0xff] %vm2523_vm13, %v5503_v0  ;;  %v5437_v41 = vadd.f32 %v5436_v8, %v5388_v1 }
 0x39a   :  { %v5340_v52 = vpop.f32.mrf.mxu2 }
 0x39b   :  { %v5485_v50 = vpop.f32.mrf.mxu1  ;;  %v5341_v14 = vadd.f32 %v5340_v52, %v5292_v42 }
 0x39c   :  { %v5486_v15 = vadd.f32 %v5485_v50, %v5437_v41 }
 0x39d   :  { %v5389_v55 = vpop.f32.mrf.mxu3 }
 0x39e   :  { %v5504_v59 = vmax.f32 %v5486_v15, 0.0  ;;  %v5390_v39 = vadd.f32 %v5389_v55, %v5341_v14 }
 0x39f   :  { %v5438_v11 = vpop.f32.mrf.mxu0 }
 0x3a0   :  { %5520 = vst.msk [vmem:[#allocation9 + $0x70] sm:$0xff] %vm2523_vm13, %v5504_v59  ;;  %v5439_v46 = vadd.f32 %v5438_v11, %v5390_v39 }
 0x3a3   :  { %v5487_v19 = vpop.f32.mrf.mxu1 }
 0x3a4   :  { %v5488_v6 = vadd.f32 %v5487_v19, %v5439_v46 }
 0x3a6   :  { %v5505_v2 = vmax.f32 %v5488_v6, 0.0 }
 0x3a8   :  { %5521 = vst.msk [vmem:[#allocation9 + $0x78] sm:$0xff] %vm2523_vm13, %v5505_v2 }
 0x3a9   :  { %5534 = dma.vmem_to_hbm [thread:$0]  %s5527_s12, 2048, %s5529_s15, [#allocation6], %s6525_s16, %s6525_s16, %s6526_s17  }
 0x3aa   :  { %6517 = dma.done.wait [#allocation6], 2048  }
 0x3ab   :  { %6518 = vsyncadd [#allocation6], 4294965248 }
 0x3ac   :  { %5539 = vsyncpa [#allocation5], 1 }
 0x3ad   :  { %5540 = vsyncpa [#allocation8], 1 }
 0x3ae   :  { %5541 = vsyncpa [#allocation6], 1 }

</bundles_post_ra>
